<compile_context>
chip_gen: v5e
topology: v5e:2x2
jax: 0.10.0
libtpu: 0.0.40
codegen_flags: <defaults>
</compile_context>

<pallas_src>
import functools

import jax
import jax.numpy as jnp
from jax.experimental import pallas as pl
from jax.experimental.pallas import tpu as pltpu


def _conv3x3_kernel(x_ref, w_ref, b_ref, o_ref, *, TH, W, Cin, apply_relu,
                    fuse_wc):
    """One grid step = one (row-tile, Cout-tile) of one batch element.

    x_ref : (H+2, W+2, Cin)        bf16, zero-padded, resident per batch elem
    w_ref : (9*Cin, TC)            bf16, resident across the row-tile sweep
    b_ref : (1, 1, TC)             f32
    o_ref : (TH, W*TC) or (TH, W, TC)
    """
    h = pl.program_id(2)                         # row-tile index (innermost)
    row0 = pl.multiple_of(h * TH, TH)

    # im2col: gather the 9 taps straight from the VMEM-resident ref and
    # concatenate along channels -> (TH, W, 9*Cin).  K = 9*Cin keeps the MXU
    # contraction depth 9x fuller than per-tap K=Cin matmuls.
    taps = []
    for kh in range(3):
        for kw in range(3):
            taps.append(x_ref[pl.ds(row0 + kh, TH), pl.ds(kw, W), :])
    patches = jnp.concatenate(taps, axis=-1)               # (TH, W, 9*Cin) bf16

    acc = jnp.einsum("hwk,ko->hwo", patches, w_ref[...],
                     preferred_element_type=jnp.float32)    # (TH, W, TC) f32
    acc = acc + b_ref[...]                                  # (1,1,TC) broadcast
    if apply_relu:
        acc = jnp.maximum(acc, 0.0)
    acc = acc.astype(o_ref.dtype)

    if fuse_wc:
        # Lane-dense store: pack (TH, W, TC) into (TH, W*TC) so every store is
        # an unmasked full-lane vst (TC alone is < 128 lanes in early layers).
        o_ref[...] = jnp.concatenate([acc[:, wi, :] for wi in range(W)], axis=1)
    else:
        o_ref[...] = acc


def _pick_row_tile(H, W):
    """Largest divisor of H keeping the tile's im2col M-dim (TH*W) <= 1024,
    with >= 2 row tiles when possible (longer grid => pipelining/megacore)."""
    best = 1
    for t in range(1, H + 1):
        if H % t != 0:
            continue
        if t * W > 1024:
            continue
        if t == H and H > 1:
            continue
        best = t
    return best


def conv2d_3x3_same_nhwc(x_nhwc, w_oihw, bias, *, apply_relu, out_dtype):
    """3x3 / stride 1 / pad 1 conv.  NHWC in -> NHWC out, compute in Pallas."""
    N, H, W, Cin = x_nhwc.shape
    Cout = w_oihw.shape[0]

    TH = _pick_row_tile(H, W)
    HT = H // TH
    TC = 128 if (Cout % 128 == 0) else Cout      # lane-dense Cout tile if >=128
    CT = Cout // TC
    # Fused lane-dense output tile (TH, W*Cout): single Cout tile, 128-aligned
    # fused width, block row dim legal for the (8,128) rule, modest unroll.
    fuse_wc = (CT == 1 and (W * Cout) % 128 == 0
               and (TH % 8 == 0 or TH == H) and W <= 64)

    # Cheap XLA-side glue: pad H/W by 1, cast to bf16, flatten the weights to
    # the (kh, kw, cin) x cout im2col layout.  No NCHW<->NHWC transposes here.
    x_pad = jnp.pad(x_nhwc.astype(jnp.bfloat16),
                    ((0, 0), (1, 1), (1, 1), (0, 0)))
    w_flat = jnp.transpose(w_oihw, (2, 3, 1, 0)).reshape(9 * Cin, Cout)
    w_flat = w_flat.astype(jnp.bfloat16)
    b3 = bias.reshape(1, 1, Cout).astype(jnp.float32)

    kernel = functools.partial(_conv3x3_kernel, TH=TH, W=W, Cin=Cin,
                               apply_relu=apply_relu, fuse_wc=fuse_wc)

    if fuse_wc:
        out_shape = jax.ShapeDtypeStruct((N, H, W * Cout), out_dtype)
        out_spec = pl.BlockSpec((None, TH, W * Cout), lambda n, c, h: (n, h, 0))
    else:
        out_shape = jax.ShapeDtypeStruct((N, H, W, Cout), out_dtype)
        out_spec = pl.BlockSpec((None, TH, W, TC), lambda n, c, h: (n, h, 0, c))

    # VMEM budget (double-buffered blocks + in-kernel temporaries) and an
    # explicit scoped-VMEM limit (v7x has only 64 MiB per TensorCore).
    vmem_need = (2 * (H + 2) * (W + 2) * Cin * 2        # resident padded image
                 + 2 * 9 * Cin * TC * 2                 # weight tile
                 + 2 * TC * 4                           # bias
                 + 2 * TH * W * TC * 4                  # output tile
                 + TH * W * 9 * Cin * 2                 # patches value
                 + 2 * TH * W * TC * 4)                 # acc / relayout slack
    vmem_limit = int(min(64 * 1024 * 1024,
                         max(32 * 1024 * 1024, 4 * vmem_need)))

    cost = pl.CostEstimate(
        flops=2 * N * H * W * Cout * 9 * Cin,
        transcendentals=0,
        bytes_accessed=int(x_pad.size * 2 + w_flat.size * 2 + b3.size * 4
                           + N * H * W * Cout * jnp.dtype(out_dtype).itemsize))

    out = pl.pallas_call(
        kernel,
        out_shape=out_shape,
        grid=(N, CT, HT),
        in_specs=[
            # Whole padded image per batch element: block index depends only
            # on n, so it is DMA'd once per n and stays resident in VMEM while
            # the kernel slices row tiles out of it with pl.ds.
            pl.BlockSpec((None, H + 2, W + 2, Cin),
                         lambda n, c, h: (n, 0, 0, 0)),
            # Weight tile: constant over n and over the inner row-tile sweep.
            pl.BlockSpec((9 * Cin, TC), lambda n, c, h: (0, c)),
            pl.BlockSpec((1, 1, TC), lambda n, c, h: (0, 0, c)),
        ],
        out_specs=out_spec,
        compiler_params=pltpu.CompilerParams(
            dimension_semantics=("parallel", "parallel", "parallel"),
            vmem_limit_bytes=vmem_limit),
        cost_estimate=cost,
    )(x_pad, w_flat, b3)

    if fuse_wc:
        out = out.reshape(N, H, W, Cout)   # same linear layout; free in XLA
    return out


class ConvolutionPallas:
    """Mirror of the PyTorch `Convolution` module (deterministic init)."""

    def __init__(self, num_convolutions, in_channels, out_channels, key):
        def init_conv(k, cin, cout):
            kw_key, kb_key = jax.random.split(k)
            fan_in = cin * 3 * 3
            bound = 1.0 / jnp.sqrt(fan_in)           # PyTorch default init bound
            w = jax.random.uniform(kw_key, (cout, cin, 3, 3),
                                   jnp.float32, -bound, bound)
            b = jax.random.uniform(kb_key, (cout,), jnp.float32, -bound, bound)
            return w, b

        keys = jax.random.split(key, num_convolutions + 1)
        self.w1, self.b1 = init_conv(keys[0], in_channels, out_channels)
        self.convs = [init_conv(keys[i + 1], out_channels, out_channels)
                      for i in range(num_convolutions)]

    def __call__(self, x_nchw):
        # One NCHW->NHWC transpose at entry, one NHWC->NCHW at exit; all
        # intermediate activations stay NHWC bf16 (no per-layer transposes,
        # halved inter-layer HBM traffic).
        x = jnp.transpose(x_nchw, (0, 2, 3, 1))
        layers = [(self.w1, self.b1, False)] + \
                 [(w, b, True) for (w, b) in self.convs]
        for i, (w, b, relu) in enumerate(layers):
            last = i == len(layers) - 1
            x = conv2d_3x3_same_nhwc(
                x, w, b, apply_relu=relu,
                out_dtype=jnp.float32 if last else jnp.bfloat16)
        return jnp.transpose(x, (0, 3, 1, 2))


def _reference(model, x):
    """Pure-JAX reference with the same bf16 quantization points as the kernel."""
    def q(v):
        return v.astype(jnp.bfloat16).astype(jnp.float32)

    def conv(y, w, b):
        y = jax.lax.conv_general_dilated(
            q(y), q(w), window_strides=(1, 1), padding=((1, 1), (1, 1)),
            dimension_numbers=("NCHW", "OIHW", "NCHW"))
        return y + b.reshape(1, -1, 1, 1)

    y = conv(x, model.w1, model.b1)
    for w, b in model.convs:
        y = jnp.maximum(conv(y, w, b), 0.0)
    return y


if __name__ == "__main__":
    key = jax.random.PRNGKey(0)
    k_x, k_p = jax.random.split(key)

    # Small shapes consistent with the module: batch=2, in_ch=4, out_ch=8, 16x16.
    x = jax.random.normal(k_x, (2, 4, 16, 16), jnp.float32)
    model = ConvolutionPallas(num_convolutions=2, in_channels=4,
                              out_channels=8, key=k_p)

    fwd = jax.jit(model.__call__)
    out = jax.block_until_ready(fwd(x))

    ref = jax.block_until_ready(jax.jit(functools.partial(_reference, model))(x))
    assert out.shape == (2, 8, 16, 16)
    max_err = float(jnp.max(jnp.abs(out - ref)))
    assert jnp.allclose(out, ref, rtol=1e-2, atol=1e-2), f"max abs err={max_err}"

    print("KERNEL_OK")
</pallas_src>

<mosaic_0001>
module attributes {stable_mosaic.version = 11 : i64} {
  func.func @_conv3x3_kernel(%arg0: i32, %arg1: i32, %arg2: i32, %arg3: memref<1x18x18x4xbf16, #tpu.memory_space<vmem>>, %arg4: memref<36x8xbf16, #tpu.memory_space<vmem>>, %arg5: memref<1x1x8xf32, #tpu.memory_space<vmem>>, %arg6: memref<1x8x128xbf16, #tpu.memory_space<vmem>>) attributes {dimension_semantics = [#tpu.dimension_semantics<parallel>, #tpu.dimension_semantics<parallel>, #tpu.dimension_semantics<parallel>], iteration_bounds = array<i64: 2, 1, 2>, scalar_prefetch = 0 : i64, scratch_operands = 0 : i64, tpu.core_type = #tpu.core_type<tc>, window_params = [{transform_indices = @transform_0, window_bounds = array<i64: 1, 18, 18, 4>}, {transform_indices = @transform_1, window_bounds = array<i64: 36, 8>}, {transform_indices = @transform_2, window_bounds = array<i64: 1, 1, 8>}, {transform_indices = @transform_3, window_bounds = array<i64: 1, 8, 128>}]} {
    %c8_i32 = arith.constant 8 : i32
    %0 = arith.muli %arg2, %c8_i32 : i32
    %1 = tpu.assume_multiple %0, 8 : i32
    %c0_i32 = arith.constant 0 : i32
    %2 = arith.addi %1, %c0_i32 : i32
    %c0 = arith.constant 0 : index
    %3 = arith.index_cast %2 : i32 to index
    %c0_0 = arith.constant 0 : index
    %c0_1 = arith.constant 0 : index
    %4 = vector.load %arg3[%c0, %3, %c0_0, %c0_1] : memref<1x18x18x4xbf16, #tpu.memory_space<vmem>>, vector<1x8x16x4xbf16>
    %5 = vector.shape_cast %4 : vector<1x8x16x4xbf16> to vector<8x16x4xbf16>
    %c0_i32_2 = arith.constant 0 : i32
    %6 = arith.addi %1, %c0_i32_2 : i32
    %c0_3 = arith.constant 0 : index
    %7 = arith.index_cast %6 : i32 to index
    %c1 = arith.constant 1 : index
    %c0_4 = arith.constant 0 : index
    %8 = vector.load %arg3[%c0_3, %7, %c1, %c0_4] : memref<1x18x18x4xbf16, #tpu.memory_space<vmem>>, vector<1x8x16x4xbf16>
    %9 = vector.shape_cast %8 : vector<1x8x16x4xbf16> to vector<8x16x4xbf16>
    %c0_i32_5 = arith.constant 0 : i32
    %10 = arith.addi %1, %c0_i32_5 : i32
    %c0_6 = arith.constant 0 : index
    %11 = arith.index_cast %10 : i32 to index
    %c2 = arith.constant 2 : index
    %c0_7 = arith.constant 0 : index
    %12 = vector.load %arg3[%c0_6, %11, %c2, %c0_7] : memref<1x18x18x4xbf16, #tpu.memory_space<vmem>>, vector<1x8x16x4xbf16>
    %13 = vector.shape_cast %12 : vector<1x8x16x4xbf16> to vector<8x16x4xbf16>
    %c1_i32 = arith.constant 1 : i32
    %14 = arith.addi %1, %c1_i32 : i32
    %c0_8 = arith.constant 0 : index
    %15 = arith.index_cast %14 : i32 to index
    %c0_9 = arith.constant 0 : index
    %c0_10 = arith.constant 0 : index
    %16 = vector.load %arg3[%c0_8, %15, %c0_9, %c0_10] : memref<1x18x18x4xbf16, #tpu.memory_space<vmem>>, vector<1x8x16x4xbf16>
    %17 = vector.shape_cast %16 : vector<1x8x16x4xbf16> to vector<8x16x4xbf16>
    %c1_i32_11 = arith.constant 1 : i32
    %18 = arith.addi %1, %c1_i32_11 : i32
    %c0_12 = arith.constant 0 : index
    %19 = arith.index_cast %18 : i32 to index
    %c1_13 = arith.constant 1 : index
    %c0_14 = arith.constant 0 : index
    %20 = vector.load %arg3[%c0_12, %19, %c1_13, %c0_14] : memref<1x18x18x4xbf16, #tpu.memory_space<vmem>>, vector<1x8x16x4xbf16>
    %21 = vector.shape_cast %20 : vector<1x8x16x4xbf16> to vector<8x16x4xbf16>
    %c1_i32_15 = arith.constant 1 : i32
    %22 = arith.addi %1, %c1_i32_15 : i32
    %c0_16 = arith.constant 0 : index
    %23 = arith.index_cast %22 : i32 to index
    %c2_17 = arith.constant 2 : index
    %c0_18 = arith.constant 0 : index
    %24 = vector.load %arg3[%c0_16, %23, %c2_17, %c0_18] : memref<1x18x18x4xbf16, #tpu.memory_space<vmem>>, vector<1x8x16x4xbf16>
    %25 = vector.shape_cast %24 : vector<1x8x16x4xbf16> to vector<8x16x4xbf16>
    %c2_i32 = arith.constant 2 : i32
    %26 = arith.addi %1, %c2_i32 : i32
    %c0_19 = arith.constant 0 : index
    %27 = arith.index_cast %26 : i32 to index
    %c0_20 = arith.constant 0 : index
    %c0_21 = arith.constant 0 : index
    %28 = vector.load %arg3[%c0_19, %27, %c0_20, %c0_21] : memref<1x18x18x4xbf16, #tpu.memory_space<vmem>>, vector<1x8x16x4xbf16>
    %29 = vector.shape_cast %28 : vector<1x8x16x4xbf16> to vector<8x16x4xbf16>
    %c2_i32_22 = arith.constant 2 : i32
    %30 = arith.addi %1, %c2_i32_22 : i32
    %c0_23 = arith.constant 0 : index
    %31 = arith.index_cast %30 : i32 to index
    %c1_24 = arith.constant 1 : index
    %c0_25 = arith.constant 0 : index
    %32 = vector.load %arg3[%c0_23, %31, %c1_24, %c0_25] : memref<1x18x18x4xbf16, #tpu.memory_space<vmem>>, vector<1x8x16x4xbf16>
    %33 = vector.shape_cast %32 : vector<1x8x16x4xbf16> to vector<8x16x4xbf16>
    %c2_i32_26 = arith.constant 2 : i32
    %34 = arith.addi %1, %c2_i32_26 : i32
    %c0_27 = arith.constant 0 : index
    %35 = arith.index_cast %34 : i32 to index
    %c2_28 = arith.constant 2 : index
    %c0_29 = arith.constant 0 : index
    %36 = vector.load %arg3[%c0_27, %35, %c2_28, %c0_29] : memref<1x18x18x4xbf16, #tpu.memory_space<vmem>>, vector<1x8x16x4xbf16>
    %37 = vector.shape_cast %36 : vector<1x8x16x4xbf16> to vector<8x16x4xbf16>
    %38 = tpu.concatenate %5, %9, %13, %17, %21, %25, %29, %33, %37 in 2 : vector<8x16x4xbf16>, vector<8x16x4xbf16>, vector<8x16x4xbf16>, vector<8x16x4xbf16>, vector<8x16x4xbf16>, vector<8x16x4xbf16>, vector<8x16x4xbf16>, vector<8x16x4xbf16>, vector<8x16x4xbf16> -> vector<8x16x36xbf16>
    %c0_30 = arith.constant 0 : index
    %c0_31 = arith.constant 0 : index
    %39 = vector.load %arg4[%c0_30, %c0_31] : memref<36x8xbf16, #tpu.memory_space<vmem>>, vector<36x8xbf16>
    "tpu.trace_start"() <{level = 10 : i32, message = "hwk,ko->hwo"}> : () -> ()
    %cst = arith.constant dense<0.000000e+00> : vector<8x16x8xf32>
    %40 = tpu.matmul %38, %39, %cst {dimension_numbers = #tpu.dot_dimension_numbers<[2], [0], [0, 1], [1], [0, 0, 0, 1, 1, 1], [], []>} : vector<8x16x36xbf16>, vector<36x8xbf16>, vector<8x16x8xf32> -> vector<8x16x8xf32>
    "tpu.trace_stop"() : () -> ()
    %c0_32 = arith.constant 0 : index
    %c0_33 = arith.constant 0 : index
    %c0_34 = arith.constant 0 : index
    %41 = vector.load %arg5[%c0_32, %c0_33, %c0_34] : memref<1x1x8xf32, #tpu.memory_space<vmem>>, vector<1x1x8xf32>
    %42 = vector.broadcast %41 : vector<1x1x8xf32> to vector<8x16x8xf32>
    %43 = arith.addf %40, %42 : vector<8x16x8xf32>
    %44 = arith.truncf %43 : vector<8x16x8xf32> to vector<8x16x8xbf16>
    %45 = vector.extract_strided_slice %44 {offsets = [0, 0, 0], sizes = [8, 1, 8], strides = [1, 1, 1]} : vector<8x16x8xbf16> to vector<8x1x8xbf16>
    %46 = vector.shape_cast %45 : vector<8x1x8xbf16> to vector<8x8xbf16>
    %47 = vector.extract_strided_slice %44 {offsets = [0, 1, 0], sizes = [8, 1, 8], strides = [1, 1, 1]} : vector<8x16x8xbf16> to vector<8x1x8xbf16>
    %48 = vector.shape_cast %47 : vector<8x1x8xbf16> to vector<8x8xbf16>
    %49 = vector.extract_strided_slice %44 {offsets = [0, 2, 0], sizes = [8, 1, 8], strides = [1, 1, 1]} : vector<8x16x8xbf16> to vector<8x1x8xbf16>
    %50 = vector.shape_cast %49 : vector<8x1x8xbf16> to vector<8x8xbf16>
    %51 = vector.extract_strided_slice %44 {offsets = [0, 3, 0], sizes = [8, 1, 8], strides = [1, 1, 1]} : vector<8x16x8xbf16> to vector<8x1x8xbf16>
    %52 = vector.shape_cast %51 : vector<8x1x8xbf16> to vector<8x8xbf16>
    %53 = vector.extract_strided_slice %44 {offsets = [0, 4, 0], sizes = [8, 1, 8], strides = [1, 1, 1]} : vector<8x16x8xbf16> to vector<8x1x8xbf16>
    %54 = vector.shape_cast %53 : vector<8x1x8xbf16> to vector<8x8xbf16>
    %55 = vector.extract_strided_slice %44 {offsets = [0, 5, 0], sizes = [8, 1, 8], strides = [1, 1, 1]} : vector<8x16x8xbf16> to vector<8x1x8xbf16>
    %56 = vector.shape_cast %55 : vector<8x1x8xbf16> to vector<8x8xbf16>
    %57 = vector.extract_strided_slice %44 {offsets = [0, 6, 0], sizes = [8, 1, 8], strides = [1, 1, 1]} : vector<8x16x8xbf16> to vector<8x1x8xbf16>
    %58 = vector.shape_cast %57 : vector<8x1x8xbf16> to vector<8x8xbf16>
    %59 = vector.extract_strided_slice %44 {offsets = [0, 7, 0], sizes = [8, 1, 8], strides = [1, 1, 1]} : vector<8x16x8xbf16> to vector<8x1x8xbf16>
    %60 = vector.shape_cast %59 : vector<8x1x8xbf16> to vector<8x8xbf16>
    %61 = vector.extract_strided_slice %44 {offsets = [0, 8, 0], sizes = [8, 1, 8], strides = [1, 1, 1]} : vector<8x16x8xbf16> to vector<8x1x8xbf16>
    %62 = vector.shape_cast %61 : vector<8x1x8xbf16> to vector<8x8xbf16>
    %63 = vector.extract_strided_slice %44 {offsets = [0, 9, 0], sizes = [8, 1, 8], strides = [1, 1, 1]} : vector<8x16x8xbf16> to vector<8x1x8xbf16>
    %64 = vector.shape_cast %63 : vector<8x1x8xbf16> to vector<8x8xbf16>
    %65 = vector.extract_strided_slice %44 {offsets = [0, 10, 0], sizes = [8, 1, 8], strides = [1, 1, 1]} : vector<8x16x8xbf16> to vector<8x1x8xbf16>
    %66 = vector.shape_cast %65 : vector<8x1x8xbf16> to vector<8x8xbf16>
    %67 = vector.extract_strided_slice %44 {offsets = [0, 11, 0], sizes = [8, 1, 8], strides = [1, 1, 1]} : vector<8x16x8xbf16> to vector<8x1x8xbf16>
    %68 = vector.shape_cast %67 : vector<8x1x8xbf16> to vector<8x8xbf16>
    %69 = vector.extract_strided_slice %44 {offsets = [0, 12, 0], sizes = [8, 1, 8], strides = [1, 1, 1]} : vector<8x16x8xbf16> to vector<8x1x8xbf16>
    %70 = vector.shape_cast %69 : vector<8x1x8xbf16> to vector<8x8xbf16>
    %71 = vector.extract_strided_slice %44 {offsets = [0, 13, 0], sizes = [8, 1, 8], strides = [1, 1, 1]} : vector<8x16x8xbf16> to vector<8x1x8xbf16>
    %72 = vector.shape_cast %71 : vector<8x1x8xbf16> to vector<8x8xbf16>
    %73 = vector.extract_strided_slice %44 {offsets = [0, 14, 0], sizes = [8, 1, 8], strides = [1, 1, 1]} : vector<8x16x8xbf16> to vector<8x1x8xbf16>
    %74 = vector.shape_cast %73 : vector<8x1x8xbf16> to vector<8x8xbf16>
    %75 = vector.extract_strided_slice %44 {offsets = [0, 15, 0], sizes = [8, 1, 8], strides = [1, 1, 1]} : vector<8x16x8xbf16> to vector<8x1x8xbf16>
    %76 = vector.shape_cast %75 : vector<8x1x8xbf16> to vector<8x8xbf16>
    %77 = tpu.concatenate %46, %48, %50, %52, %54, %56, %58, %60, %62, %64, %66, %68, %70, %72, %74, %76 in 1 : vector<8x8xbf16>, vector<8x8xbf16>, vector<8x8xbf16>, vector<8x8xbf16>, vector<8x8xbf16>, vector<8x8xbf16>, vector<8x8xbf16>, vector<8x8xbf16>, vector<8x8xbf16>, vector<8x8xbf16>, vector<8x8xbf16>, vector<8x8xbf16>, vector<8x8xbf16>, vector<8x8xbf16>, vector<8x8xbf16>, vector<8x8xbf16> -> vector<8x128xbf16>
    %c0_35 = arith.constant 0 : index
    %c0_36 = arith.constant 0 : index
    %c0_37 = arith.constant 0 : index
    %78 = vector.load %arg6[%c0_35, %c0_36, %c0_37] : memref<1x8x128xbf16, #tpu.memory_space<vmem>>, vector<1x8x128xbf16>
    %79 = vector.shape_cast %78 : vector<1x8x128xbf16> to vector<8x128xbf16>
    %80 = vector.shape_cast %77 : vector<8x128xbf16> to vector<1x8x128xbf16>
    tpu.vector_store %arg6[%c0_35, %c0_36, %c0_37], %80 {strides = array<i32>} : memref<1x8x128xbf16, #tpu.memory_space<vmem>>, vector<1x8x128xbf16>,
    return
  }
  func.func @transform_0(%arg0: i32, %arg1: i32, %arg2: i32) -> (i32, i32, i32, i32) {
    %c0_i32 = arith.constant 0 : i32
    %c0_i32_0 = arith.constant 0 : i32
    %c0_i32_1 = arith.constant 0 : i32
    %c0_i32_2 = arith.constant 0 : i32
    return %arg0, %c0_i32, %c0_i32_0, %c0_i32_1 : i32, i32, i32, i32
  }
  func.func @transform_1(%arg0: i32, %arg1: i32, %arg2: i32) -> (i32, i32) {
    %c0_i32 = arith.constant 0 : i32
    %c0_i32_0 = arith.constant 0 : i32
    return %c0_i32, %arg1 : i32, i32
  }
  func.func @transform_2(%arg0: i32, %arg1: i32, %arg2: i32) -> (i32, i32, i32) {
    %c0_i32 = arith.constant 0 : i32
    %c0_i32_0 = arith.constant 0 : i32
    %c0_i32_1 = arith.constant 0 : i32
    return %c0_i32, %c0_i32_0, %arg1 : i32, i32, i32
  }
  func.func @transform_3(%arg0: i32, %arg1: i32, %arg2: i32) -> (i32, i32, i32) {
    %c0_i32 = arith.constant 0 : i32
    %c0_i32_0 = arith.constant 0 : i32
    return %arg0, %arg2, %c0_i32 : i32, i32, i32
  }
}

module attributes {stable_mosaic.version = 11 : i64} {
  func.func @_conv3x3_kernel(%arg0: i32, %arg1: i32, %arg2: i32, %arg3: memref<1x18x18x8xbf16, #tpu.memory_space<vmem>>, %arg4: memref<72x8xbf16, #tpu.memory_space<vmem>>, %arg5: memref<1x1x8xf32, #tpu.memory_space<vmem>>, %arg6: memref<1x8x128xbf16, #tpu.memory_space<vmem>>) attributes {dimension_semantics = [#tpu.dimension_semantics<parallel>, #tpu.dimension_semantics<parallel>, #tpu.dimension_semantics<parallel>], iteration_bounds = array<i64: 2, 1, 2>, scalar_prefetch = 0 : i64, scratch_operands = 0 : i64, tpu.core_type = #tpu.core_type<tc>, window_params = [{transform_indices = @transform_0, window_bounds = array<i64: 1, 18, 18, 8>}, {transform_indices = @transform_1, window_bounds = array<i64: 72, 8>}, {transform_indices = @transform_2, window_bounds = array<i64: 1, 1, 8>}, {transform_indices = @transform_3, window_bounds = array<i64: 1, 8, 128>}]} {
    %c8_i32 = arith.constant 8 : i32
    %0 = arith.muli %arg2, %c8_i32 : i32
    %1 = tpu.assume_multiple %0, 8 : i32
    %c0_i32 = arith.constant 0 : i32
    %2 = arith.addi %1, %c0_i32 : i32
    %c0 = arith.constant 0 : index
    %3 = arith.index_cast %2 : i32 to index
    %c0_0 = arith.constant 0 : index
    %c0_1 = arith.constant 0 : index
    %4 = vector.load %arg3[%c0, %3, %c0_0, %c0_1] : memref<1x18x18x8xbf16, #tpu.memory_space<vmem>>, vector<1x8x16x8xbf16>
    %5 = vector.shape_cast %4 : vector<1x8x16x8xbf16> to vector<8x16x8xbf16>
    %c0_i32_2 = arith.constant 0 : i32
    %6 = arith.addi %1, %c0_i32_2 : i32
    %c0_3 = arith.constant 0 : index
    %7 = arith.index_cast %6 : i32 to index
    %c1 = arith.constant 1 : index
    %c0_4 = arith.constant 0 : index
    %8 = vector.load %arg3[%c0_3, %7, %c1, %c0_4] : memref<1x18x18x8xbf16, #tpu.memory_space<vmem>>, vector<1x8x16x8xbf16>
    %9 = vector.shape_cast %8 : vector<1x8x16x8xbf16> to vector<8x16x8xbf16>
    %c0_i32_5 = arith.constant 0 : i32
    %10 = arith.addi %1, %c0_i32_5 : i32
    %c0_6 = arith.constant 0 : index
    %11 = arith.index_cast %10 : i32 to index
    %c2 = arith.constant 2 : index
    %c0_7 = arith.constant 0 : index
    %12 = vector.load %arg3[%c0_6, %11, %c2, %c0_7] : memref<1x18x18x8xbf16, #tpu.memory_space<vmem>>, vector<1x8x16x8xbf16>
    %13 = vector.shape_cast %12 : vector<1x8x16x8xbf16> to vector<8x16x8xbf16>
    %c1_i32 = arith.constant 1 : i32
    %14 = arith.addi %1, %c1_i32 : i32
    %c0_8 = arith.constant 0 : index
    %15 = arith.index_cast %14 : i32 to index
    %c0_9 = arith.constant 0 : index
    %c0_10 = arith.constant 0 : index
    %16 = vector.load %arg3[%c0_8, %15, %c0_9, %c0_10] : memref<1x18x18x8xbf16, #tpu.memory_space<vmem>>, vector<1x8x16x8xbf16>
    %17 = vector.shape_cast %16 : vector<1x8x16x8xbf16> to vector<8x16x8xbf16>
    %c1_i32_11 = arith.constant 1 : i32
    %18 = arith.addi %1, %c1_i32_11 : i32
    %c0_12 = arith.constant 0 : index
    %19 = arith.index_cast %18 : i32 to index
    %c1_13 = arith.constant 1 : index
    %c0_14 = arith.constant 0 : index
    %20 = vector.load %arg3[%c0_12, %19, %c1_13, %c0_14] : memref<1x18x18x8xbf16, #tpu.memory_space<vmem>>, vector<1x8x16x8xbf16>
    %21 = vector.shape_cast %20 : vector<1x8x16x8xbf16> to vector<8x16x8xbf16>
    %c1_i32_15 = arith.constant 1 : i32
    %22 = arith.addi %1, %c1_i32_15 : i32
    %c0_16 = arith.constant 0 : index
    %23 = arith.index_cast %22 : i32 to index
    %c2_17 = arith.constant 2 : index
    %c0_18 = arith.constant 0 : index
    %24 = vector.load %arg3[%c0_16, %23, %c2_17, %c0_18] : memref<1x18x18x8xbf16, #tpu.memory_space<vmem>>, vector<1x8x16x8xbf16>
    %25 = vector.shape_cast %24 : vector<1x8x16x8xbf16> to vector<8x16x8xbf16>
    %c2_i32 = arith.constant 2 : i32
    %26 = arith.addi %1, %c2_i32 : i32
    %c0_19 = arith.constant 0 : index
    %27 = arith.index_cast %26 : i32 to index
    %c0_20 = arith.constant 0 : index
    %c0_21 = arith.constant 0 : index
    %28 = vector.load %arg3[%c0_19, %27, %c0_20, %c0_21] : memref<1x18x18x8xbf16, #tpu.memory_space<vmem>>, vector<1x8x16x8xbf16>
    %29 = vector.shape_cast %28 : vector<1x8x16x8xbf16> to vector<8x16x8xbf16>
    %c2_i32_22 = arith.constant 2 : i32
    %30 = arith.addi %1, %c2_i32_22 : i32
    %c0_23 = arith.constant 0 : index
    %31 = arith.index_cast %30 : i32 to index
    %c1_24 = arith.constant 1 : index
    %c0_25 = arith.constant 0 : index
    %32 = vector.load %arg3[%c0_23, %31, %c1_24, %c0_25] : memref<1x18x18x8xbf16, #tpu.memory_space<vmem>>, vector<1x8x16x8xbf16>
    %33 = vector.shape_cast %32 : vector<1x8x16x8xbf16> to vector<8x16x8xbf16>
    %c2_i32_26 = arith.constant 2 : i32
    %34 = arith.addi %1, %c2_i32_26 : i32
    %c0_27 = arith.constant 0 : index
    %35 = arith.index_cast %34 : i32 to index
    %c2_28 = arith.constant 2 : index
    %c0_29 = arith.constant 0 : index
    %36 = vector.load %arg3[%c0_27, %35, %c2_28, %c0_29] : memref<1x18x18x8xbf16, #tpu.memory_space<vmem>>, vector<1x8x16x8xbf16>
    %37 = vector.shape_cast %36 : vector<1x8x16x8xbf16> to vector<8x16x8xbf16>
    %38 = tpu.concatenate %5, %9, %13, %17, %21, %25, %29, %33, %37 in 2 : vector<8x16x8xbf16>, vector<8x16x8xbf16>, vector<8x16x8xbf16>, vector<8x16x8xbf16>, vector<8x16x8xbf16>, vector<8x16x8xbf16>, vector<8x16x8xbf16>, vector<8x16x8xbf16>, vector<8x16x8xbf16> -> vector<8x16x72xbf16>
    %c0_30 = arith.constant 0 : index
    %c0_31 = arith.constant 0 : index
    %39 = vector.load %arg4[%c0_30, %c0_31] : memref<72x8xbf16, #tpu.memory_space<vmem>>, vector<72x8xbf16>
    "tpu.trace_start"() <{level = 10 : i32, message = "hwk,ko->hwo"}> : () -> ()
    %cst = arith.constant dense<0.000000e+00> : vector<8x16x8xf32>
    %40 = tpu.matmul %38, %39, %cst {dimension_numbers = #tpu.dot_dimension_numbers<[2], [0], [0, 1], [1], [0, 0, 0, 1, 1, 1], [], []>} : vector<8x16x72xbf16>, vector<72x8xbf16>, vector<8x16x8xf32> -> vector<8x16x8xf32>
    "tpu.trace_stop"() : () -> ()
    %c0_32 = arith.constant 0 : index
    %c0_33 = arith.constant 0 : index
    %c0_34 = arith.constant 0 : index
    %41 = vector.load %arg5[%c0_32, %c0_33, %c0_34] : memref<1x1x8xf32, #tpu.memory_space<vmem>>, vector<1x1x8xf32>
    %42 = vector.broadcast %41 : vector<1x1x8xf32> to vector<8x16x8xf32>
    %43 = arith.addf %40, %42 : vector<8x16x8xf32>
    %cst_35 = arith.constant 0.000000e+00 : f32
    %44 = vector.broadcast %cst_35 : f32 to vector<8x16x8xf32>
    %45 = arith.maximumf %43, %44 : vector<8x16x8xf32>
    %46 = arith.truncf %45 : vector<8x16x8xf32> to vector<8x16x8xbf16>
    %47 = vector.extract_strided_slice %46 {offsets = [0, 0, 0], sizes = [8, 1, 8], strides = [1, 1, 1]} : vector<8x16x8xbf16> to vector<8x1x8xbf16>
    %48 = vector.shape_cast %47 : vector<8x1x8xbf16> to vector<8x8xbf16>
    %49 = vector.extract_strided_slice %46 {offsets = [0, 1, 0], sizes = [8, 1, 8], strides = [1, 1, 1]} : vector<8x16x8xbf16> to vector<8x1x8xbf16>
    %50 = vector.shape_cast %49 : vector<8x1x8xbf16> to vector<8x8xbf16>
    %51 = vector.extract_strided_slice %46 {offsets = [0, 2, 0], sizes = [8, 1, 8], strides = [1, 1, 1]} : vector<8x16x8xbf16> to vector<8x1x8xbf16>
    %52 = vector.shape_cast %51 : vector<8x1x8xbf16> to vector<8x8xbf16>
    %53 = vector.extract_strided_slice %46 {offsets = [0, 3, 0], sizes = [8, 1, 8], strides = [1, 1, 1]} : vector<8x16x8xbf16> to vector<8x1x8xbf16>
    %54 = vector.shape_cast %53 : vector<8x1x8xbf16> to vector<8x8xbf16>
    %55 = vector.extract_strided_slice %46 {offsets = [0, 4, 0], sizes = [8, 1, 8], strides = [1, 1, 1]} : vector<8x16x8xbf16> to vector<8x1x8xbf16>
    %56 = vector.shape_cast %55 : vector<8x1x8xbf16> to vector<8x8xbf16>
    %57 = vector.extract_strided_slice %46 {offsets = [0, 5, 0], sizes = [8, 1, 8], strides = [1, 1, 1]} : vector<8x16x8xbf16> to vector<8x1x8xbf16>
    %58 = vector.shape_cast %57 : vector<8x1x8xbf16> to vector<8x8xbf16>
    %59 = vector.extract_strided_slice %46 {offsets = [0, 6, 0], sizes = [8, 1, 8], strides = [1, 1, 1]} : vector<8x16x8xbf16> to vector<8x1x8xbf16>
    %60 = vector.shape_cast %59 : vector<8x1x8xbf16> to vector<8x8xbf16>
    %61 = vector.extract_strided_slice %46 {offsets = [0, 7, 0], sizes = [8, 1, 8], strides = [1, 1, 1]} : vector<8x16x8xbf16> to vector<8x1x8xbf16>
    %62 = vector.shape_cast %61 : vector<8x1x8xbf16> to vector<8x8xbf16>
    %63 = vector.extract_strided_slice %46 {offsets = [0, 8, 0], sizes = [8, 1, 8], strides = [1, 1, 1]} : vector<8x16x8xbf16> to vector<8x1x8xbf16>
    %64 = vector.shape_cast %63 : vector<8x1x8xbf16> to vector<8x8xbf16>
    %65 = vector.extract_strided_slice %46 {offsets = [0, 9, 0], sizes = [8, 1, 8], strides = [1, 1, 1]} : vector<8x16x8xbf16> to vector<8x1x8xbf16>
    %66 = vector.shape_cast %65 : vector<8x1x8xbf16> to vector<8x8xbf16>
    %67 = vector.extract_strided_slice %46 {offsets = [0, 10, 0], sizes = [8, 1, 8], strides = [1, 1, 1]} : vector<8x16x8xbf16> to vector<8x1x8xbf16>
    %68 = vector.shape_cast %67 : vector<8x1x8xbf16> to vector<8x8xbf16>
    %69 = vector.extract_strided_slice %46 {offsets = [0, 11, 0], sizes = [8, 1, 8], strides = [1, 1, 1]} : vector<8x16x8xbf16> to vector<8x1x8xbf16>
    %70 = vector.shape_cast %69 : vector<8x1x8xbf16> to vector<8x8xbf16>
    %71 = vector.extract_strided_slice %46 {offsets = [0, 12, 0], sizes = [8, 1, 8], strides = [1, 1, 1]} : vector<8x16x8xbf16> to vector<8x1x8xbf16>
    %72 = vector.shape_cast %71 : vector<8x1x8xbf16> to vector<8x8xbf16>
    %73 = vector.extract_strided_slice %46 {offsets = [0, 13, 0], sizes = [8, 1, 8], strides = [1, 1, 1]} : vector<8x16x8xbf16> to vector<8x1x8xbf16>
    %74 = vector.shape_cast %73 : vector<8x1x8xbf16> to vector<8x8xbf16>
    %75 = vector.extract_strided_slice %46 {offsets = [0, 14, 0], sizes = [8, 1, 8], strides = [1, 1, 1]} : vector<8x16x8xbf16> to vector<8x1x8xbf16>
    %76 = vector.shape_cast %75 : vector<8x1x8xbf16> to vector<8x8xbf16>
    %77 = vector.extract_strided_slice %46 {offsets = [0, 15, 0], sizes = [8, 1, 8], strides = [1, 1, 1]} : vector<8x16x8xbf16> to vector<8x1x8xbf16>
    %78 = vector.shape_cast %77 : vector<8x1x8xbf16> to vector<8x8xbf16>
    %79 = tpu.concatenate %48, %50, %52, %54, %56, %58, %60, %62, %64, %66, %68, %70, %72, %74, %76, %78 in 1 : vector<8x8xbf16>, vector<8x8xbf16>, vector<8x8xbf16>, vector<8x8xbf16>, vector<8x8xbf16>, vector<8x8xbf16>, vector<8x8xbf16>, vector<8x8xbf16>, vector<8x8xbf16>, vector<8x8xbf16>, vector<8x8xbf16>, vector<8x8xbf16>, vector<8x8xbf16>, vector<8x8xbf16>, vector<8x8xbf16>, vector<8x8xbf16> -> vector<8x128xbf16>
    %c0_36 = arith.constant 0 : index
    %c0_37 = arith.constant 0 : index
    %c0_38 = arith.constant 0 : index
    %80 = vector.load %arg6[%c0_36, %c0_37, %c0_38] : memref<1x8x128xbf16, #tpu.memory_space<vmem>>, vector<1x8x128xbf16>
    %81 = vector.shape_cast %80 : vector<1x8x128xbf16> to vector<8x128xbf16>
    %82 = vector.shape_cast %79 : vector<8x128xbf16> to vector<1x8x128xbf16>
    tpu.vector_store %arg6[%c0_36, %c0_37, %c0_38], %82 {strides = array<i32>} : memref<1x8x128xbf16, #tpu.memory_space<vmem>>, vector<1x8x128xbf16>,
    return
  }
  func.func @transform_0(%arg0: i32, %arg1: i32, %arg2: i32) -> (i32, i32, i32, i32) {
    %c0_i32 = arith.constant 0 : i32
    %c0_i32_0 = arith.constant 0 : i32
    %c0_i32_1 = arith.constant 0 : i32
    %c0_i32_2 = arith.constant 0 : i32
    return %arg0, %c0_i32, %c0_i32_0, %c0_i32_1 : i32, i32, i32, i32
  }
  func.func @transform_1(%arg0: i32, %arg1: i32, %arg2: i32) -> (i32, i32) {
    %c0_i32 = arith.constant 0 : i32
    %c0_i32_0 = arith.constant 0 : i32
    return %c0_i32, %arg1 : i32, i32
  }
  func.func @transform_2(%arg0: i32, %arg1: i32, %arg2: i32) -> (i32, i32, i32) {
    %c0_i32 = arith.constant 0 : i32
    %c0_i32_0 = arith.constant 0 : i32
    %c0_i32_1 = arith.constant 0 : i32
    return %c0_i32, %c0_i32_0, %arg1 : i32, i32, i32
  }
  func.func @transform_3(%arg0: i32, %arg1: i32, %arg2: i32) -> (i32, i32, i32) {
    %c0_i32 = arith.constant 0 : i32
    %c0_i32_0 = arith.constant 0 : i32
    return %arg0, %arg2, %c0_i32 : i32, i32, i32
  }
}

module attributes {stable_mosaic.version = 11 : i64} {
  func.func @_conv3x3_kernel(%arg0: i32, %arg1: i32, %arg2: i32, %arg3: memref<1x18x18x8xbf16, #tpu.memory_space<vmem>>, %arg4: memref<72x8xbf16, #tpu.memory_space<vmem>>, %arg5: memref<1x1x8xf32, #tpu.memory_space<vmem>>, %arg6: memref<1x8x128xf32, #tpu.memory_space<vmem>>) attributes {dimension_semantics = [#tpu.dimension_semantics<parallel>, #tpu.dimension_semantics<parallel>, #tpu.dimension_semantics<parallel>], iteration_bounds = array<i64: 2, 1, 2>, scalar_prefetch = 0 : i64, scratch_operands = 0 : i64, tpu.core_type = #tpu.core_type<tc>, window_params = [{transform_indices = @transform_0, window_bounds = array<i64: 1, 18, 18, 8>}, {transform_indices = @transform_1, window_bounds = array<i64: 72, 8>}, {transform_indices = @transform_2, window_bounds = array<i64: 1, 1, 8>}, {transform_indices = @transform_3, window_bounds = array<i64: 1, 8, 128>}]} {
    %c8_i32 = arith.constant 8 : i32
    %0 = arith.muli %arg2, %c8_i32 : i32
    %1 = tpu.assume_multiple %0, 8 : i32
    %c0_i32 = arith.constant 0 : i32
    %2 = arith.addi %1, %c0_i32 : i32
    %c0 = arith.constant 0 : index
    %3 = arith.index_cast %2 : i32 to index
    %c0_0 = arith.constant 0 : index
    %c0_1 = arith.constant 0 : index
    %4 = vector.load %arg3[%c0, %3, %c0_0, %c0_1] : memref<1x18x18x8xbf16, #tpu.memory_space<vmem>>, vector<1x8x16x8xbf16>
    %5 = vector.shape_cast %4 : vector<1x8x16x8xbf16> to vector<8x16x8xbf16>
    %c0_i32_2 = arith.constant 0 : i32
    %6 = arith.addi %1, %c0_i32_2 : i32
    %c0_3 = arith.constant 0 : index
    %7 = arith.index_cast %6 : i32 to index
    %c1 = arith.constant 1 : index
    %c0_4 = arith.constant 0 : index
    %8 = vector.load %arg3[%c0_3, %7, %c1, %c0_4] : memref<1x18x18x8xbf16, #tpu.memory_space<vmem>>, vector<1x8x16x8xbf16>
    %9 = vector.shape_cast %8 : vector<1x8x16x8xbf16> to vector<8x16x8xbf16>
    %c0_i32_5 = arith.constant 0 : i32
    %10 = arith.addi %1, %c0_i32_5 : i32
    %c0_6 = arith.constant 0 : index
    %11 = arith.index_cast %10 : i32 to index
    %c2 = arith.constant 2 : index
    %c0_7 = arith.constant 0 : index
    %12 = vector.load %arg3[%c0_6, %11, %c2, %c0_7] : memref<1x18x18x8xbf16, #tpu.memory_space<vmem>>, vector<1x8x16x8xbf16>
    %13 = vector.shape_cast %12 : vector<1x8x16x8xbf16> to vector<8x16x8xbf16>
    %c1_i32 = arith.constant 1 : i32
    %14 = arith.addi %1, %c1_i32 : i32
    %c0_8 = arith.constant 0 : index
    %15 = arith.index_cast %14 : i32 to index
    %c0_9 = arith.constant 0 : index
    %c0_10 = arith.constant 0 : index
    %16 = vector.load %arg3[%c0_8, %15, %c0_9, %c0_10] : memref<1x18x18x8xbf16, #tpu.memory_space<vmem>>, vector<1x8x16x8xbf16>
    %17 = vector.shape_cast %16 : vector<1x8x16x8xbf16> to vector<8x16x8xbf16>
    %c1_i32_11 = arith.constant 1 : i32
    %18 = arith.addi %1, %c1_i32_11 : i32
    %c0_12 = arith.constant 0 : index
    %19 = arith.index_cast %18 : i32 to index
    %c1_13 = arith.constant 1 : index
    %c0_14 = arith.constant 0 : index
    %20 = vector.load %arg3[%c0_12, %19, %c1_13, %c0_14] : memref<1x18x18x8xbf16, #tpu.memory_space<vmem>>, vector<1x8x16x8xbf16>
    %21 = vector.shape_cast %20 : vector<1x8x16x8xbf16> to vector<8x16x8xbf16>
    %c1_i32_15 = arith.constant 1 : i32
    %22 = arith.addi %1, %c1_i32_15 : i32
    %c0_16 = arith.constant 0 : index
    %23 = arith.index_cast %22 : i32 to index
    %c2_17 = arith.constant 2 : index
    %c0_18 = arith.constant 0 : index
    %24 = vector.load %arg3[%c0_16, %23, %c2_17, %c0_18] : memref<1x18x18x8xbf16, #tpu.memory_space<vmem>>, vector<1x8x16x8xbf16>
    %25 = vector.shape_cast %24 : vector<1x8x16x8xbf16> to vector<8x16x8xbf16>
    %c2_i32 = arith.constant 2 : i32
    %26 = arith.addi %1, %c2_i32 : i32
    %c0_19 = arith.constant 0 : index
    %27 = arith.index_cast %26 : i32 to index
    %c0_20 = arith.constant 0 : index
    %c0_21 = arith.constant 0 : index
    %28 = vector.load %arg3[%c0_19, %27, %c0_20, %c0_21] : memref<1x18x18x8xbf16, #tpu.memory_space<vmem>>, vector<1x8x16x8xbf16>
    %29 = vector.shape_cast %28 : vector<1x8x16x8xbf16> to vector<8x16x8xbf16>
    %c2_i32_22 = arith.constant 2 : i32
    %30 = arith.addi %1, %c2_i32_22 : i32
    %c0_23 = arith.constant 0 : index
    %31 = arith.index_cast %30 : i32 to index
    %c1_24 = arith.constant 1 : index
    %c0_25 = arith.constant 0 : index
    %32 = vector.load %arg3[%c0_23, %31, %c1_24, %c0_25] : memref<1x18x18x8xbf16, #tpu.memory_space<vmem>>, vector<1x8x16x8xbf16>
    %33 = vector.shape_cast %32 : vector<1x8x16x8xbf16> to vector<8x16x8xbf16>
    %c2_i32_26 = arith.constant 2 : i32
    %34 = arith.addi %1, %c2_i32_26 : i32
    %c0_27 = arith.constant 0 : index
    %35 = arith.index_cast %34 : i32 to index
    %c2_28 = arith.constant 2 : index
    %c0_29 = arith.constant 0 : index
    %36 = vector.load %arg3[%c0_27, %35, %c2_28, %c0_29] : memref<1x18x18x8xbf16, #tpu.memory_space<vmem>>, vector<1x8x16x8xbf16>
    %37 = vector.shape_cast %36 : vector<1x8x16x8xbf16> to vector<8x16x8xbf16>
    %38 = tpu.concatenate %5, %9, %13, %17, %21, %25, %29, %33, %37 in 2 : vector<8x16x8xbf16>, vector<8x16x8xbf16>, vector<8x16x8xbf16>, vector<8x16x8xbf16>, vector<8x16x8xbf16>, vector<8x16x8xbf16>, vector<8x16x8xbf16>, vector<8x16x8xbf16>, vector<8x16x8xbf16> -> vector<8x16x72xbf16>
    %c0_30 = arith.constant 0 : index
    %c0_31 = arith.constant 0 : index
    %39 = vector.load %arg4[%c0_30, %c0_31] : memref<72x8xbf16, #tpu.memory_space<vmem>>, vector<72x8xbf16>
    "tpu.trace_start"() <{level = 10 : i32, message = "hwk,ko->hwo"}> : () -> ()
    %cst = arith.constant dense<0.000000e+00> : vector<8x16x8xf32>
    %40 = tpu.matmul %38, %39, %cst {dimension_numbers = #tpu.dot_dimension_numbers<[2], [0], [0, 1], [1], [0, 0, 0, 1, 1, 1], [], []>} : vector<8x16x72xbf16>, vector<72x8xbf16>, vector<8x16x8xf32> -> vector<8x16x8xf32>
    "tpu.trace_stop"() : () -> ()
    %c0_32 = arith.constant 0 : index
    %c0_33 = arith.constant 0 : index
    %c0_34 = arith.constant 0 : index
    %41 = vector.load %arg5[%c0_32, %c0_33, %c0_34] : memref<1x1x8xf32, #tpu.memory_space<vmem>>, vector<1x1x8xf32>
    %42 = vector.broadcast %41 : vector<1x1x8xf32> to vector<8x16x8xf32>
    %43 = arith.addf %40, %42 : vector<8x16x8xf32>
    %cst_35 = arith.constant 0.000000e+00 : f32
    %44 = vector.broadcast %cst_35 : f32 to vector<8x16x8xf32>
    %45 = arith.maximumf %43, %44 : vector<8x16x8xf32>
    %46 = vector.extract_strided_slice %45 {offsets = [0, 0, 0], sizes = [8, 1, 8], strides = [1, 1, 1]} : vector<8x16x8xf32> to vector<8x1x8xf32>
    %47 = vector.shape_cast %46 : vector<8x1x8xf32> to vector<8x8xf32>
    %48 = vector.extract_strided_slice %45 {offsets = [0, 1, 0], sizes = [8, 1, 8], strides = [1, 1, 1]} : vector<8x16x8xf32> to vector<8x1x8xf32>
    %49 = vector.shape_cast %48 : vector<8x1x8xf32> to vector<8x8xf32>
    %50 = vector.extract_strided_slice %45 {offsets = [0, 2, 0], sizes = [8, 1, 8], strides = [1, 1, 1]} : vector<8x16x8xf32> to vector<8x1x8xf32>
    %51 = vector.shape_cast %50 : vector<8x1x8xf32> to vector<8x8xf32>
    %52 = vector.extract_strided_slice %45 {offsets = [0, 3, 0], sizes = [8, 1, 8], strides = [1, 1, 1]} : vector<8x16x8xf32> to vector<8x1x8xf32>
    %53 = vector.shape_cast %52 : vector<8x1x8xf32> to vector<8x8xf32>
    %54 = vector.extract_strided_slice %45 {offsets = [0, 4, 0], sizes = [8, 1, 8], strides = [1, 1, 1]} : vector<8x16x8xf32> to vector<8x1x8xf32>
    %55 = vector.shape_cast %54 : vector<8x1x8xf32> to vector<8x8xf32>
    %56 = vector.extract_strided_slice %45 {offsets = [0, 5, 0], sizes = [8, 1, 8], strides = [1, 1, 1]} : vector<8x16x8xf32> to vector<8x1x8xf32>
    %57 = vector.shape_cast %56 : vector<8x1x8xf32> to vector<8x8xf32>
    %58 = vector.extract_strided_slice %45 {offsets = [0, 6, 0], sizes = [8, 1, 8], strides = [1, 1, 1]} : vector<8x16x8xf32> to vector<8x1x8xf32>
    %59 = vector.shape_cast %58 : vector<8x1x8xf32> to vector<8x8xf32>
    %60 = vector.extract_strided_slice %45 {offsets = [0, 7, 0], sizes = [8, 1, 8], strides = [1, 1, 1]} : vector<8x16x8xf32> to vector<8x1x8xf32>
    %61 = vector.shape_cast %60 : vector<8x1x8xf32> to vector<8x8xf32>
    %62 = vector.extract_strided_slice %45 {offsets = [0, 8, 0], sizes = [8, 1, 8], strides = [1, 1, 1]} : vector<8x16x8xf32> to vector<8x1x8xf32>
    %63 = vector.shape_cast %62 : vector<8x1x8xf32> to vector<8x8xf32>
    %64 = vector.extract_strided_slice %45 {offsets = [0, 9, 0], sizes = [8, 1, 8], strides = [1, 1, 1]} : vector<8x16x8xf32> to vector<8x1x8xf32>
    %65 = vector.shape_cast %64 : vector<8x1x8xf32> to vector<8x8xf32>
    %66 = vector.extract_strided_slice %45 {offsets = [0, 10, 0], sizes = [8, 1, 8], strides = [1, 1, 1]} : vector<8x16x8xf32> to vector<8x1x8xf32>
    %67 = vector.shape_cast %66 : vector<8x1x8xf32> to vector<8x8xf32>
    %68 = vector.extract_strided_slice %45 {offsets = [0, 11, 0], sizes = [8, 1, 8], strides = [1, 1, 1]} : vector<8x16x8xf32> to vector<8x1x8xf32>
    %69 = vector.shape_cast %68 : vector<8x1x8xf32> to vector<8x8xf32>
    %70 = vector.extract_strided_slice %45 {offsets = [0, 12, 0], sizes = [8, 1, 8], strides = [1, 1, 1]} : vector<8x16x8xf32> to vector<8x1x8xf32>
    %71 = vector.shape_cast %70 : vector<8x1x8xf32> to vector<8x8xf32>
    %72 = vector.extract_strided_slice %45 {offsets = [0, 13, 0], sizes = [8, 1, 8], strides = [1, 1, 1]} : vector<8x16x8xf32> to vector<8x1x8xf32>
    %73 = vector.shape_cast %72 : vector<8x1x8xf32> to vector<8x8xf32>
    %74 = vector.extract_strided_slice %45 {offsets = [0, 14, 0], sizes = [8, 1, 8], strides = [1, 1, 1]} : vector<8x16x8xf32> to vector<8x1x8xf32>
    %75 = vector.shape_cast %74 : vector<8x1x8xf32> to vector<8x8xf32>
    %76 = vector.extract_strided_slice %45 {offsets = [0, 15, 0], sizes = [8, 1, 8], strides = [1, 1, 1]} : vector<8x16x8xf32> to vector<8x1x8xf32>
    %77 = vector.shape_cast %76 : vector<8x1x8xf32> to vector<8x8xf32>
    %78 = tpu.concatenate %47, %49, %51, %53, %55, %57, %59, %61, %63, %65, %67, %69, %71, %73, %75, %77 in 1 : vector<8x8xf32>, vector<8x8xf32>, vector<8x8xf32>, vector<8x8xf32>, vector<8x8xf32>, vector<8x8xf32>, vector<8x8xf32>, vector<8x8xf32>, vector<8x8xf32>, vector<8x8xf32>, vector<8x8xf32>, vector<8x8xf32>, vector<8x8xf32>, vector<8x8xf32>, vector<8x8xf32>, vector<8x8xf32> -> vector<8x128xf32>
    %c0_36 = arith.constant 0 : index
    %c0_37 = arith.constant 0 : index
    %c0_38 = arith.constant 0 : index
    %79 = vector.load %arg6[%c0_36, %c0_37, %c0_38] : memref<1x8x128xf32, #tpu.memory_space<vmem>>, vector<1x8x128xf32>
    %80 = vector.shape_cast %79 : vector<1x8x128xf32> to vector<8x128xf32>
    %81 = vector.shape_cast %78 : vector<8x128xf32> to vector<1x8x128xf32>
    tpu.vector_store %arg6[%c0_36, %c0_37, %c0_38], %81 {strides = array<i32>} : memref<1x8x128xf32, #tpu.memory_space<vmem>>, vector<1x8x128xf32>,
    return
  }
  func.func @transform_0(%arg0: i32, %arg1: i32, %arg2: i32) -> (i32, i32, i32, i32) {
    %c0_i32 = arith.constant 0 : i32
    %c0_i32_0 = arith.constant 0 : i32
    %c0_i32_1 = arith.constant 0 : i32
    %c0_i32_2 = arith.constant 0 : i32
    return %arg0, %c0_i32, %c0_i32_0, %c0_i32_1 : i32, i32, i32, i32
  }
  func.func @transform_1(%arg0: i32, %arg1: i32, %arg2: i32) -> (i32, i32) {
    %c0_i32 = arith.constant 0 : i32
    %c0_i32_0 = arith.constant 0 : i32
    return %c0_i32, %arg1 : i32, i32
  }
  func.func @transform_2(%arg0: i32, %arg1: i32, %arg2: i32) -> (i32, i32, i32) {
    %c0_i32 = arith.constant 0 : i32
    %c0_i32_0 = arith.constant 0 : i32
    %c0_i32_1 = arith.constant 0 : i32
    return %c0_i32, %c0_i32_0, %arg1 : i32, i32, i32
  }
  func.func @transform_3(%arg0: i32, %arg1: i32, %arg2: i32) -> (i32, i32, i32) {
    %c0_i32 = arith.constant 0 : i32
    %c0_i32_0 = arith.constant 0 : i32
    return %arg0, %arg2, %c0_i32 : i32, i32, i32
  }
}

</mosaic_0001>

<bundles_post_ra>
// kernel: a_call__.3
= control target key start
LH: loop header
LB: loop body
LE: loop exit
PB: predicated region body
PF: predicated region fallthrough
CT: control target
= control target key end

     0   :  { %s2243_s12 = smov 0   ;;  %s2245_s13 = smov 0   ;;  %s3200_s0 = inlined_call_operand.vmem [shape: bf16[2,18,18,4], index: 0, kind: input, shape index: {}]   ;;  %s3201_s1 = inlined_call_operand.vmem [shape: bf16[36,8], index: 1, kind: input, shape index: {}]   ;;  %s3202_s2 = inlined_call_operand.vmem [shape: f32[1,1,8], index: 2, kind: input, shape index: {}]   ;;  %s3203_s3 = inlined_call_operand.vmem [shape: bf16[2,16,128], index: 3, kind: output, shape index: {}]  }
   0x1   :  { %s2247_s14 = smov 0   ;;  %s2249_s15 = smov 0  }
   0x2   :  { %s2251_s16 = smov 0  }
   0x3 LB: > { %s25_s17 = sadd.s32 1, %s2194_s14  ;;  %s32_s18 = sadd.s32 1, %s2198_s15  ;;  %s2202_s16 = sphi %s2251_s16, %s13_s16   ;;  %s2198_s15 = sphi %s2249_s15, %s3230_s15   ;;  %s2194_s14 = sphi %s2247_s14, %s3229_s14   ;;  %s2190_s13 = sphi %s2245_s13, %s3228_s13   ;;  %s2186_s12 = sphi %s2243_s12, %s3227_s12  }
   0x4   : > { %p26_p0 = scmp.ge.s32.totalorder %s25_s17, 2  ;;  %p1850_p1 = scmp.ge.s32.totalorder %s2202_s16, 1 }
   0x5   : > { %p175_p2 = scmp.lt.s32.totalorder %s2202_s16, 5 }
   0x6   : > { %s3232_s17 = smov (%p26_p0, %s25_s17), 0  ;;  %s3234_s18 = smov (!%p26_p0, %s32_s18), %s2198_s15 }
   0x7   : > { %p176_p3 = pnand %p1850_p1, %p175_p2  ;;  %p34_p4 = scmp.ge.s32.totalorder %s3234_s18, 2 }
   0x8   : > { %p209_p5 = scmp.lt.s32.totalorder (!%p176_p3), %s2190_s13, 1  ;;  %s1959_s19 = smul.u32 (!%p176_p3), 96, %s2186_s12 }
   0x9   : > { %s3236_s18 = smov (%p34_p4, %s3234_s18), 0  ;;  %179 = sbr.rel (%p176_p3) target bundleno = 614 (0x266), region = 32 }
   0xa   : > { %s2204_s25 = smov (!%p176_p3), 12   ;;  %s2205_s26 = smov (!%p176_p3), 8  }
   0xb   : > { %s2206_s27 = smov (!%p176_p3), 4   ;;  %s2207_s28 = smov (!%p176_p3), 16  }
   0xc   : > { %s2208_s29 = smov (!%p176_p3), 20   ;;  %s2209_s30 = smov (!%p176_p3), 24  }
   0xd   : > { %s2210_s4 = smov (!%p176_p3), 28   ;;  %s2211_s5 = smov (!%p176_p3), 32  }
   0xe   : > { %s3238_s13 = smov (!%p209_p5, %s2190_s13), 1  ;;  %vm539_vm0 = vcmask 1046528   ;;  %vm402_vm1 = vsmask.f32 7424  ;;  %vm1092_vm2 = vcmask 31744   ;;  %vm1109_vm3 = vcmask 64512  }
   0xf   : > { %s2066_s20 = smul.u32 216, %s3238_s13  ;;  %vm1269_vm4 = vcmask 1041408   ;;  %vm1126_vm5 = vcmask 97280   ;;  %vm1143_vm6 = vcmask 130048   ;;  %vm1160_vm7 = vcmask 162816   ;;  %s2212_s21 = smov 40  }
  0x10   : > { %vm1177_vm8 = vcmask 195584   ;;  %vm1194_vm9 = vcmask 228352   ;;  %vm1211_vm10 = vcmask 261120   ;;  %vm1252_vm11 = vcmask 293888   ;;  %s2213_s22 = smov 48   ;;  %p223_p6 = scmp.lt.s32.totalorder %s2186_s12, 1 }
  0x11   : > { %s213_s23 = scalar_lea.vmem %s3200_s0, %s2066_s20  ;;  %vm1371_vm12 = vcmask 1041409   ;;  %vm1374_vm13 = vcmask 1042434   ;;  %vm1377_vm14 = vcmask 1043459   ;;  %vm1380_vm15 = vcmask 1044484  }
  0x12   : > { %s2282_s24 = scalar_lea.vmem %s213_s23, %s1959_s19  ;;  %s2214_s23 = smov 72  }
  0x13   : > { %v2027_v0 = vld [vmem:[%s2282_s24 + $0x30] sm:$0xf0]  ;;  %v254_v1 = vld [vmem:[%s2282_s24 + $0x38] sm:$0x1]  ;;  %v2028_v2 = vld [vmem:[%s2282_s24 + $0x30] sm:$0xe] }
  0x14   : > { %v390_v3 = vunpack.c.l.b16 %v254_v1  ;;  %v2029_v4 = vor.u32 %v2028_v2, %v2027_v0  ;;  %v2288_v5 = vld [vmem:[%s2282_s24] sm:$0xff]   ;;  %v250_v6 = vld [vmem:[%s2282_s24 + $0x8] sm:$0x1]  ;;  %v2030_v12 = vld [vmem:[%s2282_s24 + $0x48] sm:$0xf0]  ;;  %s3240_s12 = smov (!%p223_p6, %s2186_s12), 1 }
  0x15   : > { %v2292_v7 = vld [vmem:[%s2282_s24 + $0x3c] sm:$0xff]   ;;  %v386_v9 = vunpack.c.l.b16 %v250_v6  ;;  %v404_v10 = vshrl.u32 %v2288_v5, 16  ;;  %v406_v11 = vshll.u32 %v2288_v5, 16  ;;  %v256_v13 = vld [vmem:[%s2282_s24 + $0x50] sm:$0x1]  ;;  %v2305_v18 = vld [vmem:[%s2282_s24 + $0x48] sm:$0xff]  }
  0x16   : > { %v2295_v8 = vld [vmem:[%s2282_s24 + $0x3c] sm:$0xf0]  ;;  %v2301_v14 = vpack.c.b16 %v390_v3, %v390_v3  ;;  %v552_v15 = vrot.slane %v2029_v4, 1  ;;  %v2031_v16 = vld [vmem:[%s2282_s24 + $0x48] sm:$0xe]  ;;  %v392_v17 = vunpack.c.l.b16 %v256_v13  ;;  %v478_v26 = vshll.u32 %v2305_v18, 16  ;;  %628 = vrot.lane.b32.xlu2 %v2292_v7, %s2204_s25 }
  0x17   : > { %v2021_v19 = vld [vmem:[%s2282_s24] sm:$0xf0]  ;;  %v394_v20 = vpack.c.b16 %v386_v9, %v386_v9  ;;  %v408_v21 = vrot.slane %v406_v11, 1  ;;  %v2032_v22 = vor.u32 %v2031_v16, %v2030_v12  ;;  %v2022_v23 = vld [vmem:[%s2282_s24] sm:$0xe]  ;;  %v476_v29 = vshrl.u32 %v2305_v18, 16 }
  0x18   : > { %v553_v24 = vrot.slane %v2301_v14, 1  ;;  %v400_v25 = vpack.c.b16 %v392_v17, %v392_v17  ;;  %v2023_v30 = vor.u32 %v2022_v23, %v2021_v19  ;;  %v2313_v31 = vld [vmem:[%s2282_s24 + $0x30] sm:$0xff]   ;;  %v480_v35 = vrot.slane %v478_v26, 1  ;;  %v1879_v40 = vld [vmem:[%s2282_s24 + $0x44] sm:$0x1]  ;;  %v2325_v45 = vld [vmem:[%s2282_s24 + $0x18] sm:$0xff]  }
  0x19   : > { %v409_v27 = vor.u32 %v408_v21, %v404_v10  ;;  %v411_v28 = vshll.u32 %v394_v20, 16  ;;  %v558_v33 = vrot.slane %v2032_v22, 1  ;;  %v541_v39 = vrot.slane %v394_v20, 1  ;;  %v252_v42 = vld [vmem:[%s2282_s24 + $0x20] sm:$0x1]  ;;  %v1871_v63 = vld [vmem:[%s2282_s24 + $0x54] sm:$0xff]  }
  0x1a   : > { %v554_v32 = vsel %vm539_vm0, %v552_v15, %v553_v24  ;;  %v559_v34 = vrot.slane %v400_v25, 1  ;;  %v483_v37 = vshll.u32 %v400_v25, 16  ;;  %v540_v38 = vrot.slane %v2023_v30, 1  ;;  %v2129_v58 = vld [vmem:[%s2282_s24 + $0x3c] sm:$0xe]  ;;  %v1859_v10 = vld [vmem:[%s2282_s24 + $0xc] sm:$0xff]  }
  0x1b   : > { %572 = vrot.lane.b32.xlu0 %v554_v32, %s2205_s26  ;;  %v413_v36 = vrot.slane %v411_v28, 1  ;;  %v454_v41 = vshll.u32 %v2313_v31, 16  ;;  %v711_v44 = vshll.u32 %v2292_v7, 16  ;;  %v2329_v47 = vor.u32 %v480_v35, %v476_v29  ;;  %v2343_v0 = vld [vmem:[%s2282_s24 + $0x54] sm:$0xf0] }
  0x1c   : > { %v560_v46 = vsel %vm539_vm0, %v558_v33, %v559_v34  ;;  %v452_v48 = vshrl.u32 %v2313_v31, 16  ;;  %v648_v49 = vunpack.c.l.b16 %v1879_v40  ;;  %v485_v50 = vrot.slane %v483_v37, 1  ;;  %v2131_v11 = vld [vmem:[%s2282_s24 + $0xc] sm:$0xf0]  ;;  %v1881_v12 = vld [vmem:[%s2282_s24 + $0x5c] sm:$0x1] }
  0x1d   : > { %v414_v43 = vsel %vm402_vm1, %v409_v27, %v413_v36  ;;  %v542_v51 = vsel %vm539_vm0, %v540_v38, %v541_v39  ;;  %v459_v52 = vshll.u32 %v2301_v14, 16  ;;  %v388_v53 = vunpack.c.l.b16 %v252_v42  ;;  %v1875_v17 = vld [vmem:[%s2282_s24 + $0x14] sm:$0x1]  ;;  %v2024_v27 = vld [vmem:[%s2282_s24 + $0x18] sm:$0xf0]  ;;  %v1863_v39 = vld [vmem:[%s2282_s24 + $0x24] sm:$0xff]  }
  0x1e   : > { %499 = vrot.lane.b32.xlu1 %v414_v43, %s2206_s27  ;;  %v456_v54 = vrot.slane %v454_v41, 1  ;;  %v656_v55 = vpack.c.b16 %v648_v49, %v648_v49  ;;  %v428_v56 = vshrl.u32 %v2325_v45, 16  ;;  %v430_v57 = vshll.u32 %v2325_v45, 16  ;;  %564 = vrot.lane.b32.xlu2 %v542_v51, %s2205_s26  ;;  %v2132_v36 = vld [vmem:[%s2282_s24 + $0xc] sm:$0xe] }
  0x1f   : > { %v2337_v59 = vpack.c.b16 %v388_v53, %v388_v53  ;;  %v709_v60 = vshrl.u32 %v2292_v7, 16  ;;  %v713_v61 = vrot.slane %v711_v44, 1  ;;  %v486_v1 = vsel %vm402_vm1, %v2329_v47, %v485_v50  ;;  %v2377_v40 = vld [vmem:[%s2282_s24 + $0x24] sm:$0xf0]  ;;  %v2135_v53 = vld [vmem:[%s2282_s24 + $0x54] sm:$0xe] }
  0x20   : > { %v432_v62 = vrot.slane %v430_v57, 1  ;;  %v716_v2 = vshll.u32 %v656_v55, 16  ;;  %v2349_v4 = vor.u32 %v456_v54, %v452_v48  ;;  %v461_v6 = vrot.slane %v459_v52, 1  ;;  %v1877_v48 = vld [vmem:[%s2282_s24 + $0x2c] sm:$0x1] }
  0x21   : > { %v435_v3 = vshll.u32 %v2337_v59, 16  ;;  %v714_v13 = vor.u32 %v713_v61, %v709_v60  ;;  %v2130_v16 = vor.u32 %v2129_v58, %v2295_v8  ;;  %v650_v20 = vunpack.c.l.b16 %v1881_v12  ;;  %v2025_v8 = vld [vmem:[%s2282_s24 + $0x18] sm:$0xe]  ;;  %v1913_v54 = vld [vmem:[%s2282_s24 + $0x50] sm:$0x1] }
  0x22   : > { %v2351_v9 = vor.u32 %v432_v62, %v428_v56  ;;  %v718_v14 = vrot.slane %v716_v2, 1  ;;  %v462_v19 = vsel %vm402_vm1, %v2349_v4, %v461_v6  ;;  %v809_v21 = vrot.slane %v656_v55, 1 }
  0x23   : > { %576 = vrot.lane.b32.xlu0 %v560_v46, %s2205_s26  ;;  %v437_v7 = vrot.slane %v435_v3, 1  ;;  %v644_v22 = vunpack.c.l.b16 %v1875_v17  ;;  %v735_v24 = vshll.u32 %v1871_v63, 16  ;;  %v808_v25 = vrot.slane %v2130_v16, 1  ;;  %v1915_v16 = vld [vmem:[%s2282_s24 + $0x68] sm:$0x1] }
  0x24   : > { %v719_v23 = vsel %vm402_vm1, %v714_v13, %v718_v14  ;;  %v2366_v26 = vpack.c.b16 %v650_v20, %v650_v20  ;;  %v663_v28 = vshll.u32 %v1859_v10, 16  ;;  %v733_v32 = vshrl.u32 %v1871_v63, 16  ;;  %v2051_v14 = vld [vmem:[%s2282_s24 + $0x48] sm:$0xf0] }
  0x25   : > { %v438_v15 = vsel %vm402_vm1, %v2351_v9, %v437_v7  ;;  %v652_v29 = vpack.c.b16 %v644_v22, %v644_v22  ;;  %v810_v30 = vsel %vm539_vm0, %v808_v25, %v809_v21  ;;  %v737_v33 = vrot.slane %v735_v24, 1  ;;  %v1909_v21 = vld [vmem:[%s2282_s24 + $0x20] sm:$0x1]  ;;  %v2138_v24 = vld [vmem:[%s2282_s24 + $0x24] sm:$0xe] }
  0x26   : > { %511 = vrot.lane.b32.xlu1 %v486_v1, %s2206_s27  ;;  %503 = vrot.lane.b32.xlu2 %v438_v15, %s2206_s27  ;;  %v740_v34 = vshll.u32 %v2366_v26, 16  ;;  %v2026_v35 = vor.u32 %v2025_v8, %v2024_v27  ;;  %v661_v37 = vshrl.u32 %v1859_v10, 16  ;;  %v665_v38 = vrot.slane %v663_v28, 1  ;;  %v2052_v15 = vld [vmem:[%s2282_s24 + $0x48] sm:$0xe] }
  0x27   : > { %v668_v41 = vshll.u32 %v652_v29, 16  ;;  %v738_v42 = vor.u32 %v737_v33, %v733_v32  ;;  %v547_v46 = vrot.slane %v2337_v59, 1  ;;  %v2133_v52 = vor.u32 %v2132_v36, %v2131_v11 }
  0x28   : > { %v742_v43 = vrot.slane %v740_v34, 1  ;;  %v546_v44 = vrot.slane %v2026_v35, 1  ;;  %v666_v49 = vor.u32 %v665_v38, %v661_v37  ;;  %v646_v55 = vunpack.c.l.b16 %v1877_v48  ;;  %v2421_v38 = vld [vmem:[%s2282_s24 + $0x3c] sm:$0xff]  }
  0x29   : > { %v670_v50 = vrot.slane %v668_v41, 1  ;;  %v797_v57 = vrot.slane %v652_v29, 1  ;;  %v904_v58 = vunpack.c.l.b16 %v1913_v54  ;;  %v687_v60 = vshll.u32 %v1863_v39, 16 }
  0x2a   : > { %v743_v51 = vsel %vm402_vm1, %v738_v42, %v742_v43  ;;  %v548_v56 = vsel %vm539_vm0, %v546_v44, %v547_v46  ;;  %v796_v61 = vrot.slane %v2133_v52, 1  ;;  %v2390_v62 = vpack.c.b16 %v646_v55, %v646_v55  ;;  %v2054_v44 = vld [vmem:[%s2282_s24 + $0x60] sm:$0xf0]  ;;  %v2045_v52 = vld [vmem:[%s2282_s24 + $0x18] sm:$0xf0] }
  0x2b   : > { %507 = vrot.lane.b32.xlu0 %v462_v19, %s2206_s27  ;;  %v671_v59 = vsel %vm402_vm1, %v666_v49, %v670_v50  ;;  %v912_v1 = vpack.c.b16 %v904_v58, %v904_v58  ;;  %v685_v3 = vshrl.u32 %v1863_v39, 16  ;;  %v689_v6 = vrot.slane %v687_v60, 1  ;;  %v255_v49 = vld [vmem:[%s2282_s24 + $0x44] sm:$0x1]  ;;  %v1911_v50 = vld [vmem:[%s2282_s24 + $0x38] sm:$0x1] }
  0x2c   : > { %v798_v2 = vsel %vm539_vm0, %v796_v61, %v797_v57  ;;  %v692_v7 = vshll.u32 %v2390_v62, 16  ;;  %v2053_v20 = vor.u32 %v2052_v15, %v2051_v14  ;;  %v906_v22 = vunpack.c.l.b16 %v1915_v16  ;;  %v2447_v60 = vld [vmem:[%s2282_s24 + $0x54] sm:$0xf0]  ;;  %v2048_v14 = vld [vmem:[%s2282_s24 + $0x30] sm:$0xf0] }
  0x2d   : > { %v690_v12 = vor.u32 %v689_v6, %v685_v3  ;;  %v900_v27 = vunpack.c.l.b16 %v1909_v21  ;;  %v1065_v29 = vrot.slane %v912_v1, 1  ;;  %v2139_v37 = vor.u32 %v2138_v24, %v2377_v40  ;;  %v2055_v40 = vld [vmem:[%s2282_s24 + $0x60] sm:$0xe]  ;;  %v2455_v6 = vld [vmem:[%s2282_s24 + $0xc] sm:$0xff]  }
  0x2e   : > { %764 = vrot.lane.b32.xlu1 %v719_v23, %s2207_s28  ;;  %828 = vrot.lane.b32.xlu2 %v810_v30, %s2208_s29  ;;  %v694_v13 = vrot.slane %v692_v7, 1  ;;  %v1064_v28 = vrot.slane %v2053_v20, 1  ;;  %v914_v30 = vpack.c.b16 %v906_v22, %v906_v22  ;;  %v803_v48 = vrot.slane %v2390_v62, 1  ;;  %v2458_v7 = vld [vmem:[%s2282_s24 + $0xc] sm:$0xf0] }
  0x2f   : > { %v908_v32 = vpack.c.b16 %v900_v27, %v900_v27  ;;  %v802_v46 = vrot.slane %v2139_v37, 1  ;;  %v2056_v54 = vor.u32 %v2055_v40, %v2054_v44  ;;  %v902_v58 = vunpack.c.l.b16 %v1911_v50  ;;  %v2049_v16 = vld [vmem:[%s2282_s24 + $0x30] sm:$0xe]  ;;  %v251_v20 = vld [vmem:[%s2282_s24 + $0x14] sm:$0x1] }
  0x30   : > { %v695_v19 = vsel %vm402_vm1, %v690_v12, %v694_v13  ;;  %v1066_v35 = vsel %vm539_vm0, %v1064_v28, %v1065_v29  ;;  %v996_v36 = vshll.u32 %v914_v30, 16  ;;  %v466_v3 = vshll.u32 %v2421_v38, 16 }
  0x31   : > { %v924_v41 = vshll.u32 %v908_v32, 16  ;;  %v804_v57 = vsel %vm539_vm0, %v802_v46, %v803_v48  ;;  %v1053_v12 = vrot.slane %v908_v32, 1  ;;  %v464_v15 = vshrl.u32 %v2421_v38, 16  ;;  %v2144_v48 = vld [vmem:[%s2282_s24 + $0x54] sm:$0xe] }
  0x32   : > { %v998_v43 = vrot.slane %v996_v36, 1  ;;  %v387_v27 = vunpack.c.l.b16 %v251_v20  ;;  %v418_v36 = vshll.u32 %v2455_v6, 16 }
  0x33   : > { %620 = vrot.lane.b32.xlu0 %v1859_v10, %s2204_s25  ;;  %v972_v10 = vshll.u32 %v912_v1, 16  ;;  %v1071_v1 = vrot.slane %v914_v30, 1 }
  0x34   : > { %v420_v50 = vrot.slane %v418_v36, 1 }
  0x35   : > { %v974_v17 = vrot.slane %v972_v10, 1  ;;  %v910_v10 = vpack.c.b16 %v902_v58, %v902_v58  ;;  %v2487_v58 = vld [vmem:[%s2282_s24 + $0x24] sm:$0xff]  }
  0x36   : > { %632 = vrot.lane.b32.xlu1 %v1871_v63, %s2204_s25  ;;  %768 = vrot.lane.b32.xlu2 %v743_v51, %s2207_s28  ;;  %v2136_v63 = vor.u32 %v2135_v53, %v2343_v0  ;;  %v815_v0 = vrot.slane %v2366_v26, 1  ;;  %v2412_v26 = vld [vmem:[%s2282_s24 + $0x60] sm:$0xff]   ;;  %v926_v51 = vrot.slane %v924_v41, 1  ;;  %v2046_v53 = vld [vmem:[%s2282_s24 + $0x18] sm:$0xe] }
  0x37   : > { %v975_v25 = vsel %vm402_vm1, %v2329_v47, %v974_v17  ;;  %v991_v8 = vshll.u32 %v2412_v26, 16  ;;  %v989_v33 = vshrl.u32 %v2412_v26, 16  ;;  %v2047_v61 = vor.u32 %v2046_v53, %v2045_v52 }
  0x38   : > { %v814_v11 = vrot.slane %v2136_v63, 1  ;;  %v927_v62 = vsel %vm402_vm1, %v2351_v9, %v926_v51  ;;  %v1070_v63 = vrot.slane %v2056_v54, 1  ;;  %v468_v17 = vrot.slane %v466_v3, 1 }
  0x39   : > { %v993_v34 = vrot.slane %v991_v8, 1  ;;  %v948_v22 = vshll.u32 %v910_v10, 16  ;;  %v2145_v3 = vor.u32 %v2144_v48, %v2447_v60 }
  0x3a   : > { %v816_v23 = vsel %vm539_vm0, %v814_v11, %v815_v0  ;;  %v257_v11 = vld [vmem:[%s2282_s24 + $0x5c] sm:$0x1]  ;;  %v1052_v0 = vrot.slane %v2047_v61, 1  ;;  %v1072_v13 = vsel %vm539_vm0, %v1070_v63, %v1071_v1  ;;  %v469_v8 = vor.u32 %v468_v17, %v464_v15  ;;  %v1880_v61 = vld [vmem:[%s2282_s24 + $0x50] sm:$0x1] }
  0x3b   : > { %568 = vrot.lane.b32.xlu0 %v548_v56, %s2205_s26  ;;  %v2429_v42 = vor.u32 %v993_v34, %v989_v33  ;;  %v391_v56 = vunpack.c.l.b16 %v255_v49  ;;  %v393_v21 = vunpack.c.l.b16 %v257_v11  ;;  %v950_v32 = vrot.slane %v948_v22, 1 }
  0x3c   : > { %v1054_v24 = vsel %vm539_vm0, %v1052_v0, %v1053_v12  ;;  %v1059_v34 = vrot.slane %v910_v10, 1  ;;  %v416_v49 = vshrl.u32 %v2455_v6, 16  ;;  %v649_v11 = vunpack.c.l.b16 %v1880_v61  ;;  %v253_v0 = vld [vmem:[%s2282_s24 + $0x2c] sm:$0x1] }
  0x3d   : > { %v999_v55 = vsel %vm402_vm1, %v2429_v42, %v998_v43  ;;  %v401_v29 = vpack.c.b16 %v393_v21, %v393_v21  ;;  %v951_v40 = vsel %vm402_vm1, %v2349_v4, %v950_v32  ;;  %v389_v15 = vunpack.c.l.b16 %v253_v0 }
  0x3e   : > { %756 = vrot.lane.b32.xlu1 %v671_v59, %s2207_s28  ;;  %820 = vrot.lane.b32.xlu2 %v798_v2, %s2208_s29  ;;  %v2444_v59 = vld [vmem:[%s2282_s24 + $0x54] sm:$0xff]   ;;  %v399_v2 = vpack.c.b16 %v391_v56, %v391_v56  ;;  %v657_v17 = vpack.c.b16 %v649_v11, %v649_v11  ;;  %v442_v22 = vshll.u32 %v2487_v58, 16 }
  0x3f   : > { %v490_v30 = vshll.u32 %v2444_v59, 16  ;;  %v488_v41 = vshrl.u32 %v2444_v59, 16  ;;  %v495_v44 = vshll.u32 %v401_v29, 16  ;;  %v397_v21 = vpack.c.b16 %v389_v15, %v389_v15 }
  0x41   : > { %v492_v43 = vrot.slane %v490_v30, 1  ;;  %v497_v54 = vrot.slane %v495_v44, 1  ;;  %v1876_v30 = vld [vmem:[%s2282_s24 + $0x20] sm:$0x1]  ;;  %v550_v48 = vrot.slane %v397_v21, 1 }
  0x43   : > { %884 = vrot.lane.b32.xlu0 %v2305_v18, %s2209_s30  ;;  %v493_v53 = vor.u32 %v492_v43, %v488_v41  ;;  %v2040_v41 = vld [vmem:[%s2282_s24 + $0x48] sm:$0xe] }
  0x45   : > { %v498_v1 = vsel %vm402_vm1, %v493_v53, %v497_v54  ;;  %v2529_v54 = vld [vmem:[%s2282_s24 + $0x54] sm:$0xff]  }
  0x46   : > { %624 = vrot.lane.b32.xlu1 %v1863_v39, %s2204_s25  ;;  %760 = vrot.lane.b32.xlu2 %v695_v19, %s2207_s28  ;;  %v2424_v39 = vld [vmem:[%s2282_s24 + $0x3c] sm:$0xf0]  ;;  %v471_v19 = vshll.u32 %v399_v2, 16 }
  0x48   : > { %v473_v28 = vrot.slane %v471_v19, 1 }
  0x4a   : > { %v474_v37 = vsel %vm402_vm1, %v469_v8, %v473_v28  ;;  %v447_v8 = vshll.u32 %v397_v21, 16 }
  0x4b   : > { %832 = vrot.lane.b32.xlu0 %v816_v23, %s2208_s29  ;;  %v2141_v23 = vld [vmem:[%s2282_s24 + $0x3c] sm:$0xe] }
  0x4c   : > { %v2142_v46 = vor.u32 %v2141_v23, %v2424_v39  ;;  %v2149_v39 = vld [vmem:[%s2282_s24 + $0x24] sm:$0xf0]  ;;  %v2150_v23 = vld [vmem:[%s2282_s24 + $0x24] sm:$0xe] }
  0x4e   : > { %1020 = vrot.lane.b32.xlu1 %v975_v25, %s2210_s4  ;;  %1084 = vrot.lane.b32.xlu2 %v1066_v35, %s2211_s5  ;;  %v2050_v25 = vor.u32 %v2049_v16, %v2048_v14  ;;  %v395_v35 = vpack.c.b16 %v387_v27, %v387_v27  ;;  %v555_v56 = vrot.slane %v2142_v46, 1  ;;  %v562_v14 = vrot.slane %v401_v29, 1 }
  0x4f   : > { %v444_v27 = vrot.slane %v442_v22, 1 }
  0x50   : > { %v1058_v33 = vrot.slane %v2050_v25, 1  ;;  %v423_v51 = vshll.u32 %v395_v35, 16  ;;  %v544_v19 = vrot.slane %v395_v35, 1  ;;  %v440_v25 = vshrl.u32 %v2487_v58, 16  ;;  %v1882_v35 = vld [vmem:[%s2282_s24 + $0x68] sm:$0x1] }
  0x51   : > { %v651_v43 = vunpack.c.l.b16 %v1882_v35 }
  0x52   : > { %v1060_v52 = vsel %vm539_vm0, %v1058_v33, %v1059_v34  ;;  %v425_v63 = vrot.slane %v423_v51, 1  ;;  %v445_v32 = vor.u32 %v444_v27, %v440_v25  ;;  %v449_v33 = vrot.slane %v447_v8, 1 }
  0x53   : > { %876 = vrot.lane.b32.xlu0 %v2325_v45, %s2209_s30  ;;  %v2151_v34 = vor.u32 %v2150_v23, %v2149_v39 }
  0x54   : > { %v450_v44 = vsel %vm402_vm1, %v445_v32, %v449_v33  ;;  %v2578_v32 = vld [vmem:[%s2282_s24 + $0x24] sm:$0xff]  }
  0x55   : > { %v549_v46 = vrot.slane %v2151_v34, 1  ;;  %v2581_v33 = vld [vmem:[%s2282_s24 + $0x24] sm:$0xf0] }
  0x56   : > { %888 = vrot.lane.b32.xlu1 %v2412_v26, %s2209_s30  ;;  %1024 = vrot.lane.b32.xlu2 %v999_v55, %s2210_s4  ;;  %v2147_v55 = vld [vmem:[%s2282_s24 + $0xc] sm:$0xe] }
  0x57   : > { %v551_v53 = vsel %vm539_vm0, %v549_v46, %v550_v48 }
  0x5b   : > { %824 = vrot.lane.b32.xlu0 %v804_v57, %s2208_s29  ;;  %v556_v57 = vrot.slane %v399_v2, 1  ;;  %v2148_v2 = vor.u32 %v2147_v55, %v2458_v7  ;;  %v728_v7 = vshll.u32 %v657_v17, 16  ;;  %v2532_v55 = vld [vmem:[%s2282_s24 + $0x54] sm:$0xf0] }
  0x5d   : > { %v557_v10 = vsel %vm539_vm0, %v555_v56, %v556_v57  ;;  %v543_v60 = vrot.slane %v2148_v2, 1  ;;  %v730_v29 = vrot.slane %v728_v7, 1 }
  0x5e   : > { %1012 = vrot.lane.b32.xlu1 %v927_v62, %s2210_s4  ;;  %1088 = vrot.lane.b32.xlu2 %v1072_v13, %s2211_s5  ;;  %v421_v62 = vor.u32 %v420_v50, %v416_v49  ;;  %v561_v13 = vrot.slane %v2145_v3, 1  ;;  %v659_v50 = vpack.c.b16 %v651_v43, %v651_v43 }
  0x5f   : > { %v731_v36 = vsel %vm402_vm1, %v2329_v47, %v730_v29 }
  0x60   : > { %v426_v12 = vsel %vm402_vm1, %v421_v62, %v425_v63  ;;  %v563_v20 = vsel %vm539_vm0, %v561_v13, %v562_v14  ;;  %v752_v57 = vshll.u32 %v659_v50, 16  ;;  %v2042_v63 = vld [vmem:[%s2282_s24 + $0x60] sm:$0xf0]  ;;  %v2033_v13 = vld [vmem:[%s2282_s24 + $0x18] sm:$0xf0]  ;;  %v818_v22 = vrot.slane %v659_v50, 1 }
  0x61   : > { %v2034_v14 = vld [vmem:[%s2282_s24 + $0x18] sm:$0xe]  ;;  %v2036_v50 = vld [vmem:[%s2282_s24 + $0x30] sm:$0xf0] }
  0x62   : > { %v754_v11 = vrot.slane %v752_v57, 1  ;;  %v2035_v21 = vor.u32 %v2034_v14, %v2033_v13 }
  0x63   : > { %880 = vrot.lane.b32.xlu0 %v2313_v31, %s2209_s30 }
  0x66   : > { %1076 = vrot.lane.b32.xlu1 %v1054_v24, %s2211_s5  ;;  %509 = vrot.lane.b32.xlu2 %v474_v37, %s2206_s27  ;;  %v545_v24 = vsel %vm539_vm0, %v543_v60, %v544_v19  ;;  %v2039_v37 = vld [vmem:[%s2282_s24 + $0x48] sm:$0xf0]  ;;  %v755_v60 = vsel %vm402_vm1, %v2429_v42, %v754_v11  ;;  %v979_v42 = vshll.u32 %v2529_v54, 16 }
  0x6b   : > { %1016 = vrot.lane.b32.xlu0 %v951_v40, %s2210_s4  ;;  %v2041_v40 = vor.u32 %v2040_v41, %v2039_v37  ;;  %v981_v37 = vrot.slane %v979_v42, 1 }
  0x6d   : > { %v811_v51 = vrot.slane %v2041_v40, 1  ;;  %v2153_v40 = vld [vmem:[%s2282_s24 + $0x54] sm:$0xe] }
  0x6e   : > { %1080 = vrot.lane.b32.xlu1 %v1060_v52, %s2211_s5  ;;  %513 = vrot.lane.b32.xlu2 %v498_v1, %s2206_s27  ;;  %v812_v52 = vrot.slane %v657_v17, 1  ;;  %v2043_v1 = vld [vmem:[%s2282_s24 + $0x60] sm:$0xe] }
  0x6f   : > { %v2044_v0 = vor.u32 %v2043_v1, %v2042_v63  ;;  %v1916_v63 = vld [vmem:[%s2282_s24 + $0x74] sm:$0x1] }
  0x70   : > { %v2500_v16 = vpop.permute.xlu2 %628  ;;  %v813_v39 = vsel %vm539_vm0, %v811_v51, %v812_v52  ;;  %v2037_v51 = vld [vmem:[%s2282_s24 + $0x30] sm:$0xe]  ;;  %v907_v13 = vunpack.c.l.b16 %v1916_v63  ;;  %v2162_v63 = vld [vmem:[%s2282_s24 + $0x3c] sm:$0xe] }
  0x73   : > { %574 = vrot.lane.b32.xlu0 %v557_v10, %s2205_s26  ;;  %v1914_v10 = vld [vmem:[%s2282_s24 + $0x5c] sm:$0x1] }
  0x74   : > { %v905_v15 = vunpack.c.l.b16 %v1914_v10 }
  0x76   : > { %501 = vrot.lane.b32.xlu1 %v426_v12, %s2206_s27  ;;  %578 = vrot.lane.b32.xlu2 %v563_v20, %s2205_s26  ;;  %v1878_v12 = vld [vmem:[%s2282_s24 + $0x38] sm:$0x1] }
  0x77   : > { %v647_v20 = vunpack.c.l.b16 %v1878_v12  ;;  %v2617_v12 = vld [vmem:[%s2282_s24 + $0x3c] sm:$0xf0] }
  0x78   : > { %v565_v28 = vpop.permute.xlu2 %564 }
  0x79   : > { %v2573_v8 = vpack.c.b16 %v647_v20, %v647_v20  ;;  %v1912_v20 = vld [vmem:[%s2282_s24 + $0x44] sm:$0x1] }
  0x7a   : > { %v903_v42 = vunpack.c.l.b16 %v1912_v20 }
  0x7b   : > { %630 = vrot.lane.b32.xlu0 %v2305_v18, %s2204_s25  ;;  %v645_v18 = vunpack.c.l.b16 %v1876_v30  ;;  %v704_v43 = vshll.u32 %v2573_v8, 16 }
  0x7d   : > { %v2524_v47 = vpack.c.b16 %v645_v18, %v645_v18  ;;  %v1961_v18 = vld [vmem:[%s3201_s1 + $0x8] sm:$0xff]  ;;  %v706_v57 = vrot.slane %v704_v43, 1 }
  0x7e   : > { %566 = vrot.lane.b32.xlu1 %v545_v24, %s2205_s26  ;;  %622 = vrot.lane.b32.xlu2 %v2325_v45, %s2204_s25  ;;  %v2568_v24 = vpack.c.b16 %v905_v15, %v905_v15  ;;  %v806_v15 = vrot.slane %v2573_v8, 1  ;;  %v929_v8 = vshrl.u32 %v2578_v32, 16 }
  0x7f   : > { %v680_v56 = vshll.u32 %v2524_v47, 16  ;;  %v800_v29 = vrot.slane %v2524_v47, 1 }
  0x80   : > { %v2522_v49 = vpop.permute.xlu2 %503  ;;  %v984_v41 = vshll.u32 %v2568_v24, 16 }
  0x81   : > { %v682_v62 = vrot.slane %v680_v56, 1  ;;  %v1910_v56 = vld [vmem:[%s2282_s24 + $0x2c] sm:$0x1] }
  0x82   : > { %v986_v47 = vrot.slane %v984_v41, 1  ;;  %v901_v11 = vunpack.c.l.b16 %v1910_v56 }
  0x83   : > { %766 = vrot.lane.b32.xlu0 %v731_v36, %s2207_s28  ;;  %v683_v2 = vsel %vm402_vm1, %v2351_v9, %v682_v62  ;;  %v1232_v9 = vld [vmem:[%s3201_s1 + $0x10] sm:$0x3]  ;;  %v977_v36 = vshrl.u32 %v2529_v54, 16  ;;  %v2038_v62 = vor.u32 %v2037_v51, %v2036_v50 }
  0x84   : > { %v1246_v7 = vunpack.c.l.b16 %v1232_v9 }
  0x85   : > { %v982_v48 = vor.u32 %v981_v37, %v977_v36  ;;  %v805_v14 = vrot.slane %v2038_v62, 1 }
  0x86   : > { %505 = vrot.lane.b32.xlu1 %v450_v44, %s2206_s27  ;;  %570 = vrot.lane.b32.xlu2 %v551_v53, %s2205_s26  ;;  %v1249_v27 = vpack.c.b16 %v1246_v7, %v1246_v7  ;;  %v1907_v53 = vld [vmem:[%s2282_s24 + $0x6c] sm:$0xff]   ;;  %s2218_s27 = smov 88  }
  0x87   : > { %v987_v10 = vsel %vm402_vm1, %v982_v48, %v986_v47  ;;  %v807_v7 = vsel %vm539_vm0, %v805_v14, %v806_v15 }
  0x88   : > { %v2539_v61 = vpop.permute.xlu2 %828  ;;  %v1271_v34 = vsel %vm1269_vm4, %v1249_v27, 0  ;;  %vm1688_vm4 = vcmask 326656  }
  0x89   : > { %2058 = vmatpush.bf16.msra.mxu2 %v1271_v34  ;;  %2059 = vmatpush.bf16.msra.mxu3 %v1271_v34 }
  0x8a   : > { %1278 = vmatpush.bf16.msra.mxu0 %v1271_v34  ;;  %2057 = vmatpush.bf16.msra.mxu1 %v1271_v34  ;;  %v1001_v34 = vshrl.u32 %v1907_v53, 16 }
  0x8b   : > { %634 = vrot.lane.b32.xlu0 %v2412_v26, %s2204_s25 }
  0x8d   : > { %v2543_v3 = vpop.permute.xlu0 %572  ;;  %2061 = vmatpush.bf16.msra.mxu2 %v1961_v18  ;;  %2062 = vmatpush.bf16.msra.mxu3 %v1961_v18 }
  0x8e   : > { %830 = vrot.lane.b32.xlu1 %v813_v39, %s2208_s29  ;;  %886 = vrot.lane.b32.xlu2 %v2529_v54, %s2209_s30  ;;  %v2604_v54 = vld [vmem:[%s2282_s24 + $0x6c] sm:$0xf0]  ;;  %v1960_v39 = vld [vmem:[%s3201_s1] sm:$0xff] }
  0x8f   : > { %1279 = vmatpush.bf16.msra.mxu0 %v1961_v18  ;;  %2060 = vmatpush.bf16.msra.mxu1 %v1961_v18  ;;  %v911_v18 = vpack.c.b16 %v903_v42, %v903_v42  ;;  %v2127_v42 = vld [vmem:[%s2282_s24 + $0x48] sm:$0xff]  }
  0x90   : > { %v500_v26 = vpop.permute.xlu1 %499  ;;  %v2566_v23 = vpop.permute.xlu2 %768 }
  0x91   : > { %v1094_v17 = vsel %vm1092_vm2, %v2288_v5, %v500_v26  ;;  %v817_v5 = vrot.slane %v2044_v0, 1  ;;  %v1899_v0 = vld [vmem:[%s2282_s24 + $0x3c] sm:$0xff]   ;;  %2064 = vmatpush.bf16.msra.mxu2 %v1960_v39  ;;  %2065 = vmatpush.bf16.msra.mxu3 %v1960_v39  ;;  %v707_v26 = vsel %vm402_vm1, %v2349_v4, %v706_v57  ;;  %v960_v56 = vshll.u32 %v911_v18, 16 }
  0x92   : > { %v2559_v19 = vsel %vm1109_vm3, %v1094_v17, %v565_v28  ;;  %v799_v28 = vrot.slane %v2035_v21, 1  ;;  %v931_v17 = vshll.u32 %v2578_v32, 16  ;;  %v1003_v21 = vshll.u32 %v1907_v53, 16 }
  0x93   : > { %758 = vrot.lane.b32.xlu0 %v683_v2, %s2207_s28  ;;  %v819_v30 = vsel %vm539_vm0, %v817_v5, %v818_v22  ;;  %1280 = vmatpush.bf16.msra.mxu0 %v1960_v39  ;;  %v2154_v2 = vor.u32 %v2153_v40, %v2532_v55  ;;  %v915_v55 = vpack.c.b16 %v907_v13, %v907_v13  ;;  %v1068_v22 = vrot.slane %v2568_v24, 1  ;;  %v2159_v40 = vld [vmem:[%s2282_s24 + $0x6c] sm:$0xe] }
  0x94   : > { %v801_v44 = vsel %vm539_vm0, %v799_v28, %v800_v29  ;;  %2063 = vmatpush.bf16.msra.mxu1 %v1960_v39  ;;  %v933_v28 = vrot.slane %v931_v17, 1  ;;  %v1005_v36 = vrot.slane %v1003_v21, 1  ;;  %v955_v41 = vshll.u32 %v1899_v0, 16 }
  0x95   : > { %v2570_v25 = vpop.permute.xlu0 %576  ;;  %v1067_v5 = vrot.slane %v2154_v2, 1  ;;  %v1008_v37 = vshll.u32 %v915_v55, 16  ;;  %v953_v50 = vshrl.u32 %v1899_v0, 16  ;;  %v962_v13 = vrot.slane %v960_v56, 1 }
  0x96   : > { %770 = vrot.lane.b32.xlu1 %v755_v60, %s2207_s28  ;;  %834 = vrot.lane.b32.xlu2 %v819_v30, %s2208_s29  ;;  %v909_v60 = vpack.c.b16 %v901_v11, %v901_v11  ;;  %v2156_v30 = vld [vmem:[%s2282_s24 + $0x24] sm:$0xe]  ;;  %v934_v43 = vor.u32 %v933_v28, %v929_v8  ;;  %v957_v51 = vrot.slane %v955_v41, 1  ;;  %v1074_v20 = vrot.slane %v915_v55, 1  ;;  %s2215_s24 = smov 64  }
  0x97   : > { %v1069_v24 = vsel %vm539_vm0, %v1067_v5, %v1068_v22  ;;  %v1010_v47 = vrot.slane %v1008_v37, 1  ;;  %v2157_v62 = vor.u32 %v2156_v30, %v2581_v33 }
  0x98   : > { %v2583_v35 = vpop.permute.xlu1 %511  ;;  %v2596_v46 = vpop.permute.xlu2 %820  ;;  %v936_v29 = vshll.u32 %v909_v60, 16  ;;  %v958_v2 = vor.u32 %v957_v51, %v953_v50  ;;  %v1056_v15 = vrot.slane %v909_v60, 1  ;;  %v1098_v51 = vsel %vm1092_vm2, %v2325_v45, %v2522_v49 }
  0x99   : > { %v1055_v14 = vrot.slane %v2157_v62, 1  ;;  %v1106_v8 = vsel %vm1092_vm2, %v2127_v42, %v2583_v35 }
  0x9a   : > { %v963_v21 = vsel %vm402_vm1, %v958_v2, %v962_v13 }
  0x9b   : > { %626 = vrot.lane.b32.xlu0 %v2313_v31, %s2204_s25  ;;  %s2216_s25 = smov 56  }
  0x9d   : > { %v2600_v52 = vpop.permute.xlu0 %507 }
  0x9e   : > { %822 = vrot.lane.b32.xlu1 %v801_v44, %s2208_s29  ;;  %878 = vrot.lane.b32.xlu2 %v2578_v32, %s2209_s30  ;;  %v938_v44 = vrot.slane %v936_v29, 1  ;;  %v1006_v32 = vor.u32 %v1005_v36, %v1001_v34  ;;  %v1102_v11 = vsel %vm1092_vm2, %v2313_v31, %v2600_v52  ;;  %v1057_v52 = vsel %vm539_vm0, %v1055_v14, %v1056_v15 }
  0x9f   : > { %v1119_v33 = vsel %vm1109_vm3, %v1102_v11, %v2543_v3  ;;  %v1123_v36 = vsel %vm1109_vm3, %v1106_v8, %v2570_v25 }
  0xa0   : > { %v2612_v1 = vpop.permute.xlu1 %764  ;;  %v2631_v4 = vpop.permute.xlu2 %760  ;;  %v939_v39 = vsel %vm402_vm1, %v934_v43, %v938_v44  ;;  %v1136_v5 = vsel %vm1126_vm5, %v1119_v33, %v2500_v16 }
  0xa1   : > { %v1153_v55 = vsel %vm1143_vm6, %v1136_v5, %v2612_v1 }
  0xa2   : > { %v1170_v16 = vsel %vm1160_vm7, %v1153_v55, %v2539_v61 }
  0xa3   : > { %1022 = vrot.lane.b32.xlu0 %v987_v10, %s2210_s4  ;;  %v1011_v10 = vsel %vm402_vm1, %v1006_v32, %v1010_v47  ;;  %vm1386_vm1 = vcmask 1046534  }
  0xa5   : > { %v2628_v9 = vpop.permute.xlu0 %620 }
  0xa6   : > { %762 = vrot.lane.b32.xlu1 %v707_v26, %s2207_s28  ;;  %826 = vrot.lane.b32.xlu2 %v807_v7, %s2208_s29  ;;  %v2160_v26 = vor.u32 %v2159_v40, %v2604_v54  ;;  %v2163_v54 = vor.u32 %v2162_v63, %v2617_v12  ;;  %v1062_v7 = vrot.slane %v911_v18, 1  ;;  %s2220_s29 = smov 120  }
  0xa8   : > { %v2635_v27 = vpop.permute.xlu1 %632  ;;  %v1061_v22 = vrot.slane %v2163_v54, 1 }
  0xa9   : > { %v1140_v61 = vsel %vm1126_vm5, %v1123_v36, %v2635_v27  ;;  %v1128_v27 = vsel %vm1126_vm5, %v2559_v19, %v2628_v9 }
  0xaa   : > { %v1063_v1 = vsel %vm539_vm0, %v1061_v22, %v1062_v7 }
  0xab   : > { %890 = vrot.lane.b32.xlu0 %v1907_v53, %s2209_s30  ;;  %v1085_v53 = vpop.permute.xlu2 %1084 }
  0xad   : > { %v2643_v48 = vpop.permute.xlu0 %568 }
  0xae   : > { %1086 = vrot.lane.b32.xlu1 %v1069_v24, %s2211_s5  ;;  %882 = vrot.lane.b32.xlu2 %v1899_v0, %s2209_s30  ;;  %v1073_v0 = vrot.slane %v2160_v26, 1  ;;  %v1157_v24 = vsel %vm1143_vm6, %v1140_v61, %v2566_v23 }
  0xb0   : > { %v2646_v57 = vpop.permute.xlu1 %756  ;;  %v1075_v3 = vsel %vm539_vm0, %v1073_v0, %v1074_v20  ;;  %vm1383_vm0 = vcmask 1045509  }
  0xb1   : > { %v1145_v23 = vsel %vm1143_vm6, %v1128_v27, %v2646_v57 }
  0xb2   : > { %v1162_v56 = vsel %vm1160_vm7, %v1145_v23, %v2596_v46 }
  0xb3   : > { %1014 = vrot.lane.b32.xlu0 %v939_v39, %s2210_s4  ;;  %v1025_v60 = vpop.permute.xlu2 %1024 }
  0xb5   : > { %v885_v17 = vpop.permute.xlu0 %884 }
  0xb6   : > { %1026 = vrot.lane.b32.xlu1 %v1011_v10, %s2210_s4  ;;  %1018 = vrot.lane.b32.xlu2 %v963_v21, %s2210_s4  ;;  %v1187_v28 = vsel %vm1177_vm8, %v1170_v16, %v885_v17  ;;  %s2222_s4 = smov 104  }
  0xb8   : > { %v625_v31 = vpop.permute.xlu1 %624 }
  0xbb   : > { %1078 = vrot.lane.b32.xlu0 %v1057_v52, %s2211_s5  ;;  %v1089_v35 = vpop.permute.xlu2 %1088 }
  0xbd   : > { %v833_v12 = vpop.permute.xlu0 %832 }
  0xbe   : > { %1090 = vrot.lane.b32.xlu1 %v1075_v3, %s2211_s5  ;;  %v1174_v41 = vsel %vm1160_vm7, %v1157_v24, %v833_v12 }
  0xc0   : > { %v1021_v29 = vpop.permute.xlu1 %1020 }
  0xc1   : > { %v1204_v30 = vsel %vm1194_vm9, %v1187_v28, %v1021_v29 }
  0xc2   : > { %v1221_v34 = vsel %vm1211_vm10, %v1204_v30, %v1085_v53  ;;  %v1115_v53 = vsel %vm1109_vm3, %v1098_v51, %v2643_v48 }
  0xc3   : > { %1937 = vmatmul.msk.bf16.vlgmr.msra.gmra.mxu2 %vm1252_vm11, %v1221_v34  ;;  %1082 = vrot.lane.b32.xlu0 %v1063_v1, %s2211_s5  ;;  %v510_v32 = vpop.permute.xlu2 %509  ;;  %v1132_v62 = vsel %vm1126_vm5, %v1115_v53, %v625_v31 }
  0xc4   : > { %v1149_v45 = vsel %vm1143_vm6, %v1132_v62, %v2631_v4  ;;  %v1104_v12 = vsel %vm1092_vm2, %v2421_v38, %v510_v32 }
  0xc5   : > { %v877_v37 = vpop.permute.xlu0 %876 }
  0xc6   : > { %v1179_v39 = vsel %vm1177_vm8, %v1162_v56, %v877_v37 }
  0xc8   : > { %v889_v18 = vpop.permute.xlu1 %888 }
  0xc9   : > { %v1191_v43 = vsel %vm1177_vm8, %v1174_v41, %v889_v18 }
  0xca   : > { %v1208_v44 = vsel %vm1194_vm9, %v1191_v43, %v1025_v60 }
  0xcb   : > { %v1225_v25 = vsel %vm1211_vm10, %v1208_v44, %v1089_v35  ;;  %v514_v9 = vpop.permute.xlu2 %513 }
  0xcc   : > { %1939 = vmatmul.msk.bf16.vlgmr.msra.gmra.mxu3 %vm1252_vm11, %v1225_v25  ;;  %v1108_v41 = vsel %vm1092_vm2, %v2444_v59, %v514_v9 }
  0xcd   : > { %v825_v40 = vpop.permute.xlu0 %824 }
  0xce   : > { %v1166_v49 = vsel %vm1160_vm7, %v1149_v45, %v825_v40 }
  0xd0   : > { %v1013_v47 = vpop.permute.xlu1 %1012 }
  0xd1   : > { %v1196_v19 = vsel %vm1194_vm9, %v1179_v39, %v1013_v47 }
  0xd3   : > { %v579_v2 = vpop.permute.xlu2 %578 }
  0xd4   : > { %v1125_v32 = vsel %vm1109_vm3, %v1108_v41, %v579_v2 }
  0xd5   : > { %v881_v50 = vpop.permute.xlu0 %880 }
  0xd6   : > { %v1183_v46 = vsel %vm1177_vm8, %v1166_v49, %v881_v50 }
  0xd8   : > { %v1077_v63 = vpop.permute.xlu1 %1076 }
  0xd9   : > { %v1213_v57 = vsel %vm1211_vm10, %v1196_v19, %v1077_v63 }
  0xda   : > { %1933 = vmatmul.msk.bf16.vlgmr.msra.gmra.mxu0 %vm1252_vm11, %v1213_v57 }
  0xdb   : > { %v623_v15 = vpop.permute.xlu2 %622 }
  0xdd   : > { %v1017_v48 = vpop.permute.xlu0 %1016 }
  0xde   : > { %v1200_v10 = vsel %vm1194_vm9, %v1183_v46, %v1017_v48 }
  0xe0   : > { %v1081_v11 = vpop.permute.xlu1 %1080 }
  0xe1   : > { %v1217_v26 = vsel %vm1211_vm10, %v1200_v10, %v1081_v11 }
  0xe2   : > { %1935 = vmatmul.msk.bf16.vlgmr.msra.gmra.mxu1 %vm1252_vm11, %v1217_v26  ;;  %v2761_v26 = vld [vmem:[%s3202_s2] ss:$0 sm:$0xff] }
  0xe3   : > { %v571_v4 = vpop.permute.xlu2 %570 }
  0xe5   : > { %v575_v13 = vpop.permute.xlu0 %574 }
  0xe6   : > { %v1121_v42 = vsel %vm1109_vm3, %v1104_v12, %v575_v13 }
  0xe8   : > { %v502_v14 = vpop.permute.xlu1 %501 }
  0xe9   : > { %v1096_v38 = vsel %vm1092_vm2, %v2455_v6, %v502_v14 }
  0xeb   : > { %v887_v31 = vpop.permute.xlu2 %886 }
  0xed   : > { %v631_v17 = vpop.permute.xlu0 %630 }
  0xee   : > { %v1138_v8 = vsel %vm1126_vm5, %v1121_v42, %v631_v17 }
  0xf0   : > { %v567_v33 = vpop.permute.xlu1 %566 }
  0xf1   : > { %v1113_v37 = vsel %vm1109_vm3, %v1096_v38, %v567_v33 }
  0xf2   : > { %v1130_v43 = vsel %vm1126_vm5, %v1113_v37, %v623_v15 }
  0xf3   : > { %v835_v60 = vpop.permute.xlu2 %834 }
  0xf5   : > { %v767_v0 = vpop.permute.xlu0 %766 }
  0xf6   : > { %v1155_v28 = vsel %vm1143_vm6, %v1138_v8, %v767_v0 }
  0xf8   : > { %v506_v20 = vpop.permute.xlu1 %505 }
  0xf9   : > { %v1100_v18 = vsel %vm1092_vm2, %v2487_v58, %v506_v20  ;;  %vm1389_vm2 = vcmask 1047559  }
  0xfa   : > { %v1117_v27 = vsel %vm1109_vm3, %v1100_v18, %v571_v4 }
  0xfb   : > { %v879_v22 = vpop.permute.xlu2 %878 }
  0xfd   : > { %v635_v21 = vpop.permute.xlu0 %634 }
  0xfe   : > { %v1142_v6 = vsel %vm1126_vm5, %v1125_v32, %v635_v21 }
 0x100   : > { %v831_v52 = vpop.permute.xlu1 %830 }
 0x101   : > { %v1172_v29 = vsel %vm1160_vm7, %v1155_v28, %v831_v52 }
 0x102   : > { %v1189_v34 = vsel %vm1177_vm8, %v1172_v29, %v887_v31 }
 0x103   : > { %v827_v30 = vpop.permute.xlu2 %826 }
 0x105   : > { %v759_v54 = vpop.permute.xlu0 %758 }
 0x106   : > { %v1147_v44 = vsel %vm1143_vm6, %v1130_v43, %v759_v54 }
 0x108   : > { %v771_v5 = vpop.permute.xlu1 %770 }
 0x109   : > { %v1159_v23 = vsel %vm1143_vm6, %v1142_v6, %v771_v5 }
 0x10a   : > { %v1176_v53 = vsel %vm1160_vm7, %v1159_v23, %v835_v60 }
 0x10b   : > { %v883_v25 = vpop.permute.xlu2 %882 }
 0x10d   : > { %v627_v3 = vpop.permute.xlu0 %626 }
 0x10e   : > { %v1134_v59 = vsel %vm1126_vm5, %v1117_v27, %v627_v3  ;;  %vm1691_vm5 = vcmask 392192  }
 0x110   : > { %v823_v55 = vpop.permute.xlu1 %822 }
 0x111   : > { %v1164_v47 = vsel %vm1160_vm7, %v1147_v44, %v823_v55 }
 0x112   : > { %v1181_v50 = vsel %vm1177_vm8, %v1164_v47, %v879_v22 }
 0x113   : > { %v1019_v45 = vpop.permute.xlu2 %1018 }
 0x115   : > { %v1023_v7 = vpop.permute.xlu0 %1022 }
 0x116   : > { %v1206_v36 = vsel %vm1194_vm9, %v1189_v34, %v1023_v7 }
 0x118   : > { %v763_v16 = vpop.permute.xlu1 %762 }
 0x119   : > { %v1151_v58 = vsel %vm1143_vm6, %v1134_v59, %v763_v16 }
 0x11a   : > { %v1168_v62 = vsel %vm1160_vm7, %v1151_v58, %v827_v30  ;;  %vm1694_vm7 = vcmask 457728  }
 0x11b   : > { %v1185_v49 = vsel %vm1177_vm8, %v1168_v62, %v883_v25 }
 0x11c   : > { %v1202_v46 = vsel %vm1194_vm9, %v1185_v49, %v1019_v45 }
 0x11d   : > { %v891_v1 = vpop.permute.xlu0 %890 }
 0x11e   : > { %v1193_v19 = vsel %vm1177_vm8, %v1176_v53, %v891_v1 }
 0x120   : > { %v1087_v61 = vpop.permute.xlu1 %1086 }
 0x121   : > { %v1223_v35 = vsel %vm1211_vm10, %v1206_v36, %v1087_v61 }
 0x122   : > { %1938 = vmatmul.msk.bf16.gmra.mxu2 %vm1252_vm11, %v1223_v35 }
 0x125   : > { %v1015_v24 = vpop.permute.xlu0 %1014 }
 0x126   : > { %v1198_v51 = vsel %vm1194_vm9, %v1181_v50, %v1015_v24 }
 0x128   : > { %v1027_v40 = vpop.permute.xlu1 %1026 }
 0x129   : > { %v1210_v9 = vsel %vm1194_vm9, %v1193_v19, %v1027_v40  ;;  %vm1697_vm9 = vcmask 523264  }
 0x12d   : > { %v1079_v56 = vpop.permute.xlu0 %1078 }
 0x12e   : > { %v1215_v39 = vsel %vm1211_vm10, %v1198_v51, %v1079_v56 }
 0x12f   : > { %1934 = vmatmul.msk.bf16.gmra.mxu0 %vm1252_vm11, %v1215_v39 }
 0x130   : > { %v1091_v63 = vpop.permute.xlu1 %1090 }
 0x131   : > { %v1227_v57 = vsel %vm1211_vm10, %v1210_v9, %v1091_v63 }
 0x132   : > { %1940 = vmatmul.msk.bf16.gmra.mxu3 %vm1252_vm11, %v1227_v57 }
 0x135   : > { %v1083_v48 = vpop.permute.xlu0 %1082 }
 0x136   : > { %v1219_v10 = vsel %vm1211_vm10, %v1202_v46, %v1083_v48 }
 0x137   : > { %1936 = vmatmul.msk.bf16.gmra.mxu1 %vm1252_vm11, %v1219_v10  ;;  %vm1712_vm11 = vcmask 850944  }
 0x146   : > { %v1302_v11 = vpop.f32.mrf.mxu2 }
 0x147   : > { %v1303_v14 = vadd.f32 %v2761_v26, %v1302_v11 }
 0x149   : > { %v1330_v0 = vpack.c.bf16 %v1303_v14, %v1303_v14 }
 0x14b   : > { %v1350_v52 = vunpack.c.l.b16 %v1330_v0 }
 0x14d   : > { %v2768_v22 = vunpack.i.l.s16 %v1350_v52 }
 0x14e   : > { %v1304_v13 = vpop.f32.mrf.mxu2 }
 0x14f   : > { %v1312_v2 = vpop.f32.mrf.mxu3  ;;  %v1305_v17 = vadd.f32 %v2761_v26, %v1304_v13  ;;  %v1432_v36 = vrot.slane %v2768_v22, 7  ;;  %v1467_v35 = vrot.slane %v2768_v22, 1  ;;  %v1398_v38 = vrot.slane %v2768_v22, 5 }
 0x150   : > { %v1313_v4 = vadd.f32 %v2761_v26, %v1312_v2  ;;  %v1484_v37 = vrot.slane %v2768_v22, 2  ;;  %v1415_v41 = vrot.slane %v2768_v22, 6  ;;  %v1501_v43 = vrot.slane %v2768_v22, 3 }
 0x151   : > { %v1331_v20 = vpack.c.bf16 %v1305_v17, %v1305_v17 }
 0x152   : > { %v1334_v54 = vpack.c.bf16 %v1313_v4, %v1313_v4 }
 0x153   : > { %v1523_v5 = vunpack.c.l.b16 %v1331_v20 }
 0x154   : > { %v1352_v7 = vunpack.c.l.b16 %v1334_v54 }
 0x155   : > { %v2772_v8 = vunpack.i.l.s16 %v1523_v5 }
 0x156   : > { %v2774_v1 = vunpack.i.l.s16 %v1352_v7 }
 0x157   : > { %v1282_v15 = vpop.f32.mrf.mxu0  ;;  %v1314_v31 = vpop.f32.mrf.mxu3  ;;  %v1566_v18 = vrot.slane %v2772_v8, 5  ;;  %v1549_v25 = vrot.slane %v2772_v8, 4 }
 0x158   : > { %v1283_v21 = vadd.f32 %v2761_v26, %v1282_v15  ;;  %v1315_v60 = vadd.f32 %v2761_v26, %v1314_v31  ;;  %v1436_v27 = vrot.slane %v2774_v1, 5  ;;  %v1470_v23 = vrot.slane %v2774_v1, 7 }
 0x159   : > { %v1402_v58 = vrot.slane %v2774_v1, 3  ;;  %v1419_v50 = vrot.slane %v2774_v1, 4  ;;  %v1453_v51 = vrot.slane %v2774_v1, 6 }
 0x15a   : > { %v1322_v55 = vpack.c.bf16 %v1283_v21, %v1283_v21  ;;  %v1335_v28 = vpack.c.bf16 %v1315_v60, %v1315_v60 }
 0x15c   : > { %v1346_v29 = vunpack.c.l.b16 %v1322_v55  ;;  %v1525_v24 = vunpack.c.l.b16 %v1335_v28 }
 0x15e   : > { %v2784_v44 = vunpack.i.l.s16 %v1346_v29  ;;  %v2794_v56 = vunpack.i.l.s16 %v1525_v24 }
 0x15f   : > { %v1292_v33 = vpop.f32.mrf.mxu1  ;;  %v1284_v3 = vpop.f32.mrf.mxu0 }
 0x160   : > { %v1293_v12 = vadd.f32 %v2761_v26, %v1292_v33  ;;  %v1285_v16 = vadd.f32 %v2761_v26, %v1284_v3  ;;  %v1426_v63 = vrot.slane %v2784_v44, 3  ;;  %v1460_v57 = vrot.slane %v2784_v44, 5 }
 0x161   : > { %v1392_v48 = vrot.slane %v2784_v44, 1  ;;  %v1477_v10 = vrot.slane %v2784_v44, 6  ;;  %v1409_v13 = vrot.slane %v2784_v44, 2  ;;  %v1443_v14 = vrot.slane %v2784_v44, 4 }
 0x162   : > { %v1326_v30 = vpack.c.bf16 %v1293_v12, %v1293_v12  ;;  %v1323_v61 = vpack.c.bf16 %v1285_v16, %v1285_v16  ;;  %v1570_v15 = vrot.slane %v2794_v56, 3  ;;  %v1494_v33 = vrot.slane %v2784_v44, 7 }
 0x164   : > { %v1348_v47 = vunpack.c.l.b16 %v1326_v30  ;;  %v1519_v59 = vunpack.c.l.b16 %v1323_v61 }
 0x166   : > { %v2803_v49 = vunpack.i.l.s16 %v1348_v47  ;;  %v2807_v11 = vunpack.i.l.s16 %v1519_v59 }
 0x167   : > { %v1294_v42 = vpop.f32.mrf.mxu1 }
 0x168   : > { %v1295_v34 = vadd.f32 %v2761_v26, %v1294_v42  ;;  %v1429_v5 = vrot.slane %v2803_v49, 1  ;;  %v1463_v60 = vrot.slane %v2803_v49, 3  ;;  %v1394_v55 = vrot.slane %v2803_v49, 7 }
 0x169   : > { %v1480_v7 = vrot.slane %v2803_v49, 4  ;;  %v1446_v12 = vrot.slane %v2803_v49, 2  ;;  %v1560_v16 = vrot.slane %v2807_v11, 1  ;;  %v1497_v29 = vrot.slane %v2803_v49, 5 }
 0x16a   : > { %v1327_v6 = vpack.c.bf16 %v1295_v34, %v1295_v34 }
 0x16c   : > { %v1521_v46 = vunpack.c.l.b16 %v1327_v6 }
 0x16e   : > { %v2819_v52 = vunpack.i.l.s16 %v1521_v46 }
 0x1a5   : > { %v1307_v53 = vpop.f32.mrf.mxu2 }
 0x1a6   : > { %v1308_v9 = vadd.f32 %v2761_v26, %v1307_v53 }
 0x1a8   : > { %v1332_v2 = vpack.c.bf16 %v1308_v9, %v1308_v9  ;;  %v1562_v9 = vrot.slane %v2819_v52, 7 }
 0x1aa   : > { %v1351_v54 = vunpack.c.l.b16 %v1332_v2 }
 0x1ac   : > { %v1287_v3 = vpop.f32.mrf.mxu0  ;;  %v2835_v59 = vunpack.i.l.s16 %v1351_v54 }
 0x1ad   : > { %v1288_v42 = vadd.f32 %v2761_v26, %v1287_v3  ;;  %v1309_v28 = vpop.f32.mrf.mxu2  ;;  %v1545_v3 = vrot.slane %v2819_v52, 6 }
 0x1ae   : > { %v1310_v61 = vadd.f32 %v2761_v26, %v1309_v28  ;;  %v1400_v46 = vrot.slane %v2835_v59, 4  ;;  %v1486_v21 = vrot.slane %v2835_v59, 1  ;;  %v1417_v54 = vrot.slane %v2835_v59, 5 }
 0x1af   : > { %v1324_v53 = vpack.c.bf16 %v1288_v42, %v1288_v42 }
 0x1b0   : > { %v1333_v2 = vpack.c.bf16 %v1310_v61, %v1310_v61  ;;  %v1434_v61 = vrot.slane %v2835_v59, 6 }
 0x1b1   : > { %v1347_v45 = vunpack.c.l.b16 %v1324_v53 }
 0x1b2   : > { %v1524_v62 = vunpack.c.l.b16 %v1333_v2  ;;  %v1451_v2 = vrot.slane %v2835_v59, 7 }
 0x1b3   : > { %v2845_v42 = vunpack.i.l.s16 %v1347_v45 }
 0x1b4   : > { %v2849_v20 = vunpack.i.l.s16 %v1524_v62  ;;  %v1289_v53 = vpop.f32.mrf.mxu0  ;;  %v1297_v6 = vpop.f32.mrf.mxu1 }
 0x1b5   : > { %v1290_v19 = vadd.f32 %v2761_v26, %v1289_v53  ;;  %v1298_v45 = vadd.f32 %v2761_v26, %v1297_v6  ;;  %v1317_v32 = vpop.f32.mrf.mxu3  ;;  %v1427_v47 = vrot.slane %v2845_v42, 2  ;;  %v1461_v62 = vrot.slane %v2845_v42, 4 }
 0x1b6   : > { %v1318_v24 = vadd.f32 %v2761_v26, %v1317_v32  ;;  %v1393_v4 = vsel %vm1371_vm12, %v2845_v42, %v1392_v48  ;;  %v1478_v40 = vrot.slane %v2845_v42, 5  ;;  %v1410_v53 = vrot.slane %v2845_v42, 1 }
 0x1b7   : > { %v1325_v0 = vpack.c.bf16 %v1290_v19, %v1290_v19  ;;  %v1328_v6 = vpack.c.bf16 %v1298_v45, %v1298_v45  ;;  %v1428_v28 = vsel %vm1371_vm12, %v1427_v47, %v1426_v63  ;;  %v1462_v32 = vsel %vm1371_vm12, %v1461_v62, %v1460_v57 }
 0x1b8   : > { %v1336_v34 = vpack.c.bf16 %v1318_v24, %v1318_v24  ;;  %v1430_v39 = vsel %vm1374_vm13, %v1429_v5, %v1428_v28  ;;  %v1464_v31 = vsel %vm1374_vm13, %v1463_v60, %v1462_v32  ;;  %v1503_v48 = vrot.slane %v2835_v59, 2 }
 0x1b9   : > { %v1520_v17 = vunpack.c.l.b16 %v1325_v0  ;;  %v1349_v30 = vunpack.c.l.b16 %v1328_v6  ;;  %v1479_v19 = vsel %vm1371_vm12, %v1478_v40, %v1477_v10  ;;  %v1411_v63 = vsel %vm1371_vm12, %v1410_v53, %v1409_v13 }
 0x1ba   : > { %v1353_v47 = vunpack.c.l.b16 %v1336_v34  ;;  %v1395_v57 = vsel %vm1374_vm13, %v1394_v55, %v1393_v4  ;;  %v1481_v5 = vsel %vm1374_vm13, %v1480_v7, %v1479_v19  ;;  %v1444_v0 = vrot.slane %v2845_v42, 3 }
 0x1bb   : > { %v2887_v60 = vunpack.i.l.s16 %v1520_v17  ;;  %v2889_v24 = vunpack.i.l.s16 %v1349_v30  ;;  %v1412_v40 = vsel %vm1374_vm13, %v2803_v49, %v1411_v63  ;;  %v1568_v10 = vrot.slane %v2849_v20, 4 }
 0x1bc   : > { %v2894_v13 = vunpack.i.l.s16 %v1353_v47  ;;  %v1299_v34 = vpop.f32.mrf.mxu1  ;;  %v1445_v4 = vsel %vm1371_vm12, %v1444_v0, %v1443_v14  ;;  %v1551_v55 = vrot.slane %v2849_v20, 3  ;;  %v1495_v7 = vrot.slane %v2845_v42, 6 }
 0x1bd   : > { %v1300_v17 = vadd.f32 %v2761_v26, %v1299_v34  ;;  %v1319_v30 = vpop.f32.mrf.mxu3  ;;  %v1431_v28 = vsel %vm1377_vm14, %v2889_v24, %v1430_v39  ;;  %v1465_v45 = vrot.slane %v2889_v24, 2  ;;  %v1396_v62 = vrot.slane %v2889_v24, 6 }
 0x1be   : > { %v1320_v53 = vadd.f32 %v2761_v26, %v1319_v30  ;;  %v1433_v14 = vsel %vm1380_vm15, %v1432_v36, %v1431_v28  ;;  %v1438_v6 = vrot.slane %v2894_v13, 4  ;;  %v1472_v32 = vrot.slane %v2894_v13, 6 }
 0x1bf   : > { %v1329_v19 = vpack.c.bf16 %v1300_v17, %v1300_v17  ;;  %v1435_v63 = vsel %vm1383_vm0, %v1434_v61, %v1433_v14  ;;  %v1466_v47 = vsel %vm1377_vm14, %v1465_v45, %v1464_v31  ;;  %v1397_v39 = vsel %vm1377_vm14, %v1396_v62, %v1395_v57 }
 0x1c0   : > { %v1337_v0 = vpack.c.bf16 %v1320_v53, %v1320_v53  ;;  %v1437_v26 = vsel %vm1386_vm1, %v1436_v27, %v1435_v63  ;;  %v1468_v36 = vsel %vm1380_vm15, %v1467_v35, %v1466_v47  ;;  %v1399_v34 = vsel %vm1380_vm15, %v1398_v38, %v1397_v39 }
 0x1c1   : > { %v1522_v17 = vunpack.c.l.b16 %v1329_v19  ;;  %v1439_v61 = vsel %vm1389_vm2, %v1438_v6, %v1437_v26  ;;  %v1469_v31 = vsel %vm1383_vm0, %v2835_v59, %v1468_v36  ;;  %v1401_v57 = vsel %vm1383_vm0, %v1400_v46, %v1399_v34 }
 0x1c2   : > { %v1526_v30 = vunpack.c.l.b16 %v1337_v0  ;;  %v1440_v27 = vpack.c.b16 %v1439_v61, %v1439_v61  ;;  %v1471_v35 = vsel %vm1386_vm1, %v1470_v23, %v1469_v31  ;;  %v1403_v38 = vsel %vm1386_vm1, %v1402_v58, %v1401_v57 }
 0x1c3   : > { %v1473_v28 = vsel %vm1389_vm2, %v1472_v32, %v1471_v35  ;;  %v1404_v45 = vrot.slane %v2894_v13, 2  ;;  %v1482_v62 = vrot.slane %v2889_v24, 3  ;;  %v1619_v53 = vrot.slane %v2849_v20, 7 }
 0x1c4   : > { %v2940_v14 = vunpack.i.l.s16 %v1522_v17  ;;  %v2942_v46 = vunpack.i.l.s16 %v1526_v30  ;;  %1441 = vrot.lane.b32.xlu0 %v1440_v27, %s2209_s30  ;;  %v1474_v6 = vpack.c.b16 %v1473_v28, %v1473_v28  ;;  %v1413_v23 = vrot.slane %v2889_v24, 7  ;;  %s2221_s30 = smov 112  }
 0x1c5   : > { %v1405_v19 = vsel %vm1389_vm2, %v1404_v45, %v1403_v38  ;;  %v1483_v58 = vsel %vm1377_vm14, %v1482_v62, %v1481_v5  ;;  %v1489_v32 = vrot.slane %v2894_v13, 7  ;;  %v1421_v63 = vrot.slane %v2894_v13, 3 }
 0x1c6   : > { %1475 = vrot.lane.b32.xlu2 %v1474_v6, %s2212_s21  ;;  %v1406_v47 = vpack.c.b16 %v1405_v19, %v1405_v19  ;;  %v1485_v39 = vsel %vm1380_vm15, %v1484_v37, %v1483_v58  ;;  %v1414_v0 = vsel %vm1377_vm14, %v1413_v23, %v1412_v40  ;;  %v1448_v26 = vrot.slane %v2889_v24, 1 }
 0x1c7   : > { %v1487_v36 = vsel %vm1383_vm0, %v1486_v21, %v1485_v39  ;;  %v1416_v5 = vsel %vm1380_vm15, %v1415_v41, %v1414_v0  ;;  %v1447_v34 = vsel %vm1374_vm13, %v1446_v12, %v1445_v4  ;;  %v1561_v37 = vsel %vm1371_vm12, %v2887_v60, %v1560_v16 }
 0x1c8   : > { %1407 = vrot.lane.b32.xlu1 %v1406_v47, %s2205_s26  ;;  %v1488_v40 = vsel %vm1386_vm1, %v2774_v1, %v1487_v36  ;;  %v1418_v21 = vsel %vm1383_vm0, %v1417_v54, %v1416_v5  ;;  %v1449_v41 = vsel %vm1377_vm14, %v1448_v26, %v1447_v34  ;;  %v1455_v17 = vrot.slane %v2894_v13, 5  ;;  %s2217_s26 = smov 96  }
 0x1c9   : > { %v1490_v12 = vsel %vm1389_vm2, %v1489_v32, %v1488_v40  ;;  %v1420_v4 = vsel %vm1386_vm1, %v1419_v50, %v1418_v21  ;;  %v1450_v16 = vsel %vm1380_vm15, %v2768_v22, %v1449_v41  ;;  %v1564_v61 = vrot.slane %v2940_v14, 6 }
 0x1ca   : > { %v1491_v31 = vpack.c.b16 %v1490_v12, %v1490_v12  ;;  %v1422_v57 = vsel %vm1389_vm2, %v1421_v63, %v1420_v4  ;;  %v1452_v54 = vsel %vm1383_vm0, %v1451_v2, %v1450_v16  ;;  %v1563_v30 = vsel %vm1374_vm13, %v1562_v9, %v1561_v37 }
 0x1cb   : > { %v1454_v50 = vsel %vm1386_vm1, %v1453_v51, %v1452_v54  ;;  %v1565_v27 = vsel %vm1377_vm14, %v1564_v61, %v1563_v30  ;;  %v1572_v35 = vrot.slane %v2942_v46, 2  ;;  %v1543_v38 = vrot.slane %v2887_v60, 7 }
 0x1cc   : > { %1492 = vrot.lane.b32.xlu0 %v1491_v31, %s2213_s22  ;;  %v1423_v28 = vpack.c.b16 %v1422_v57, %v1422_v57  ;;  %v1456_v45 = vsel %vm1389_vm2, %v1455_v17, %v1454_v50  ;;  %v1567_v2 = vsel %vm1380_vm15, %v1566_v18, %v1565_v27  ;;  %v1547_v9 = vrot.slane %v2940_v14, 5 }
 0x1cd   : > { %v1457_v62 = vpack.c.b16 %v1456_v45, %v1456_v45  ;;  %v1569_v51 = vsel %vm1383_vm0, %v1568_v10, %v1567_v2  ;;  %v1544_v6 = vsel %vm1371_vm12, %v1543_v38, %v2807_v11  ;;  %v1496_v23 = vsel %vm1371_vm12, %v1495_v7, %v1494_v33 }
 0x1ce   : > { %1424 = vrot.lane.b32.xlu2 %v1423_v28, %s2207_s28  ;;  %v1571_v18 = vsel %vm1386_vm1, %v1570_v15, %v1569_v51  ;;  %v1546_v19 = vsel %vm1374_vm13, %v1545_v3, %v1544_v6  ;;  %v1498_v10 = vsel %vm1374_vm13, %v1497_v29, %v1496_v23  ;;  %v1499_v58 = vrot.slane %v2889_v24, 4  ;;  %s2219_s28 = smov 80  }
 0x1cf   : > { %v1573_v32 = vsel %vm1389_vm2, %v1572_v35, %v1571_v18  ;;  %v1548_v33 = vsel %vm1377_vm14, %v1547_v9, %v1546_v19  ;;  %v1612_v7 = vrot.slane %v2887_v60, 3  ;;  %v1616_v63 = vrot.slane %v2940_v14, 1 }
 0x1d0   : > { %1458 = vrot.lane.b32.xlu1 %v1457_v62, %s2211_s5  ;;  %v1574_v15 = vpack.c.b16 %v1573_v32, %v1573_v32  ;;  %v1550_v3 = vsel %vm1380_vm15, %v1549_v25, %v1548_v33  ;;  %v1555_v47 = vrot.slane %v2942_v46, 1  ;;  %v1500_v29 = vsel %vm1377_vm14, %v1499_v58, %v1498_v10  ;;  %s1852_s5 = sshll.u32 %s3238_s13, 1 }
 0x1d1   : > { %v1552_v39 = vsel %vm1383_vm0, %v1551_v55, %v1550_v3  ;;  %v1502_v0 = vsel %vm1380_vm15, %v1501_v43, %v1500_v29  ;;  %v3204_v26 = vrot.slane %v2807_v11, 4  ;;  %v1595_v5 = vrot.slane %v2887_v60, 2  ;;  %s226_s6 = sadd.s32 %s1852_s5, %s3240_s12 }
 0x1d2   : > { %v3205_v25 = vrot.slane %v2794_v56, 2  ;;  %v1504_v37 = vsel %vm1383_vm0, %v1503_v48, %v1502_v0  ;;  %v3206_v55 = vrot.slane %v2819_v52, 2  ;;  %v1623_v43 = vrot.slane %v2942_v46, 5  ;;  %s1853_s7 = sshll.u32 %s226_s6, 2 }
 0x1d3   : > { %v1613_v36 = vsel %vm1371_vm12, %v1612_v7, %v3204_v26  ;;  %v3207_v41 = vrot.slane %v2774_v1, 1  ;;  %v3208_v4 = vrot.slane %v2807_v11, 3  ;;  %v3209_v57 = vrot.slane %v2819_v52, 1  ;;  %s228_s10 = scalar_lea.vmem %s3203_s3, %s1853_s7 }
 0x1d4   : > { %v1554_v34 = vsel %vm1386_vm1, %v3205_v25, %v1552_v39  ;;  %v1615_v40 = vsel %vm1374_vm13, %v3206_v55, %v1613_v36  ;;  %1575 = vrot.lane.b32.xlu0 %v1574_v15, %s2214_s23  ;;  %v1602_v35 = vrot.slane %v2849_v20, 6  ;;  %v3210_v38 = vrot.slane %v2794_v56, 6 }
 0x1d5   : > { %v1556_v21 = vsel %vm1389_vm2, %v1555_v47, %v1554_v34  ;;  %v1506_v17 = vsel %vm1386_vm1, %v3207_v41, %v1504_v37  ;;  %v1617_v12 = vsel %vm1377_vm14, %v1616_v63, %v1615_v40  ;;  %v1596_v16 = vsel %vm1371_vm12, %v1595_v5, %v3208_v4 }
 0x1d6   : > { %v1557_v48 = vpack.c.b16 %v1556_v21, %v1556_v21  ;;  %v1507_v61 = vsel %vm1389_vm2, %v2894_v13, %v1506_v17  ;;  %v1618_v31 = vsel %vm1380_vm15, %v2772_v8, %v1617_v12  ;;  %v1598_v54 = vsel %vm1374_vm13, %v3209_v57, %v1596_v16 }
 0x1d7   : > { %v1508_v30 = vpack.c.b16 %v1507_v61, %v1507_v61  ;;  %v1620_v50 = vsel %vm1383_vm0, %v1619_v53, %v1618_v31  ;;  %v1599_v27 = vsel %vm1377_vm14, %v2940_v14, %v1598_v54  ;;  %v3211_v45 = vrot.slane %v2772_v8, 7 }
 0x1d8   : > { %1558 = vrot.lane.b32.xlu2 %v1557_v48, %s2215_s24  ;;  %v1622_v28 = vsel %vm1386_vm1, %v3210_v38, %v1620_v50  ;;  %v1578_v9 = vrot.slane %v2887_v60, 1  ;;  %v1581_v62 = vrot.slane %v2940_v14, 7  ;;  %v1606_v6 = vrot.slane %v2942_v46, 4 }
 0x1d9   : > { %v1601_v2 = vsel %vm1380_vm15, %v3211_v45, %v1599_v27  ;;  %v1624_v53 = vsel %vm1389_vm2, %v1623_v43, %v1622_v28  ;;  %v1585_v23 = vrot.slane %v2849_v20, 5  ;;  %1509 = vrot.lane.b32.xlu1 %v1508_v30, %s2216_s25  ;;  %v3212_v18 = vrot.slane %v2794_v56, 5 }
 0x1da   : > { %v1603_v51 = vsel %vm1383_vm0, %v1602_v35, %v1601_v2  ;;  %v3213_v10 = vrot.slane %v2807_v11, 2  ;;  %v1589_v32 = vrot.slane %v2942_v46, 3  ;;  %v1663_v33 = vrot.slane %v2887_v60, 6 }
 0x1db   : > { %v1605_v19 = vsel %vm1386_vm1, %v3212_v18, %v1603_v51  ;;  %v1625_v7 = vpack.c.b16 %v1624_v53, %v1624_v53  ;;  %v1667_v3 = vrot.slane %v2940_v14, 4  ;;  %v3214_v29 = vrot.slane %v2807_v11, 7 }
 0x1dc   : > { %v1579_v58 = vsel %vm1371_vm12, %v1578_v9, %v3213_v10  ;;  %v1607_v63 = vsel %vm1389_vm2, %v1606_v6, %v1605_v19  ;;  %v1671_v0 = vrot.slane %v2849_v20, 2  ;;  %v1646_v26 = vrot.slane %v2887_v60, 5 }
 0x1dd   : > { %v1580_v15 = vsel %vm1374_vm13, %v2819_v52, %v1579_v58  ;;  %v1664_v39 = vsel %vm1371_vm12, %v1663_v33, %v3214_v29  ;;  %v1608_v36 = vpack.c.b16 %v1607_v63, %v1607_v63  ;;  %v3215_v5 = vrot.slane %v2772_v8, 6  ;;  %1626 = vrot.lane.b32.xlu0 %v1625_v7, %s2217_s26 }
 0x1de   : > { %v1582_v47 = vsel %vm1377_vm14, %v1581_v62, %v1580_v15  ;;  %v3216_v34 = vrot.slane %v2819_v52, 5  ;;  %v1650_v55 = vrot.slane %v2940_v14, 3  ;;  %v3217_v21 = vrot.slane %v2807_v11, 6 }
 0x1df   : > { %v1584_v25 = vsel %vm1380_vm15, %v3215_v5, %v1582_v47  ;;  %v1654_v17 = vrot.slane %v2849_v20, 1  ;;  %v3218_v12 = vrot.slane %v2794_v56, 4  ;;  %v3219_v16 = vrot.slane %v2772_v8, 3 }
 0x1e0   : > { %v1666_v37 = vsel %vm1374_vm13, %v3216_v34, %v1664_v39  ;;  %v1586_v40 = vsel %vm1383_vm0, %v1585_v23, %v1584_v25  ;;  %v1647_v41 = vsel %vm1371_vm12, %v1646_v26, %v3217_v21  ;;  %v3220_v61 = vrot.slane %v2819_v52, 4  ;;  %1609 = vrot.lane.b32.xlu2 %v1608_v36, %s2218_s27 }
 0x1e1   : > { %v1668_v43 = vsel %vm1377_vm14, %v1667_v3, %v1666_v37  ;;  %v1588_v4 = vsel %vm1386_vm1, %v3218_v12, %v1586_v40  ;;  %v1629_v57 = vrot.slane %v2887_v60, 4  ;;  %v1633_v27 = vrot.slane %v2940_v14, 2 }
 0x1e2   : > { %v1670_v48 = vsel %vm1380_vm15, %v3219_v16, %v1668_v43  ;;  %v1649_v31 = vsel %vm1374_vm13, %v3220_v61, %v1647_v41  ;;  %v1590_v54 = vsel %vm1389_vm2, %v1589_v32, %v1588_v4  ;;  %v3221_v38 = vrot.slane %v2794_v56, 1 }
 0x1e3   : > { %v1672_v30 = vsel %vm1383_vm0, %v1671_v0, %v1670_v48  ;;  %v1651_v50 = vsel %vm1377_vm14, %v1650_v55, %v1649_v31  ;;  %v1591_v35 = vpack.c.b16 %v1590_v54, %v1590_v54  ;;  %v3222_v45 = vrot.slane %v2772_v8, 2 }
 0x1e4   : > { %v1674_v28 = vsel %vm1386_vm1, %v3221_v38, %v1672_v30  ;;  %v3223_v60 = vrot.slane %v2807_v11, 5  ;;  %v1657_v14 = vrot.slane %v2942_v46, 7  ;;  %v3224_v51 = vrot.slane %v2819_v52, 3 }
 0x1e5   : > { %v1653_v2 = vsel %vm1380_vm15, %v3222_v45, %v1651_v50  ;;  %v1675_v62 = vsel %vm1389_vm2, %v2942_v46, %v1674_v28  ;;  %1592 = vrot.lane.b32.xlu1 %v1591_v35, %s2219_s28  ;;  %v1370_v18 = vrot.slane %v2845_v42, 7  ;;  %v1373_v19 = vrot.slane %v2803_v49, 6 }
 0x1e6   : > { %v1630_v9 = vsel %vm1371_vm12, %v1629_v57, %v3223_v60  ;;  %v1655_v53 = vsel %vm1383_vm0, %v1654_v17, %v1653_v2  ;;  %v1676_v10 = vpack.c.b16 %v1675_v62, %v1675_v62  ;;  %v3225_v32 = vrot.slane %v2772_v8, 1 }
 0x1e7   : > { %v1632_v6 = vsel %vm1374_vm13, %v3224_v51, %v1630_v9  ;;  %v1656_v23 = vsel %vm1386_vm1, %v2794_v56, %v1655_v53  ;;  %v1376_v33 = vrot.slane %v2889_v24, 5  ;;  %v1640_v63 = vrot.slane %v2942_v46, 6 }
 0x1e8   : > { %v1634_v11 = vsel %vm1377_vm14, %v1633_v27, %v1632_v6  ;;  %v1658_v58 = vsel %vm1389_vm2, %v1657_v14, %v1656_v23  ;;  %v1372_v15 = vsel %vm1371_vm12, %v1370_v18, %v2784_v44  ;;  %1677 = vrot.lane.b32.xlu0 %v1676_v10, %s2220_s29  ;;  %v3226_v42 = vrot.slane %v2794_v56, 7 }
 0x1e9   : > { %v1636_v52 = vsel %vm1380_vm15, %v3225_v32, %v1634_v11  ;;  %v1659_v49 = vpack.c.b16 %v1658_v58, %v1658_v58  ;;  %v1375_v8 = vsel %vm1374_vm13, %v1373_v19, %v1372_v15  ;;  %v1379_v47 = vrot.slane %v2768_v22, 4 }
 0x1ea   : > { %v1637_v7 = vsel %vm1383_vm0, %v2849_v20, %v1636_v52  ;;  %v1378_v20 = vsel %vm1377_vm14, %v1376_v33, %v1375_v8  ;;  %v1382_v46 = vrot.slane %v2835_v59, 3  ;;  %v1385_v29 = vrot.slane %v2774_v1, 2 }
 0x1eb   : > { %v1639_v3 = vsel %vm1386_vm1, %v3226_v42, %v1637_v7  ;;  %1660 = vrot.lane.b32.xlu2 %v1659_v49, %s2221_s30  ;;  %v1381_v44 = vsel %vm1380_vm15, %v1379_v47, %v1378_v20  ;;  %v1388_v0 = vrot.slane %v2894_v13, 1  ;;  %vm1715_vm12 = vcmask 916480  }
 0x1ec   : > { %v1641_v24 = vsel %vm1389_vm2, %v1640_v63, %v1639_v3  ;;  %v1384_v56 = vsel %vm1383_vm0, %v1382_v46, %v1381_v44  ;;  %vm1718_vm13 = vcmask 982016  }
 0x1ed   : > { %v1642_v39 = vpack.c.b16 %v1641_v24, %v1641_v24  ;;  %v1387_v26 = vsel %vm1386_vm1, %v1385_v29, %v1384_v56 }
 0x1ee   : > { %v1390_v22 = vsel %vm1389_vm2, %v1388_v0, %v1387_v26 }
 0x1ef   : > { %1643 = vrot.lane.b32.xlu1 %v1642_v39, %s2222_s4  ;;  %v1391_v34 = vpack.c.b16 %v1390_v22, %v1390_v22 }
 0x220   : > { %v1476_v36 = vpop.permute.xlu2 %1475 }
 0x228   : > { %v1425_v25 = vpop.permute.xlu2 %1424 }
 0x232   : > { %v1559_v21 = vpop.permute.xlu2 %1558 }
 0x236   : > { %v1442_v5 = vpop.permute.xlu0 %1441 }
 0x23a   : > { %v1408_v59 = vpop.permute.xlu1 %1407  ;;  %v1610_v61 = vpop.permute.xlu2 %1609 }
 0x23b   : > { %v1681_v1 = vsel %vm1109_vm3, %v1391_v34, %v1408_v59  ;;  %vm1700_vm3 = vcmask 588800  }
 0x23c   : > { %v1683_v40 = vsel %vm1143_vm6, %v1681_v1, %v1425_v25  ;;  %vm1703_vm6 = vcmask 654336  }
 0x23d   : > { %v1685_v13 = vsel %vm1177_vm8, %v1683_v40, %v1442_v5  ;;  %vm1706_vm8 = vcmask 719872  }
 0x23e   : > { %v1493_v37 = vpop.permute.xlu0 %1492 }
 0x242   : > { %v1459_v55 = vpop.permute.xlu1 %1458 }
 0x243   : > { %v1687_v43 = vsel %vm1211_vm10, %v1685_v13, %v1459_v55  ;;  %vm1709_vm10 = vcmask 785408  }
 0x244   : > { %v1690_v17 = vsel %vm1688_vm4, %v1687_v43, %v1476_v36 }
 0x245   : > { %v1693_v4 = vsel %vm1691_vm5, %v1690_v17, %v1493_v37  ;;  %v1661_v38 = vpop.permute.xlu2 %1660 }
 0x246   : > { %v1576_v41 = vpop.permute.xlu0 %1575 }
 0x24b   : > { %v1510_v12 = vpop.permute.xlu1 %1509 }
 0x24c   : > { %v1696_v16 = vsel %vm1694_vm7, %v1693_v4, %v1510_v12 }
 0x24d   : > { %v1699_v48 = vsel %vm1697_vm9, %v1696_v16, %v1559_v21 }
 0x24e   : > { %v1702_v54 = vsel %vm1700_vm3, %v1699_v48, %v1576_v41 }
 0x24f   : > { %v1627_v31 = vpop.permute.xlu0 %1626 }
 0x257   : > { %v1593_v57 = vpop.permute.xlu1 %1592 }
 0x258   : > { %v1705_v30 = vsel %vm1703_vm6, %v1702_v54, %v1593_v57 }
 0x259   : > { %v1708_v50 = vsel %vm1706_vm8, %v1705_v30, %v1610_v61 }
 0x25a   : > { %v1711_v35 = vsel %vm1709_vm10, %v1708_v50, %v1627_v31  ;;  %v1678_v45 = vpop.permute.xlu0 %1677 }
 0x261   : > { %v1644_v27 = vpop.permute.xlu1 %1643 }
 0x262   : > { %v1714_v28 = vsel %vm1712_vm11, %v1711_v35, %v1644_v27 }
 0x263   : > { %v1717_v2 = vsel %vm1715_vm12, %v1714_v28, %v1661_v38 }
 0x264   : > { %v1720_v60 = vsel %vm1718_vm13, %v1717_v2, %v1678_v45 }
 0x265   : > { %1722 = vst [vmem:[%s228_s10] sm:$0xf] %v1720_v60 }
 0x266 PF: > { %s13_s16 = sadd.s32 1, %s2202_s16   ;;  %s3227_s12 = smov %s2194_s14 }
 0x267   : > { %p10_p7 = scmp.ge.s32.totalorder %s13_s16, 6   ;;  %s3228_s13 = smov %s2198_s15 }
 0x268   : > { %s3229_s14 = smov %s3232_s17  ;;  %s3230_s15 = smov %s3236_s18 }
 0x269   :  { %12 = sbr.rel (!%p10_p7) target bundleno = 3 (0x3), region = 71 }

// kernel: a_call__.4
= control target key start
LH: loop header
LB: loop body
LE: loop exit
PB: predicated region body
PF: predicated region fallthrough
CT: control target
= control target key end

     0   :  { %s2279_s12 = smov 0   ;;  %s2281_s13 = smov 0   ;;  %s3256_s0 = inlined_call_operand.vmem [shape: bf16[2,18,18,8], index: 0, kind: input, shape index: {}]   ;;  %s3257_s1 = inlined_call_operand.vmem [shape: bf16[72,8], index: 1, kind: input, shape index: {}]   ;;  %s3258_s2 = inlined_call_operand.vmem [shape: f32[1,1,8], index: 2, kind: input, shape index: {}]   ;;  %s3259_s3 = inlined_call_operand.vmem [shape: bf16[2,16,128], index: 3, kind: output, shape index: {}]  }
   0x1   :  { %s2283_s14 = smov 0   ;;  %s2285_s15 = smov 0  }
   0x2   :  { %s2287_s16 = smov 0  }
   0x3 LB: > { %s25_s17 = sadd.s32 1, %s2234_s14  ;;  %s32_s18 = sadd.s32 1, %s2238_s15  ;;  %s2242_s16 = sphi %s2287_s16, %s13_s16   ;;  %s2238_s15 = sphi %s2285_s15, %s3283_s15   ;;  %s2234_s14 = sphi %s2283_s14, %s3282_s14   ;;  %s2230_s13 = sphi %s2281_s13, %s3281_s13   ;;  %s2226_s12 = sphi %s2279_s12, %s3280_s12  }
   0x4   : > { %p26_p0 = scmp.ge.s32.totalorder %s25_s17, 2  ;;  %p1877_p1 = scmp.ge.s32.totalorder %s2242_s16, 1 }
   0x5   : > { %p175_p2 = scmp.lt.s32.totalorder %s2242_s16, 5 }
   0x6   : > { %s3285_s17 = smov (%p26_p0, %s25_s17), 0  ;;  %s3287_s18 = smov (!%p26_p0, %s32_s18), %s2238_s15 }
   0x7   : > { %p176_p3 = pnand %p1877_p1, %p175_p2  ;;  %p34_p4 = scmp.ge.s32.totalorder %s3287_s18, 2 }
   0x8   : > { %p209_p5 = scmp.lt.s32.totalorder (!%p176_p3), %s2230_s13, 1  ;;  %s1994_s19 = smul.u32 (!%p176_p3), 96, %s2226_s12 }
   0x9   : > { %s3289_s18 = smov (%p34_p4, %s3287_s18), 0  ;;  %179 = sbr.rel (%p176_p3) target bundleno = 617 (0x269), region = 32 }
   0xa   : > { %s2244_s25 = smov (!%p176_p3), 24   ;;  %s2245_s26 = smov (!%p176_p3), 16  }
   0xb   : > { %s2246_s27 = smov (!%p176_p3), 8   ;;  %s2247_s28 = smov (!%p176_p3), 32  }
   0xc   : > { %s2248_s29 = smov (!%p176_p3), 40   ;;  %s2249_s30 = smov (!%p176_p3), 48  }
   0xd   : > { %s2250_s4 = smov (!%p176_p3), 56   ;;  %s2251_s5 = smov (!%p176_p3), 64  }
   0xe   : > { %s3291_s13 = smov (!%p209_p5, %s2230_s13), 1  ;;  %vm539_vm0 = vcmask 1046528   ;;  %vm402_vm1 = vsmask.f32 7424  ;;  %vm1092_vm2 = vcmask 64512   ;;  %vm1285_vm3 = vcmask 1043456  }
   0xf   : > { %s2109_s20 = smul.u32 216, %s3291_s13  ;;  %vm1109_vm4 = vcmask 130048   ;;  %vm1126_vm5 = vcmask 195584   ;;  %vm1143_vm6 = vcmask 261120   ;;  %vm1160_vm7 = vcmask 326656   ;;  %p223_p6 = scmp.lt.s32.totalorder %s2226_s12, 1 }
  0x10   : > { %vm1177_vm8 = vcmask 392192   ;;  %vm1194_vm9 = vcmask 457728   ;;  %vm1211_vm10 = vcmask 523264   ;;  %vm1268_vm11 = vcmask 588800  }
  0x11   : > { %s213_s23 = scalar_lea.vmem %s3256_s0, %s2109_s20  ;;  %vm1403_vm12 = vcmask 1041409   ;;  %vm1406_vm13 = vcmask 1042434   ;;  %vm1409_vm14 = vcmask 1043459   ;;  %vm1412_vm15 = vcmask 1044484   ;;  %s3293_s12 = smov (!%p223_p6, %s2226_s12), 1 }
  0x12   : > { %s2318_s24 = scalar_lea.vmem %s213_s23, %s1994_s19 }
  0x13   : > { %v2064_v0 = vld [vmem:[%s2318_s24 + $0x30] sm:$0xf0]  ;;  %v254_v1 = vld [vmem:[%s2318_s24 + $0x38] sm:$0x1]  ;;  %v2065_v2 = vld [vmem:[%s2318_s24 + $0x30] sm:$0xe] }
  0x14   : > { %v390_v3 = vunpack.c.l.b16 %v254_v1  ;;  %v2066_v4 = vor.u32 %v2065_v2, %v2064_v0  ;;  %v2324_v5 = vld [vmem:[%s2318_s24] sm:$0xff]   ;;  %v250_v6 = vld [vmem:[%s2318_s24 + $0x8] sm:$0x1]  ;;  %v2067_v12 = vld [vmem:[%s2318_s24 + $0x48] sm:$0xf0] }
  0x15   : > { %v2328_v7 = vld [vmem:[%s2318_s24 + $0x3c] sm:$0xff]   ;;  %v386_v9 = vunpack.c.l.b16 %v250_v6  ;;  %v404_v10 = vshrl.u32 %v2324_v5, 16  ;;  %v406_v11 = vshll.u32 %v2324_v5, 16  ;;  %v256_v13 = vld [vmem:[%s2318_s24 + $0x50] sm:$0x1]  ;;  %v2341_v18 = vld [vmem:[%s2318_s24 + $0x48] sm:$0xff]  }
  0x16   : > { %v2331_v8 = vld [vmem:[%s2318_s24 + $0x3c] sm:$0xf0]  ;;  %v2337_v14 = vpack.c.b16 %v390_v3, %v390_v3  ;;  %v552_v15 = vrot.slane %v2066_v4, 1  ;;  %v2068_v16 = vld [vmem:[%s2318_s24 + $0x48] sm:$0xe]  ;;  %v392_v17 = vunpack.c.l.b16 %v256_v13  ;;  %v478_v26 = vshll.u32 %v2341_v18, 16  ;;  %628 = vrot.lane.b32.xlu2 %v2328_v7, %s2244_s25 }
  0x17   : > { %v2058_v19 = vld [vmem:[%s2318_s24] sm:$0xf0]  ;;  %v394_v20 = vpack.c.b16 %v386_v9, %v386_v9  ;;  %v408_v21 = vrot.slane %v406_v11, 1  ;;  %v2069_v22 = vor.u32 %v2068_v16, %v2067_v12  ;;  %v2059_v23 = vld [vmem:[%s2318_s24] sm:$0xe]  ;;  %v476_v29 = vshrl.u32 %v2341_v18, 16 }
  0x18   : > { %v553_v24 = vrot.slane %v2337_v14, 1  ;;  %v400_v25 = vpack.c.b16 %v392_v17, %v392_v17  ;;  %v2060_v30 = vor.u32 %v2059_v23, %v2058_v19  ;;  %v2349_v31 = vld [vmem:[%s2318_s24 + $0x30] sm:$0xff]   ;;  %v480_v35 = vrot.slane %v478_v26, 1  ;;  %v1906_v40 = vld [vmem:[%s2318_s24 + $0x44] sm:$0x1]  ;;  %v2361_v45 = vld [vmem:[%s2318_s24 + $0x18] sm:$0xff]  }
  0x19   : > { %v409_v27 = vor.u32 %v408_v21, %v404_v10  ;;  %v411_v28 = vshll.u32 %v394_v20, 16  ;;  %v558_v33 = vrot.slane %v2069_v22, 1  ;;  %v541_v39 = vrot.slane %v394_v20, 1  ;;  %v252_v42 = vld [vmem:[%s2318_s24 + $0x20] sm:$0x1]  ;;  %v1898_v63 = vld [vmem:[%s2318_s24 + $0x54] sm:$0xff]  }
  0x1a   : > { %v554_v32 = vsel %vm539_vm0, %v552_v15, %v553_v24  ;;  %v559_v34 = vrot.slane %v400_v25, 1  ;;  %v483_v37 = vshll.u32 %v400_v25, 16  ;;  %v540_v38 = vrot.slane %v2060_v30, 1  ;;  %v2169_v58 = vld [vmem:[%s2318_s24 + $0x3c] sm:$0xe]  ;;  %v1886_v10 = vld [vmem:[%s2318_s24 + $0xc] sm:$0xff]  }
  0x1b   : > { %572 = vrot.lane.b32.xlu0 %v554_v32, %s2245_s26  ;;  %v413_v36 = vrot.slane %v411_v28, 1  ;;  %v454_v41 = vshll.u32 %v2349_v31, 16  ;;  %v711_v44 = vshll.u32 %v2328_v7, 16  ;;  %v2365_v47 = vor.u32 %v480_v35, %v476_v29  ;;  %v2379_v0 = vld [vmem:[%s2318_s24 + $0x54] sm:$0xf0] }
  0x1c   : > { %v560_v46 = vsel %vm539_vm0, %v558_v33, %v559_v34  ;;  %v452_v48 = vshrl.u32 %v2349_v31, 16  ;;  %v648_v49 = vunpack.c.l.b16 %v1906_v40  ;;  %v485_v50 = vrot.slane %v483_v37, 1  ;;  %v2171_v11 = vld [vmem:[%s2318_s24 + $0xc] sm:$0xf0]  ;;  %v1908_v12 = vld [vmem:[%s2318_s24 + $0x5c] sm:$0x1] }
  0x1d   : > { %v414_v43 = vsel %vm402_vm1, %v409_v27, %v413_v36  ;;  %v542_v51 = vsel %vm539_vm0, %v540_v38, %v541_v39  ;;  %v459_v52 = vshll.u32 %v2337_v14, 16  ;;  %v388_v53 = vunpack.c.l.b16 %v252_v42  ;;  %v1902_v17 = vld [vmem:[%s2318_s24 + $0x14] sm:$0x1]  ;;  %v2061_v27 = vld [vmem:[%s2318_s24 + $0x18] sm:$0xf0]  ;;  %v1890_v39 = vld [vmem:[%s2318_s24 + $0x24] sm:$0xff]  }
  0x1e   : > { %499 = vrot.lane.b32.xlu1 %v414_v43, %s2246_s27  ;;  %v456_v54 = vrot.slane %v454_v41, 1  ;;  %v656_v55 = vpack.c.b16 %v648_v49, %v648_v49  ;;  %v428_v56 = vshrl.u32 %v2361_v45, 16  ;;  %v430_v57 = vshll.u32 %v2361_v45, 16  ;;  %564 = vrot.lane.b32.xlu2 %v542_v51, %s2245_s26  ;;  %v2172_v36 = vld [vmem:[%s2318_s24 + $0xc] sm:$0xe] }
  0x1f   : > { %v2373_v59 = vpack.c.b16 %v388_v53, %v388_v53  ;;  %v709_v60 = vshrl.u32 %v2328_v7, 16  ;;  %v713_v61 = vrot.slane %v711_v44, 1  ;;  %v486_v1 = vsel %vm402_vm1, %v2365_v47, %v485_v50  ;;  %v2413_v40 = vld [vmem:[%s2318_s24 + $0x24] sm:$0xf0]  ;;  %v2175_v53 = vld [vmem:[%s2318_s24 + $0x54] sm:$0xe] }
  0x20   : > { %v432_v62 = vrot.slane %v430_v57, 1  ;;  %v716_v2 = vshll.u32 %v656_v55, 16  ;;  %v2385_v4 = vor.u32 %v456_v54, %v452_v48  ;;  %v461_v6 = vrot.slane %v459_v52, 1  ;;  %v1904_v48 = vld [vmem:[%s2318_s24 + $0x2c] sm:$0x1] }
  0x21   : > { %v435_v3 = vshll.u32 %v2373_v59, 16  ;;  %v714_v13 = vor.u32 %v713_v61, %v709_v60  ;;  %v2170_v16 = vor.u32 %v2169_v58, %v2331_v8  ;;  %v650_v20 = vunpack.c.l.b16 %v1908_v12  ;;  %v2062_v8 = vld [vmem:[%s2318_s24 + $0x18] sm:$0xe]  ;;  %v1940_v54 = vld [vmem:[%s2318_s24 + $0x50] sm:$0x1] }
  0x22   : > { %v2387_v9 = vor.u32 %v432_v62, %v428_v56  ;;  %v718_v14 = vrot.slane %v716_v2, 1  ;;  %v462_v19 = vsel %vm402_vm1, %v2385_v4, %v461_v6  ;;  %v809_v21 = vrot.slane %v656_v55, 1 }
  0x23   : > { %576 = vrot.lane.b32.xlu0 %v560_v46, %s2245_s26  ;;  %v437_v7 = vrot.slane %v435_v3, 1  ;;  %v644_v22 = vunpack.c.l.b16 %v1902_v17  ;;  %v735_v24 = vshll.u32 %v1898_v63, 16  ;;  %v808_v25 = vrot.slane %v2170_v16, 1  ;;  %v1942_v16 = vld [vmem:[%s2318_s24 + $0x68] sm:$0x1] }
  0x24   : > { %v719_v23 = vsel %vm402_vm1, %v714_v13, %v718_v14  ;;  %v2402_v26 = vpack.c.b16 %v650_v20, %v650_v20  ;;  %v663_v28 = vshll.u32 %v1886_v10, 16  ;;  %v733_v32 = vshrl.u32 %v1898_v63, 16  ;;  %v2088_v14 = vld [vmem:[%s2318_s24 + $0x48] sm:$0xf0] }
  0x25   : > { %v438_v15 = vsel %vm402_vm1, %v2387_v9, %v437_v7  ;;  %v652_v29 = vpack.c.b16 %v644_v22, %v644_v22  ;;  %v810_v30 = vsel %vm539_vm0, %v808_v25, %v809_v21  ;;  %v737_v33 = vrot.slane %v735_v24, 1  ;;  %v1936_v21 = vld [vmem:[%s2318_s24 + $0x20] sm:$0x1]  ;;  %v2178_v24 = vld [vmem:[%s2318_s24 + $0x24] sm:$0xe] }
  0x26   : > { %511 = vrot.lane.b32.xlu1 %v486_v1, %s2246_s27  ;;  %503 = vrot.lane.b32.xlu2 %v438_v15, %s2246_s27  ;;  %v740_v34 = vshll.u32 %v2402_v26, 16  ;;  %v2063_v35 = vor.u32 %v2062_v8, %v2061_v27  ;;  %v661_v37 = vshrl.u32 %v1886_v10, 16  ;;  %v665_v38 = vrot.slane %v663_v28, 1  ;;  %v2089_v15 = vld [vmem:[%s2318_s24 + $0x48] sm:$0xe] }
  0x27   : > { %v668_v41 = vshll.u32 %v652_v29, 16  ;;  %v738_v42 = vor.u32 %v737_v33, %v733_v32  ;;  %v547_v46 = vrot.slane %v2373_v59, 1  ;;  %v2173_v52 = vor.u32 %v2172_v36, %v2171_v11 }
  0x28   : > { %v742_v43 = vrot.slane %v740_v34, 1  ;;  %v546_v44 = vrot.slane %v2063_v35, 1  ;;  %v666_v49 = vor.u32 %v665_v38, %v661_v37  ;;  %v646_v55 = vunpack.c.l.b16 %v1904_v48  ;;  %v2458_v37 = vld [vmem:[%s2318_s24 + $0x3c] sm:$0xff]  }
  0x29   : > { %v670_v50 = vrot.slane %v668_v41, 1  ;;  %v797_v57 = vrot.slane %v652_v29, 1  ;;  %v904_v58 = vunpack.c.l.b16 %v1940_v54  ;;  %v687_v60 = vshll.u32 %v1890_v39, 16  ;;  %v2461_v38 = vld [vmem:[%s2318_s24 + $0x3c] sm:$0xf0] }
  0x2a   : > { %v743_v51 = vsel %vm402_vm1, %v738_v42, %v742_v43  ;;  %v548_v56 = vsel %vm539_vm0, %v546_v44, %v547_v46  ;;  %v796_v61 = vrot.slane %v2173_v52, 1  ;;  %v2426_v62 = vpack.c.b16 %v646_v55, %v646_v55  ;;  %v255_v44 = vld [vmem:[%s2318_s24 + $0x44] sm:$0x1]  ;;  %v2082_v52 = vld [vmem:[%s2318_s24 + $0x18] sm:$0xf0] }
  0x2b   : > { %507 = vrot.lane.b32.xlu0 %v462_v19, %s2246_s27  ;;  %v671_v59 = vsel %vm402_vm1, %v666_v49, %v670_v50  ;;  %v912_v1 = vpack.c.b16 %v904_v58, %v904_v58  ;;  %v685_v3 = vshrl.u32 %v1890_v39, 16  ;;  %v689_v6 = vrot.slane %v687_v60, 1  ;;  %v2091_v49 = vld [vmem:[%s2318_s24 + $0x60] sm:$0xf0]  ;;  %v1938_v50 = vld [vmem:[%s2318_s24 + $0x38] sm:$0x1] }
  0x2c   : > { %v798_v2 = vsel %vm539_vm0, %v796_v61, %v797_v57  ;;  %v692_v7 = vshll.u32 %v2426_v62, 16  ;;  %v2090_v20 = vor.u32 %v2089_v15, %v2088_v14  ;;  %v906_v22 = vunpack.c.l.b16 %v1942_v16  ;;  %v2486_v60 = vld [vmem:[%s2318_s24 + $0x54] sm:$0xf0] }
  0x2d   : > { %v690_v12 = vor.u32 %v689_v6, %v685_v3  ;;  %v900_v27 = vunpack.c.l.b16 %v1936_v21  ;;  %v1065_v29 = vrot.slane %v912_v1, 1  ;;  %v803_v48 = vrot.slane %v2426_v62, 1  ;;  %v2498_v3 = vld [vmem:[%s2318_s24 + $0xc] sm:$0xf0] }
  0x2e   : > { %764 = vrot.lane.b32.xlu1 %v719_v23, %s2247_s28  ;;  %828 = vrot.lane.b32.xlu2 %v810_v30, %s2248_s29  ;;  %v694_v13 = vrot.slane %v692_v7, 1  ;;  %v1064_v28 = vrot.slane %v2090_v20, 1  ;;  %v914_v30 = vpack.c.b16 %v906_v22, %v906_v22  ;;  %v391_v54 = vunpack.c.l.b16 %v255_v44  ;;  %v251_v22 = vld [vmem:[%s2318_s24 + $0x14] sm:$0x1] }
  0x2f   : > { %v2453_v32 = vpack.c.b16 %v900_v27, %v900_v27  ;;  %v902_v58 = vunpack.c.l.b16 %v1938_v50 }
  0x30   : > { %v695_v19 = vsel %vm402_vm1, %v690_v12, %v694_v13  ;;  %v1066_v35 = vsel %vm539_vm0, %v1064_v28, %v1065_v29  ;;  %v996_v36 = vshll.u32 %v914_v30, 16  ;;  %v1071_v7 = vrot.slane %v914_v30, 1 }
  0x31   : > { %v924_v41 = vshll.u32 %v2453_v32, 16  ;;  %v464_v12 = vshrl.u32 %v2458_v37, 16  ;;  %v1053_v15 = vrot.slane %v2453_v32, 1  ;;  %v387_v28 = vunpack.c.l.b16 %v251_v22 }
  0x32   : > { %v998_v43 = vrot.slane %v996_v36, 1 }
  0x33   : > { %620 = vrot.lane.b32.xlu0 %v1886_v10, %s2244_s25  ;;  %v972_v10 = vshll.u32 %v912_v1, 16  ;;  %v466_v1 = vshll.u32 %v2458_v37, 16 }
  0x35   : > { %v974_v17 = vrot.slane %v972_v10, 1  ;;  %v910_v10 = vpack.c.b16 %v902_v58, %v902_v58  ;;  %v468_v13 = vrot.slane %v466_v1, 1  ;;  %v2187_v58 = vld [vmem:[%s2318_s24 + $0xc] sm:$0xe] }
  0x36   : > { %632 = vrot.lane.b32.xlu1 %v1898_v63, %s2244_s25  ;;  %768 = vrot.lane.b32.xlu2 %v743_v51, %s2247_s28  ;;  %v2176_v63 = vor.u32 %v2175_v53, %v2379_v0  ;;  %v815_v0 = vrot.slane %v2402_v26, 1  ;;  %v2448_v26 = vld [vmem:[%s2318_s24 + $0x60] sm:$0xff]   ;;  %v926_v51 = vrot.slane %v924_v41, 1  ;;  %v2083_v53 = vld [vmem:[%s2318_s24 + $0x18] sm:$0xe] }
  0x37   : > { %v975_v25 = vsel %vm402_vm1, %v2365_v47, %v974_v17  ;;  %v991_v8 = vshll.u32 %v2448_v26, 16  ;;  %v989_v33 = vshrl.u32 %v2448_v26, 16  ;;  %v2084_v61 = vor.u32 %v2083_v53, %v2082_v52  ;;  %v2085_v17 = vld [vmem:[%s2318_s24 + $0x30] sm:$0xf0] }
  0x38   : > { %v814_v11 = vrot.slane %v2176_v63, 1  ;;  %v927_v62 = vsel %vm402_vm1, %v2387_v9, %v926_v51  ;;  %v2491_v63 = vpack.c.b16 %v391_v54, %v391_v54  ;;  %v948_v21 = vshll.u32 %v910_v10, 16 }
  0x39   : > { %v993_v34 = vrot.slane %v991_v8, 1 }
  0x3a   : > { %v816_v23 = vsel %vm539_vm0, %v814_v11, %v815_v0  ;;  %v257_v11 = vld [vmem:[%s2318_s24 + $0x5c] sm:$0x1]  ;;  %v1052_v0 = vrot.slane %v2084_v61, 1  ;;  %v471_v14 = vshll.u32 %v2491_v63, 16  ;;  %v950_v32 = vrot.slane %v948_v21, 1 }
  0x3b   : > { %568 = vrot.lane.b32.xlu0 %v548_v56, %s2245_s26  ;;  %v2468_v42 = vor.u32 %v993_v34, %v989_v33  ;;  %v393_v20 = vunpack.c.l.b16 %v257_v11  ;;  %v1059_v34 = vrot.slane %v910_v10, 1  ;;  %v1907_v61 = vld [vmem:[%s2318_s24 + $0x50] sm:$0x1]  ;;  %v253_v10 = vld [vmem:[%s2318_s24 + $0x2c] sm:$0x1] }
  0x3c   : > { %v473_v27 = vrot.slane %v471_v14, 1  ;;  %v1054_v8 = vsel %vm539_vm0, %v1052_v0, %v1053_v15  ;;  %v649_v0 = vunpack.c.l.b16 %v1907_v61 }
  0x3d   : > { %v999_v55 = vsel %vm402_vm1, %v2468_v42, %v998_v43  ;;  %v401_v29 = vpack.c.b16 %v393_v20, %v393_v20 }
  0x3e   : > { %756 = vrot.lane.b32.xlu1 %v671_v59, %s2247_s28  ;;  %820 = vrot.lane.b32.xlu2 %v798_v2, %s2248_s29  ;;  %v2483_v59 = vld [vmem:[%s2318_s24 + $0x54] sm:$0xff]   ;;  %v2495_v2 = vld [vmem:[%s2318_s24 + $0xc] sm:$0xff]  }
  0x3f   : > { %v490_v30 = vshll.u32 %v2483_v59, 16  ;;  %v418_v36 = vshll.u32 %v2495_v2, 16  ;;  %v488_v41 = vshrl.u32 %v2483_v59, 16  ;;  %v495_v44 = vshll.u32 %v401_v29, 16 }
  0x40   : > { %v416_v50 = vshrl.u32 %v2495_v2, 16  ;;  %v562_v15 = vrot.slane %v401_v29, 1 }
  0x41   : > { %v492_v43 = vrot.slane %v490_v30, 1  ;;  %v420_v51 = vrot.slane %v418_v36, 1  ;;  %v497_v54 = vrot.slane %v495_v44, 1  ;;  %v1903_v30 = vld [vmem:[%s2318_s24 + $0x20] sm:$0x1] }
  0x42   : > { %v2076_v36 = vld [vmem:[%s2318_s24 + $0x48] sm:$0xf0] }
  0x43   : > { %884 = vrot.lane.b32.xlu0 %v2341_v18, %s2249_s30  ;;  %v493_v53 = vor.u32 %v492_v43, %v488_v41  ;;  %v645_v41 = vunpack.c.l.b16 %v1903_v30  ;;  %v1909_v43 = vld [vmem:[%s2318_s24 + $0x68] sm:$0x1] }
  0x46   : > { %624 = vrot.lane.b32.xlu1 %v1890_v39, %s2244_s25  ;;  %760 = vrot.lane.b32.xlu2 %v695_v19, %s2247_s28  ;;  %v2179_v39 = vor.u32 %v2178_v24, %v2413_v40  ;;  %v2092_v40 = vld [vmem:[%s2318_s24 + $0x60] sm:$0xe]  ;;  %v2086_v19 = vld [vmem:[%s2318_s24 + $0x30] sm:$0xe] }
  0x47   : > { %v2093_v56 = vor.u32 %v2092_v40, %v2091_v49  ;;  %v2087_v24 = vor.u32 %v2086_v19, %v2085_v17  ;;  %v2184_v49 = vld [vmem:[%s2318_s24 + $0x54] sm:$0xe]  ;;  %v657_v17 = vpack.c.b16 %v649_v0, %v649_v0 }
  0x48   : > { %v802_v46 = vrot.slane %v2179_v39, 1  ;;  %v395_v39 = vpack.c.b16 %v387_v28, %v387_v28 }
  0x49   : > { %v1070_v6 = vrot.slane %v2093_v56, 1  ;;  %v1058_v33 = vrot.slane %v2087_v24, 1  ;;  %v2189_v56 = vld [vmem:[%s2318_s24 + $0x24] sm:$0xf0]  ;;  %v2190_v24 = vld [vmem:[%s2318_s24 + $0x24] sm:$0xe] }
  0x4a   : > { %v804_v57 = vsel %vm539_vm0, %v802_v46, %v803_v48  ;;  %v951_v46 = vsel %vm402_vm1, %v2385_v4, %v950_v32  ;;  %v423_v52 = vshll.u32 %v395_v39, 16  ;;  %v544_v21 = vrot.slane %v395_v39, 1  ;;  %v2077_v39 = vld [vmem:[%s2318_s24 + $0x48] sm:$0xe] }
  0x4b   : > { %832 = vrot.lane.b32.xlu0 %v816_v23, %s2248_s29  ;;  %v1072_v16 = vsel %vm539_vm0, %v1070_v6, %v1071_v7  ;;  %v2181_v23 = vld [vmem:[%s2318_s24 + $0x3c] sm:$0xe]  ;;  %v1060_v40 = vsel %vm539_vm0, %v1058_v33, %v1059_v34  ;;  %v498_v6 = vsel %vm402_vm1, %v493_v53, %v497_v54  ;;  %v2185_v7 = vor.u32 %v2184_v49, %v2486_v60  ;;  %v2575_v53 = vld [vmem:[%s2318_s24 + $0x54] sm:$0xff]  }
  0x4c   : > { %v2182_v48 = vor.u32 %v2181_v23, %v2461_v38  ;;  %v556_v38 = vrot.slane %v2491_v63, 1  ;;  %v425_v1 = vrot.slane %v423_v52, 1  ;;  %v728_v23 = vshll.u32 %v657_v17, 16  ;;  %v2578_v54 = vld [vmem:[%s2318_s24 + $0x54] sm:$0xf0] }
  0x4d   : > { %v561_v14 = vrot.slane %v2185_v7, 1  ;;  %v2191_v34 = vor.u32 %v2190_v24, %v2189_v56  ;;  %v2078_v44 = vor.u32 %v2077_v39, %v2076_v36  ;;  %v651_v49 = vunpack.c.l.b16 %v1909_v43  ;;  %v2080_v7 = vld [vmem:[%s2318_s24 + $0x60] sm:$0xe] }
  0x4e   : > { %1020 = vrot.lane.b32.xlu1 %v975_v25, %s2250_s4  ;;  %1084 = vrot.lane.b32.xlu2 %v1066_v35, %s2251_s5  ;;  %v469_v25 = vor.u32 %v468_v13, %v464_v12  ;;  %v389_v12 = vunpack.c.l.b16 %v253_v10  ;;  %v2188_v13 = vor.u32 %v2187_v58, %v2498_v3  ;;  %v730_v29 = vrot.slane %v728_v23, 1 }
  0x4f   : > { %v563_v22 = vsel %vm539_vm0, %v561_v14, %v562_v15  ;;  %v977_v39 = vshrl.u32 %v2575_v53, 16 }
  0x50   : > { %v474_v35 = vsel %vm402_vm1, %v469_v25, %v473_v27  ;;  %v397_v60 = vpack.c.b16 %v389_v12, %v389_v12  ;;  %v543_v20 = vrot.slane %v2188_v13, 1 }
  0x52   : > { %v447_v27 = vshll.u32 %v397_v60, 16 }
  0x53   : > { %876 = vrot.lane.b32.xlu0 %v2361_v45, %s2249_s30 }
  0x54   : > { %v449_v33 = vrot.slane %v447_v27, 1 }
  0x56   : > { %888 = vrot.lane.b32.xlu1 %v2448_v26, %s2249_s30  ;;  %1024 = vrot.lane.b32.xlu2 %v999_v55, %s2250_s4  ;;  %v2529_v55 = vld [vmem:[%s2318_s24 + $0x24] sm:$0xff]  }
  0x57   : > { %v442_v19 = vshll.u32 %v2529_v55, 16  ;;  %v440_v3 = vshrl.u32 %v2529_v55, 16 }
  0x59   : > { %v444_v25 = vrot.slane %v442_v19, 1 }
  0x5b   : > { %824 = vrot.lane.b32.xlu0 %v804_v57, %s2248_s29  ;;  %v555_v57 = vrot.slane %v2182_v48, 1  ;;  %v445_v32 = vor.u32 %v444_v25, %v440_v3  ;;  %v550_v48 = vrot.slane %v397_v60, 1  ;;  %v2071_v60 = vld [vmem:[%s2318_s24 + $0x18] sm:$0xe]  ;;  %v979_v25 = vshll.u32 %v2575_v53, 16 }
  0x5d   : > { %v557_v11 = vsel %vm539_vm0, %v555_v57, %v556_v38  ;;  %v1236_v57 = vld [vmem:[%s3257_s1 + $0x20] sm:$0xf] }
  0x5e   : > { %1012 = vrot.lane.b32.xlu1 %v927_v62, %s2250_s4  ;;  %1088 = vrot.lane.b32.xlu2 %v1072_v16, %s2251_s5  ;;  %v421_v62 = vor.u32 %v420_v51, %v416_v50  ;;  %v811_v50 = vrot.slane %v2078_v44, 1  ;;  %v812_v51 = vrot.slane %v657_v17, 1  ;;  %v1258_v61 = vunpack.c.l.b16 %v1236_v57  ;;  %v2070_v17 = vld [vmem:[%s2318_s24 + $0x18] sm:$0xf0]  ;;  %v1937_v57 = vld [vmem:[%s2318_s24 + $0x2c] sm:$0x1] }
  0x60   : > { %v426_v63 = vsel %vm402_vm1, %v421_v62, %v425_v1  ;;  %v813_v38 = vsel %vm539_vm0, %v811_v50, %v812_v51  ;;  %v1263_v0 = vpack.c.b16 %v1258_v61, %v1258_v61  ;;  %v2073_v51 = vld [vmem:[%s2318_s24 + $0x30] sm:$0xf0] }
  0x62   : > { %v1287_v13 = vsel %vm1285_vm3, %v1263_v0, 0  ;;  %v1926_v0 = vld [vmem:[%s2318_s24 + $0x3c] sm:$0xff]   ;;  %vm1421_vm3 = vcmask 1047559  }
  0x63   : > { %880 = vrot.lane.b32.xlu0 %v2349_v31, %s2249_s30  ;;  %2095 = vmatpush.bf16.msra.mxu2 %v1287_v13 }
  0x64   : > { %2096 = vmatpush.bf16.msra.mxu3 %v1287_v13  ;;  %1292 = vmatpush.bf16.msra.mxu0 %v1287_v13 }
  0x65   : > { %2094 = vmatpush.bf16.msra.mxu1 %v1287_v13 }
  0x66   : > { %1076 = vrot.lane.b32.xlu1 %v1054_v8, %s2251_s5  ;;  %509 = vrot.lane.b32.xlu2 %v474_v35, %s2246_s27  ;;  %v545_v8 = vsel %vm539_vm0, %v543_v20, %v544_v21  ;;  %v731_v35 = vsel %vm402_vm1, %v2365_v47, %v730_v29  ;;  %v2570_v47 = vpack.c.b16 %v645_v41, %v645_v41  ;;  %v1998_v21 = vld [vmem:[%s3257_s1 + $0x18] sm:$0xff]  ;;  %v1997_v29 = vld [vmem:[%s3257_s1 + $0x10] sm:$0xff]  ;;  %v981_v41 = vrot.slane %v979_v25, 1 }
  0x67   : > { %2098 = vmatpush.bf16.msra.mxu2 %v1998_v21 }
  0x68   : > { %v680_v56 = vshll.u32 %v2570_v47, 16  ;;  %2099 = vmatpush.bf16.msra.mxu3 %v1998_v21  ;;  %1293 = vmatpush.bf16.msra.mxu0 %v1998_v21 }
  0x69   : > { %2097 = vmatpush.bf16.msra.mxu1 %v1998_v21 }
  0x6a   : > { %v682_v1 = vrot.slane %v680_v56, 1  ;;  %v2657_v56 = vld [vmem:[%s2318_s24 + $0x6c] sm:$0xf0] }
  0x6b   : > { %1016 = vrot.lane.b32.xlu0 %v951_v46, %s2250_s4  ;;  %v549_v46 = vrot.slane %v2191_v34, 1  ;;  %v2631_v34 = vld [vmem:[%s2318_s24 + $0x24] sm:$0xff]   ;;  %2101 = vmatpush.bf16.msra.mxu2 %v1997_v29 }
  0x6c   : > { %v683_v15 = vsel %vm402_vm1, %v2387_v9, %v682_v1  ;;  %2102 = vmatpush.bf16.msra.mxu3 %v1997_v29  ;;  %1294 = vmatpush.bf16.msra.mxu0 %v1997_v29  ;;  %v1943_v1 = vld [vmem:[%s2318_s24 + $0x74] sm:$0x1]  ;;  %v929_v25 = vshrl.u32 %v2631_v34, 16 }
  0x6d   : > { %v551_v52 = vsel %vm539_vm0, %v549_v46, %v550_v48  ;;  %2100 = vmatpush.bf16.msra.mxu1 %v1997_v29  ;;  %v2193_v48 = vld [vmem:[%s2318_s24 + $0x54] sm:$0xe]  ;;  %v907_v13 = vunpack.c.l.b16 %v1943_v1 }
  0x6e   : > { %1080 = vrot.lane.b32.xlu1 %v1060_v40, %s2251_s5  ;;  %513 = vrot.lane.b32.xlu2 %v498_v6, %s2246_s27  ;;  %v2079_v6 = vld [vmem:[%s2318_s24 + $0x60] sm:$0xf0] }
  0x6f   : > { %v2081_v12 = vor.u32 %v2080_v7, %v2079_v6 }
  0x70   : > { %v2544_v16 = vpop.permute.xlu2 %628 }
  0x71   : > { %v817_v24 = vrot.slane %v2081_v12, 1 }
  0x73   : > { %574 = vrot.lane.b32.xlu0 %v557_v11, %s2245_s26  ;;  %v1941_v11 = vld [vmem:[%s2318_s24 + $0x5c] sm:$0x1] }
  0x74   : > { %v905_v19 = vunpack.c.l.b16 %v1941_v11  ;;  %v901_v11 = vunpack.c.l.b16 %v1937_v57 }
  0x76   : > { %501 = vrot.lane.b32.xlu1 %v426_v63, %s2246_s27  ;;  %578 = vrot.lane.b32.xlu2 %v563_v22, %s2245_s26  ;;  %v1905_v63 = vld [vmem:[%s2318_s24 + $0x38] sm:$0x1] }
  0x77   : > { %v647_v22 = vunpack.c.l.b16 %v1905_v63  ;;  %v2194_v63 = vor.u32 %v2193_v48, %v2578_v54  ;;  %v915_v54 = vpack.c.b16 %v907_v13, %v907_v13 }
  0x78   : > { %v2555_v28 = vpop.permute.xlu2 %564 }
  0x7b   : > { %630 = vrot.lane.b32.xlu0 %v2341_v18, %s2244_s25  ;;  %v450_v18 = vsel %vm402_vm1, %v445_v32, %v449_v33  ;;  %v800_v32 = vrot.slane %v2570_v47, 1  ;;  %v982_v47 = vor.u32 %v981_v41, %v977_v39  ;;  %v1008_v39 = vshll.u32 %v915_v54, 16 }
  0x7c   : > { %v955_v41 = vshll.u32 %v1926_v0, 16 }
  0x7e   : > { %566 = vrot.lane.b32.xlu1 %v545_v8, %s2245_s26  ;;  %622 = vrot.lane.b32.xlu2 %v2361_v45, %s2244_s25  ;;  %v659_v45 = vpack.c.b16 %v651_v49, %v651_v49  ;;  %v2618_v8 = vpack.c.b16 %v905_v19, %v905_v19  ;;  %v1939_v19 = vld [vmem:[%s2318_s24 + $0x44] sm:$0x1] }
  0x80   : > { %v2568_v40 = vpop.permute.xlu2 %503  ;;  %v752_v58 = vshll.u32 %v659_v45, 16  ;;  %v818_v3 = vrot.slane %v659_v45, 1  ;;  %v984_v43 = vshll.u32 %v2618_v8, 16 }
  0x82   : > { %v819_v33 = vsel %vm539_vm0, %v817_v24, %v818_v3  ;;  %v986_v50 = vrot.slane %v984_v43, 1  ;;  %v903_v24 = vunpack.c.l.b16 %v1939_v19 }
  0x83   : > { %766 = vrot.lane.b32.xlu0 %v731_v35, %s2247_s28  ;;  %v2634_v35 = vld [vmem:[%s2318_s24 + $0x24] sm:$0xf0] }
  0x84   : > { %v987_v7 = vsel %vm402_vm1, %v982_v47, %v986_v50  ;;  %v911_v43 = vpack.c.b16 %v903_v24, %v903_v24  ;;  %v1010_v47 = vrot.slane %v1008_v39, 1  ;;  %v953_v50 = vshrl.u32 %v1926_v0, 16 }
  0x86   : > { %505 = vrot.lane.b32.xlu1 %v450_v18, %s2246_s27  ;;  %570 = vrot.lane.b32.xlu2 %v551_v52, %s2245_s26  ;;  %v1996_v18 = vld [vmem:[%s3257_s1 + $0x8] sm:$0xff]  ;;  %v2074_v52 = vld [vmem:[%s2318_s24 + $0x30] sm:$0xe] }
  0x87   : > { %2104 = vmatpush.bf16.msra.mxu2 %v1996_v18  ;;  %2105 = vmatpush.bf16.msra.mxu3 %v1996_v18  ;;  %v2075_v61 = vor.u32 %v2074_v52, %v2073_v51  ;;  %v957_v51 = vrot.slane %v955_v41, 1  ;;  %v960_v52 = vshll.u32 %v911_v43, 16 }
  0x88   : > { %v2588_v62 = vpop.permute.xlu2 %828  ;;  %1295 = vmatpush.bf16.msra.mxu0 %v1996_v18  ;;  %2103 = vmatpush.bf16.msra.mxu1 %v1996_v18 }
  0x8b   : > { %634 = vrot.lane.b32.xlu0 %v2448_v26, %s2244_s25  ;;  %v754_v26 = vrot.slane %v752_v58, 1  ;;  %v1995_v58 = vld [vmem:[%s3257_s1] sm:$0xff] }
  0x8c   : > { %2107 = vmatpush.bf16.msra.mxu2 %v1995_v58  ;;  %2108 = vmatpush.bf16.msra.mxu3 %v1995_v58 }
  0x8d   : > { %v2592_v10 = vpop.permute.xlu0 %572  ;;  %v755_v23 = vsel %vm402_vm1, %v2468_v42, %v754_v26  ;;  %v2623_v42 = vpack.c.b16 %v647_v22, %v647_v22  ;;  %v2670_v26 = vld [vmem:[%s2318_s24 + $0x3c] sm:$0xf0]  ;;  %1296 = vmatpush.bf16.msra.mxu0 %v1995_v58  ;;  %2106 = vmatpush.bf16.msra.mxu1 %v1995_v58  ;;  %v1067_v22 = vrot.slane %v2194_v63, 1  ;;  %v962_v63 = vrot.slane %v960_v52, 1 }
  0x8e   : > { %830 = vrot.lane.b32.xlu1 %v813_v38, %s2248_s29  ;;  %886 = vrot.lane.b32.xlu2 %v2575_v53, %s2249_s30  ;;  %v1934_v53 = vld [vmem:[%s2318_s24 + $0x6c] sm:$0xff]  }
  0x8f   : > { %v704_v44 = vshll.u32 %v2623_v42, 16  ;;  %v1003_v21 = vshll.u32 %v1934_v53, 16 }
  0x90   : > { %v500_v14 = vpop.permute.xlu1 %499  ;;  %v2616_v27 = vpop.permute.xlu2 %768 }
  0x91   : > { %v1094_v20 = vsel %vm1092_vm2, %v2324_v5, %v500_v14  ;;  %v2072_v5 = vor.u32 %v2071_v60, %v2070_v17  ;;  %v706_v38 = vrot.slane %v704_v44, 1  ;;  %v805_v14 = vrot.slane %v2075_v61, 1  ;;  %v2202_v61 = vld [vmem:[%s2318_s24 + $0x3c] sm:$0xe] }
  0x92   : > { %v2610_v9 = vsel %vm1109_vm4, %v1094_v20, %v2555_v28  ;;  %v931_v17 = vshll.u32 %v2631_v34, 16  ;;  %v909_v60 = vpack.c.b16 %v901_v11, %v901_v11 }
  0x93   : > { %758 = vrot.lane.b32.xlu0 %v683_v15, %s2247_s28  ;;  %v799_v30 = vrot.slane %v2072_v5, 1  ;;  %v707_v12 = vsel %vm402_vm1, %v2385_v4, %v706_v38  ;;  %v806_v15 = vrot.slane %v2623_v42, 1 }
  0x94   : > { %v933_v42 = vrot.slane %v931_v17, 1  ;;  %v936_v29 = vshll.u32 %v909_v60, 16  ;;  %v1074_v17 = vrot.slane %v915_v54, 1 }
  0x95   : > { %v2620_v28 = vpop.permute.xlu0 %576  ;;  %v801_v46 = vsel %vm539_vm0, %v799_v30, %v800_v32  ;;  %v807_v5 = vsel %vm539_vm0, %v805_v14, %v806_v15  ;;  %v2196_v30 = vld [vmem:[%s2318_s24 + $0x24] sm:$0xe]  ;;  %v1001_v32 = vshrl.u32 %v1934_v53, 16  ;;  %v1056_v14 = vrot.slane %v909_v60, 1 }
  0x96   : > { %770 = vrot.lane.b32.xlu1 %v755_v23, %s2247_s28  ;;  %834 = vrot.lane.b32.xlu2 %v819_v33, %s2248_s29  ;;  %v1068_v23 = vrot.slane %v2618_v8, 1  ;;  %v1005_v33 = vrot.slane %v1003_v21, 1  ;;  %v934_v18 = vor.u32 %v933_v42, %v929_v25  ;;  %v938_v44 = vrot.slane %v936_v29, 1 }
  0x97   : > { %v2197_v58 = vor.u32 %v2196_v30, %v2634_v35 }
  0x98   : > { %v2636_v36 = vpop.permute.xlu1 %511  ;;  %v2649_v49 = vpop.permute.xlu2 %820  ;;  %v1069_v8 = vsel %vm539_vm0, %v1067_v22, %v1068_v23  ;;  %v939_v38 = vsel %vm402_vm1, %v934_v18, %v938_v44  ;;  %v1062_v23 = vrot.slane %v911_v43, 1 }
  0x99   : > { %v1055_v13 = vrot.slane %v2197_v58, 1 }
  0x9b   : > { %626 = vrot.lane.b32.xlu0 %v2349_v31, %s2244_s25 }
  0x9d   : > { %v2653_v45 = vpop.permute.xlu0 %507 }
  0x9e   : > { %822 = vrot.lane.b32.xlu1 %v801_v46, %s2248_s29  ;;  %878 = vrot.lane.b32.xlu2 %v2631_v34, %s2249_s30  ;;  %v2199_v46 = vld [vmem:[%s2318_s24 + $0x6c] sm:$0xe]  ;;  %v1006_v34 = vor.u32 %v1005_v33, %v1001_v32 }
  0x9f   : > { %v2200_v11 = vor.u32 %v2199_v46, %v2657_v56  ;;  %v2203_v56 = vor.u32 %v2202_v61, %v2670_v26 }
  0xa0   : > { %v2665_v6 = vpop.permute.xlu1 %764  ;;  %v2684_v4 = vpop.permute.xlu2 %760  ;;  %v1011_v1 = vsel %vm402_vm1, %v1006_v34, %v1010_v47 }
  0xa1   : > { %v1061_v54 = vrot.slane %v2203_v56, 1 }
  0xa3   : > { %1022 = vrot.lane.b32.xlu0 %v987_v7, %s2250_s4  ;;  %v1102_v7 = vsel %vm1092_vm2, %v2349_v31, %v2653_v45  ;;  %v1057_v45 = vsel %vm539_vm0, %v1055_v13, %v1056_v14 }
  0xa4   : > { %v1119_v35 = vsel %vm1109_vm4, %v1102_v7, %v2592_v10 }
  0xa5   : > { %v2681_v20 = vpop.permute.xlu0 %620  ;;  %v1136_v21 = vsel %vm1126_vm5, %v1119_v35, %v2544_v16 }
  0xa6   : > { %762 = vrot.lane.b32.xlu1 %v707_v12, %s2247_s28  ;;  %826 = vrot.lane.b32.xlu2 %v807_v5, %s2248_s29  ;;  %v958_v12 = vor.u32 %v957_v51, %v953_v50  ;;  %v1153_v22 = vsel %vm1143_vm6, %v1136_v21, %v2665_v6  ;;  %v2166_v5 = vld [vmem:[%s2318_s24 + $0x48] sm:$0xff]   ;;  %v1063_v6 = vsel %vm539_vm0, %v1061_v54, %v1062_v23  ;;  %v2167_v50 = vld [vmem:[%s2318_s24 + $0x18] sm:$0xff]  }
  0xa7   : > { %v1170_v16 = vsel %vm1160_vm7, %v1153_v22, %v2588_v62  ;;  %v1106_v24 = vsel %vm1092_vm2, %v2166_v5, %v2636_v36  ;;  %v1128_v34 = vsel %vm1126_vm5, %v2610_v9, %v2681_v20  ;;  %v1098_v51 = vsel %vm1092_vm2, %v2167_v50, %v2568_v40 }
  0xa8   : > { %v2688_v3 = vpop.permute.xlu1 %632  ;;  %v963_v19 = vsel %vm402_vm1, %v958_v12, %v962_v63  ;;  %v1123_v32 = vsel %vm1109_vm4, %v1106_v24, %v2620_v28  ;;  %vm1418_vm1 = vcmask 1046534  }
  0xa9   : > { %v1140_v62 = vsel %vm1126_vm5, %v1123_v32, %v2688_v3 }
  0xaa   : > { %v1157_v39 = vsel %vm1143_vm6, %v1140_v62, %v2616_v27 }
  0xab   : > { %890 = vrot.lane.b32.xlu0 %v1934_v53, %s2249_s30  ;;  %v1085_v53 = vpop.permute.xlu2 %1084 }
  0xad   : > { %v2696_v48 = vpop.permute.xlu0 %568 }
  0xae   : > { %1086 = vrot.lane.b32.xlu1 %v1069_v8, %s2251_s5  ;;  %882 = vrot.lane.b32.xlu2 %v1926_v0, %s2249_s30  ;;  %v1073_v0 = vrot.slane %v2200_v11, 1 }
  0xb0   : > { %v2699_v57 = vpop.permute.xlu1 %756  ;;  %v1075_v10 = vsel %vm539_vm0, %v1073_v0, %v1074_v17  ;;  %vm1415_vm0 = vcmask 1045509  }
  0xb1   : > { %v1145_v27 = vsel %vm1143_vm6, %v1128_v34, %v2699_v57 }
  0xb2   : > { %v1162_v52 = vsel %vm1160_vm7, %v1145_v27, %v2649_v49 }
  0xb3   : > { %1014 = vrot.lane.b32.xlu0 %v939_v38, %s2250_s4  ;;  %v1025_v60 = vpop.permute.xlu2 %1024 }
  0xb5   : > { %v885_v15 = vpop.permute.xlu0 %884 }
  0xb6   : > { %1026 = vrot.lane.b32.xlu1 %v1011_v1, %s2250_s4  ;;  %1018 = vrot.lane.b32.xlu2 %v963_v19, %s2250_s4  ;;  %v1187_v25 = vsel %vm1177_vm8, %v1170_v16, %v885_v15 }
  0xb8   : > { %v625_v31 = vpop.permute.xlu1 %624 }
  0xbb   : > { %1078 = vrot.lane.b32.xlu0 %v1057_v45, %s2251_s5  ;;  %v1089_v36 = vpop.permute.xlu2 %1088 }
  0xbd   : > { %v833_v26 = vpop.permute.xlu0 %832 }
  0xbe   : > { %1090 = vrot.lane.b32.xlu1 %v1075_v10, %s2251_s5  ;;  %v1174_v8 = vsel %vm1160_vm7, %v1157_v39, %v833_v26 }
  0xc0   : > { %v1021_v42 = vpop.permute.xlu1 %1020 }
  0xc1   : > { %v1204_v29 = vsel %vm1194_vm9, %v1187_v25, %v1021_v42 }
  0xc2   : > { %v1221_v30 = vsel %vm1211_vm10, %v1204_v29, %v1085_v53  ;;  %v1115_v53 = vsel %vm1109_vm4, %v1098_v51, %v2696_v48 }
  0xc3   : > { %1972 = vmatmul.msk.bf16.vlgmr.msra.gmra.mxu2 %vm1268_vm11, %v1221_v30  ;;  %1082 = vrot.lane.b32.xlu0 %v1063_v6, %s2251_s5  ;;  %v510_v46 = vpop.permute.xlu2 %509  ;;  %v1132_v58 = vsel %vm1126_vm5, %v1115_v53, %v625_v31 }
  0xc4   : > { %v1149_v40 = vsel %vm1143_vm6, %v1132_v58, %v2684_v4  ;;  %v1104_v16 = vsel %vm1092_vm2, %v2458_v37, %v510_v46 }
  0xc5   : > { %v877_v33 = vpop.permute.xlu0 %876 }
  0xc6   : > { %v1179_v38 = vsel %vm1177_vm8, %v1162_v52, %v877_v33 }
  0xc8   : > { %v889_v41 = vpop.permute.xlu1 %888 }
  0xc9   : > { %v1191_v43 = vsel %vm1177_vm8, %v1174_v8, %v889_v41 }
  0xca   : > { %v1208_v28 = vsel %vm1194_vm9, %v1191_v43, %v1025_v60 }
  0xcb   : > { %v1225_v18 = vsel %vm1211_vm10, %v1208_v28, %v1089_v36  ;;  %v514_v20 = vpop.permute.xlu2 %513 }
  0xcc   : > { %1974 = vmatmul.msk.bf16.vlgmr.msra.gmra.mxu3 %vm1268_vm11, %v1225_v18  ;;  %v1108_v41 = vsel %vm1092_vm2, %v2483_v59, %v514_v20 }
  0xcd   : > { %v825_v44 = vpop.permute.xlu0 %824 }
  0xce   : > { %v1166_v49 = vsel %vm1160_vm7, %v1149_v40, %v825_v44 }
  0xd0   : > { %v1013_v3 = vpop.permute.xlu1 %1012 }
  0xd1   : > { %v1196_v9 = vsel %vm1194_vm9, %v1179_v38, %v1013_v3 }
  0xd3   : > { %v579_v63 = vpop.permute.xlu2 %578 }
  0xd4   : > { %v1125_v3 = vsel %vm1109_vm4, %v1108_v41, %v579_v63 }
  0xd5   : > { %v881_v47 = vpop.permute.xlu0 %880 }
  0xd6   : > { %v1183_v1 = vsel %vm1177_vm8, %v1166_v49, %v881_v47 }
  0xd8   : > { %v1077_v61 = vpop.permute.xlu1 %1076 }
  0xd9   : > { %v1213_v57 = vsel %vm1211_vm10, %v1196_v9, %v1077_v61 }
  0xda   : > { %1968 = vmatmul.msk.bf16.vlgmr.msra.gmra.mxu0 %vm1268_vm11, %v1213_v57 }
  0xdb   : > { %v623_v15 = vpop.permute.xlu2 %622 }
  0xdd   : > { %v1017_v48 = vpop.permute.xlu0 %1016 }
  0xde   : > { %v1200_v7 = vsel %vm1194_vm9, %v1183_v1, %v1017_v48 }
  0xe0   : > { %v1081_v11 = vpop.permute.xlu1 %1080 }
  0xe1   : > { %v1217_v12 = vsel %vm1211_vm10, %v1200_v7, %v1081_v11 }
  0xe2   : > { %1970 = vmatmul.msk.bf16.vlgmr.msra.gmra.mxu1 %vm1268_vm11, %v1217_v12  ;;  %v2814_v12 = vld [vmem:[%s3258_s2] ss:$0 sm:$0xff] }
  0xe3   : > { %v571_v4 = vpop.permute.xlu2 %570 }
  0xe5   : > { %v575_v13 = vpop.permute.xlu0 %574 }
  0xe6   : > { %v1121_v24 = vsel %vm1109_vm4, %v1104_v16, %v575_v13 }
  0xe8   : > { %v502_v14 = vpop.permute.xlu1 %501 }
  0xe9   : > { %v1096_v37 = vsel %vm1092_vm2, %v2495_v2, %v502_v14 }
  0xeb   : > { %v887_v45 = vpop.permute.xlu2 %886 }
  0xed   : > { %v631_v35 = vpop.permute.xlu0 %630 }
  0xee   : > { %v1138_v25 = vsel %vm1126_vm5, %v1121_v24, %v631_v35 }
  0xf0   : > { %v567_v0 = vpop.permute.xlu1 %566 }
  0xf1   : > { %v1113_v39 = vsel %vm1109_vm4, %v1096_v37, %v567_v0 }
  0xf2   : > { %v1130_v28 = vsel %vm1126_vm5, %v1113_v39, %v623_v15 }
  0xf3   : > { %v835_v10 = vpop.permute.xlu2 %834 }
  0xf5   : > { %v767_v17 = vpop.permute.xlu0 %766 }
  0xf6   : > { %v1155_v42 = vsel %vm1143_vm6, %v1138_v25, %v767_v17 }
  0xf8   : > { %v506_v19 = vpop.permute.xlu1 %505 }
  0xf9   : > { %v1100_v43 = vsel %vm1092_vm2, %v2529_v55, %v506_v19 }
  0xfa   : > { %v1117_v27 = vsel %vm1109_vm4, %v1100_v43, %v571_v4 }
  0xfb   : > { %v879_v23 = vpop.permute.xlu2 %878 }
  0xfd   : > { %v635_v31 = vpop.permute.xlu0 %634 }
  0xfe   : > { %v1142_v2 = vsel %vm1126_vm5, %v1125_v3, %v635_v31 }
 0x100   : > { %v831_v56 = vpop.permute.xlu1 %830 }
 0x101   : > { %v1172_v6 = vsel %vm1160_vm7, %v1155_v42, %v831_v56 }
 0x102   : > { %v1189_v32 = vsel %vm1177_vm8, %v1172_v6, %v887_v45 }
 0x103   : > { %v827_v30 = vpop.permute.xlu2 %826 }
 0x105   : > { %v759_v21 = vpop.permute.xlu0 %758 }
 0x106   : > { %v1147_v18 = vsel %vm1143_vm6, %v1130_v28, %v759_v21 }
 0x108   : > { %v771_v60 = vpop.permute.xlu1 %770 }
 0x109   : > { %v1159_v47 = vsel %vm1143_vm6, %v1142_v2, %v771_v60 }
 0x10a   : > { %v1176_v53 = vsel %vm1160_vm7, %v1159_v47, %v835_v10 }
 0x10b   : > { %v883_v44 = vpop.permute.xlu2 %882 }
 0x10d   : > { %v627_v22 = vpop.permute.xlu0 %626 }
 0x10e   : > { %v1134_v59 = vsel %vm1126_vm5, %v1117_v27, %v627_v22 }
 0x110   : > { %v823_v54 = vpop.permute.xlu1 %822 }
 0x111   : > { %v1164_v34 = vsel %vm1160_vm7, %v1147_v18, %v823_v54 }
 0x112   : > { %v1181_v50 = vsel %vm1177_vm8, %v1164_v34, %v879_v23 }
 0x113   : > { %v1019_v40 = vpop.permute.xlu2 %1018 }
 0x115   : > { %v1023_v26 = vpop.permute.xlu0 %1022 }
 0x116   : > { %v1206_v62 = vsel %vm1194_vm9, %v1189_v32, %v1023_v26 }
 0x118   : > { %v763_v5 = vpop.permute.xlu1 %762 }
 0x119   : > { %v1151_v55 = vsel %vm1143_vm6, %v1134_v59, %v763_v5 }
 0x11a   : > { %v1168_v58 = vsel %vm1160_vm7, %v1151_v55, %v827_v30 }
 0x11b   : > { %v1185_v49 = vsel %vm1177_vm8, %v1168_v58, %v883_v44 }
 0x11c   : > { %v1202_v1 = vsel %vm1194_vm9, %v1185_v49, %v1019_v40 }
 0x11d   : > { %v891_v29 = vpop.permute.xlu0 %890 }
 0x11e   : > { %v1193_v9 = vsel %vm1177_vm8, %v1176_v53, %v891_v29 }
 0x120   : > { %v1087_v36 = vpop.permute.xlu1 %1086 }
 0x121   : > { %v1223_v33 = vsel %vm1211_vm10, %v1206_v62, %v1087_v36 }
 0x122   : > { %1973 = vmatmul.msk.bf16.gmra.mxu2 %vm1268_vm11, %v1223_v33 }
 0x125   : > { %v1015_v8 = vpop.permute.xlu0 %1014 }
 0x126   : > { %v1198_v51 = vsel %vm1194_vm9, %v1181_v50, %v1015_v8 }
 0x128   : > { %v1027_v46 = vpop.permute.xlu1 %1026 }
 0x129   : > { %v1210_v20 = vsel %vm1194_vm9, %v1193_v9, %v1027_v46 }
 0x12d   : > { %v1079_v52 = vpop.permute.xlu0 %1078 }
 0x12e   : > { %v1215_v38 = vsel %vm1211_vm10, %v1198_v51, %v1079_v52 }
 0x12f   : > { %1969 = vmatmul.msk.bf16.gmra.mxu0 %vm1268_vm11, %v1215_v38 }
 0x130   : > { %v1091_v61 = vpop.permute.xlu1 %1090 }
 0x131   : > { %v1227_v57 = vsel %vm1211_vm10, %v1210_v20, %v1091_v61 }
 0x132   : > { %1975 = vmatmul.msk.bf16.gmra.mxu3 %vm1268_vm11, %v1227_v57 }
 0x135   : > { %v1083_v48 = vpop.permute.xlu0 %1082 }
 0x136   : > { %v1219_v7 = vsel %vm1211_vm10, %v1202_v1, %v1083_v48 }
 0x137   : > { %1971 = vmatmul.msk.bf16.gmra.mxu1 %vm1268_vm11, %v1219_v7 }
 0x146   : > { %v1318_v11 = vpop.f32.mrf.mxu2 }
 0x147   : > { %v1319_v13 = vadd.f32 %v2814_v12, %v1318_v11 }
 0x149   : > { %v1346_v0 = vmax.f32 %v1319_v13, 0.0 }
 0x14b   : > { %v1362_v56 = vpack.c.bf16 %v1346_v0, %v1346_v0 }
 0x14d   : > { %v1382_v23 = vunpack.c.l.b16 %v1362_v56 }
 0x14e   : > { %v1320_v14 = vpop.f32.mrf.mxu2 }
 0x14f   : > { %v1328_v63 = vpop.f32.mrf.mxu3  ;;  %v1321_v35 = vadd.f32 %v2814_v12, %v1320_v14  ;;  %v2823_v29 = vunpack.i.l.s16 %v1382_v23 }
 0x150   : > { %v1329_v17 = vadd.f32 %v2814_v12, %v1328_v63 }
 0x151   : > { %v1347_v19 = vmax.f32 %v1321_v35, 0.0  ;;  %v1464_v43 = vrot.slane %v2823_v29, 7  ;;  %v1499_v18 = vrot.slane %v2823_v29, 1  ;;  %v1430_v44 = vrot.slane %v2823_v29, 5 }
 0x152   : > { %v1350_v21 = vmax.f32 %v1329_v17, 0.0  ;;  %v1516_v46 = vrot.slane %v2823_v29, 2  ;;  %v1447_v2 = vrot.slane %v2823_v29, 6 }
 0x153   : > { %v1363_v10 = vpack.c.bf16 %v1347_v19, %v1347_v19 }
 0x154   : > { %v1366_v26 = vpack.c.bf16 %v1350_v21, %v1350_v21 }
 0x155   : > { %v1555_v42 = vunpack.c.l.b16 %v1363_v10 }
 0x156   : > { %v1384_v30 = vunpack.c.l.b16 %v1366_v26 }
 0x157   : > { %v1298_v15 = vpop.f32.mrf.mxu0  ;;  %v1330_v45 = vpop.f32.mrf.mxu3  ;;  %v2826_v37 = vunpack.i.l.s16 %v1555_v42 }
 0x158   : > { %v1299_v31 = vadd.f32 %v2814_v12, %v1298_v15  ;;  %v1331_v60 = vadd.f32 %v2814_v12, %v1330_v45  ;;  %v2828_v8 = vunpack.i.l.s16 %v1384_v30 }
 0x159   : > { %v1598_v59 = vrot.slane %v2826_v37, 5  ;;  %v1581_v55 = vrot.slane %v2826_v37, 4 }
 0x15a   : > { %v1338_v22 = vmax.f32 %v1299_v31, 0.0  ;;  %v1351_v5 = vmax.f32 %v1331_v60, 0.0  ;;  %v1468_v52 = vrot.slane %v2828_v8, 5  ;;  %v1502_v53 = vrot.slane %v2828_v8, 7 }
 0x15b   : > { %v1434_v20 = vrot.slane %v2828_v8, 3  ;;  %v1451_v61 = vrot.slane %v2828_v8, 4  ;;  %v1485_v57 = vrot.slane %v2828_v8, 6 }
 0x15c   : > { %v1354_v6 = vpack.c.bf16 %v1338_v22, %v1338_v22  ;;  %v1367_v36 = vpack.c.bf16 %v1351_v5, %v1351_v5 }
 0x15e   : > { %v1378_v39 = vunpack.c.l.b16 %v1354_v6  ;;  %v1557_v3 = vunpack.c.l.b16 %v1367_v36 }
 0x15f   : > { %v1308_v4 = vpop.f32.mrf.mxu1  ;;  %v1300_v54 = vpop.f32.mrf.mxu0 }
 0x160   : > { %v1309_v16 = vadd.f32 %v2814_v12, %v1308_v4  ;;  %v1301_v24 = vadd.f32 %v2814_v12, %v1300_v54  ;;  %v2836_v47 = vunpack.i.l.s16 %v1378_v39  ;;  %v2847_v40 = vunpack.i.l.s16 %v1557_v3 }
 0x162   : > { %v1342_v32 = vmax.f32 %v1309_v16, 0.0  ;;  %v1339_v33 = vmax.f32 %v1301_v24, 0.0  ;;  %v1458_v7 = vrot.slane %v2836_v47, 3  ;;  %v1492_v35 = vrot.slane %v2836_v47, 5 }
 0x163   : > { %v1424_v0 = vrot.slane %v2836_v47, 1  ;;  %v1509_v4 = vrot.slane %v2836_v47, 6  ;;  %v1441_v19 = vrot.slane %v2836_v47, 2  ;;  %v1475_v31 = vrot.slane %v2836_v47, 4 }
 0x164   : > { %v1358_v41 = vpack.c.bf16 %v1342_v32, %v1342_v32  ;;  %v1355_v34 = vpack.c.bf16 %v1339_v33, %v1339_v33  ;;  %v1602_v21 = vrot.slane %v2847_v40, 3  ;;  %v1585_v60 = vrot.slane %v2847_v40, 2 }
 0x165   : > { %v1526_v10 = vrot.slane %v2836_v47, 7 }
 0x166   : > { %v1380_v51 = vunpack.c.l.b16 %v1358_v41  ;;  %v1551_v49 = vunpack.c.l.b16 %v1355_v34 }
 0x167   : > { %v1310_v25 = vpop.f32.mrf.mxu1 }
 0x168   : > { %v1311_v62 = vadd.f32 %v2814_v12, %v1310_v25  ;;  %v2855_v14 = vunpack.i.l.s16 %v1380_v51  ;;  %v2862_v45 = vunpack.i.l.s16 %v1551_v49 }
 0x16a   : > { %v1343_v28 = vmax.f32 %v1311_v62, 0.0  ;;  %v1461_v5 = vrot.slane %v2855_v14, 1  ;;  %v1495_v24 = vrot.slane %v2855_v14, 3  ;;  %v1426_v32 = vrot.slane %v2855_v14, 7 }
 0x16b   : > { %v1512_v62 = vrot.slane %v2855_v14, 4  ;;  %v1478_v33 = vrot.slane %v2855_v14, 2  ;;  %v1592_v39 = vrot.slane %v2862_v45, 1  ;;  %v1529_v41 = vrot.slane %v2855_v14, 5 }
 0x16c   : > { %v1359_v58 = vpack.c.bf16 %v1343_v28, %v1343_v28  ;;  %v1643_v3 = vrot.slane %v2862_v45, 4 }
 0x16e   : > { %v1553_v17 = vunpack.c.l.b16 %v1359_v58 }
 0x170   : > { %v2873_v42 = vunpack.i.l.s16 %v1553_v17 }
 0x172   : > { %v1594_v17 = vrot.slane %v2873_v42, 7 }
 0x1a5   : > { %v1323_v9 = vpop.f32.mrf.mxu2 }
 0x1a6   : > { %v1324_v1 = vadd.f32 %v2814_v12, %v1323_v9 }
 0x1a8   : > { %v1348_v15 = vmax.f32 %v1324_v1, 0.0 }
 0x1aa   : > { %v1364_v56 = vpack.c.bf16 %v1348_v15, %v1348_v15 }
 0x1ac   : > { %v1383_v26 = vunpack.c.l.b16 %v1364_v56  ;;  %v1303_v16 = vpop.f32.mrf.mxu0  ;;  %v1577_v56 = vrot.slane %v2873_v42, 6 }
 0x1ad   : > { %v1304_v6 = vadd.f32 %v2814_v12, %v1303_v16  ;;  %v1325_v30 = vpop.f32.mrf.mxu2 }
 0x1ae   : > { %v1326_v36 = vadd.f32 %v2814_v12, %v1325_v30  ;;  %v2885_v58 = vunpack.i.l.s16 %v1383_v26  ;;  %v1646_v30 = vrot.slane %v2873_v42, 2 }
 0x1af   : > { %v1340_v28 = vmax.f32 %v1304_v6, 0.0 }
 0x1b0   : > { %v1349_v9 = vmax.f32 %v1326_v36, 0.0  ;;  %v1466_v23 = vrot.slane %v2885_v58, 6  ;;  %v1432_v16 = vrot.slane %v2885_v58, 4  ;;  %v1449_v36 = vrot.slane %v2885_v58, 5 }
 0x1b1   : > { %v1356_v15 = vpack.c.bf16 %v1340_v28, %v1340_v28  ;;  %v1483_v54 = vrot.slane %v2885_v58, 7 }
 0x1b2   : > { %v1365_v6 = vpack.c.bf16 %v1349_v9, %v1349_v9  ;;  %v1518_v9 = vrot.slane %v2885_v58, 1 }
 0x1b3   : > { %v1379_v63 = vunpack.c.l.b16 %v1356_v15 }
 0x1b4   : > { %v1556_v25 = vunpack.c.l.b16 %v1365_v6  ;;  %v1305_v28 = vpop.f32.mrf.mxu0  ;;  %v1313_v11 = vpop.f32.mrf.mxu1 }
 0x1b5   : > { %v2899_v1 = vunpack.i.l.s16 %v1379_v63  ;;  %v1306_v38 = vadd.f32 %v2814_v12, %v1305_v28  ;;  %v1314_v15 = vadd.f32 %v2814_v12, %v1313_v11  ;;  %v1333_v26 = vpop.f32.mrf.mxu3 }
 0x1b6   : > { %v2904_v6 = vunpack.i.l.s16 %v1556_v25  ;;  %v1334_v49 = vadd.f32 %v2814_v12, %v1333_v26 }
 0x1b7   : > { %v1341_v50 = vmax.f32 %v1306_v38, 0.0  ;;  %v1344_v63 = vmax.f32 %v1314_v15, 0.0  ;;  %v1459_v28 = vrot.slane %v2899_v1, 2  ;;  %v1493_v11 = vrot.slane %v2899_v1, 4 }
 0x1b8   : > { %v1352_v13 = vmax.f32 %v1334_v49, 0.0  ;;  %v1425_v25 = vsel %vm1403_vm12, %v2899_v1, %v1424_v0  ;;  %v1510_v26 = vrot.slane %v2899_v1, 5  ;;  %v1442_v34 = vrot.slane %v2899_v1, 1 }
 0x1b9   : > { %v1357_v22 = vpack.c.bf16 %v1341_v50, %v1341_v50  ;;  %v1360_v48 = vpack.c.bf16 %v1344_v63, %v1344_v63  ;;  %v1460_v38 = vsel %vm1403_vm12, %v1459_v28, %v1458_v7  ;;  %v1494_v49 = vsel %vm1403_vm12, %v1493_v11, %v1492_v35 }
 0x1ba   : > { %v1368_v15 = vpack.c.bf16 %v1352_v13, %v1352_v13  ;;  %v1462_v51 = vsel %vm1406_vm13, %v1461_v5, %v1460_v38  ;;  %v1496_v0 = vsel %vm1406_vm13, %v1495_v24, %v1494_v49  ;;  %v1427_v50 = vsel %vm1406_vm13, %v1426_v32, %v1425_v25 }
 0x1bb   : > { %v1552_v63 = vunpack.c.l.b16 %v1357_v22  ;;  %v1381_v27 = vunpack.c.l.b16 %v1360_v48  ;;  %v1511_v7 = vsel %vm1403_vm12, %v1510_v26, %v1509_v4  ;;  %v1443_v13 = vsel %vm1403_vm12, %v1442_v34, %v1441_v19 }
 0x1bc   : > { %v1385_v35 = vunpack.c.l.b16 %v1368_v15  ;;  %v1315_v28 = vpop.f32.mrf.mxu1  ;;  %v1513_v5 = vsel %vm1406_vm13, %v1512_v62, %v1511_v7  ;;  %v1444_v24 = vsel %vm1406_vm13, %v2855_v14, %v1443_v13  ;;  %v1476_v22 = vrot.slane %v2899_v1, 3 }
 0x1bd   : > { %v2942_v48 = vunpack.i.l.s16 %v1552_v63  ;;  %v2944_v32 = vunpack.i.l.s16 %v1381_v27  ;;  %v1316_v4 = vadd.f32 %v2814_v12, %v1315_v28  ;;  %v1335_v11 = vpop.f32.mrf.mxu3  ;;  %v1600_v19 = vrot.slane %v2904_v6, 4 }
 0x1be   : > { %v2948_v34 = vunpack.i.l.s16 %v1385_v35  ;;  %v1336_v25 = vadd.f32 %v2814_v12, %v1335_v11  ;;  %v1477_v62 = vsel %vm1403_vm12, %v1476_v22, %v1475_v31  ;;  %v1583_v26 = vrot.slane %v2904_v6, 3 }
 0x1bf   : > { %v1345_v38 = vmax.f32 %v1316_v4, 0.0  ;;  %v1463_v27 = vsel %vm1409_vm14, %v2944_v32, %v1462_v51  ;;  %v1497_v49 = vrot.slane %v2944_v32, 2  ;;  %v1428_v15 = vrot.slane %v2944_v32, 6 }
 0x1c0   : > { %v1353_v63 = vmax.f32 %v1336_v25, 0.0  ;;  %v1465_v7 = vsel %vm1412_vm15, %v1464_v43, %v1463_v27  ;;  %v1470_v12 = vrot.slane %v2948_v34, 4  ;;  %v1504_v13 = vrot.slane %v2948_v34, 6 }
 0x1c1   : > { %v1361_v31 = vpack.c.bf16 %v1345_v38, %v1345_v38  ;;  %v1467_v35 = vsel %vm1415_vm0, %v1466_v23, %v1465_v7  ;;  %v1498_v28 = vsel %vm1409_vm14, %v1497_v49, %v1496_v0  ;;  %v1429_v51 = vsel %vm1409_vm14, %v1428_v15, %v1427_v50 }
 0x1c2   : > { %v1369_v22 = vpack.c.bf16 %v1353_v63, %v1353_v63  ;;  %v1469_v4 = vsel %vm1418_vm1, %v1468_v52, %v1467_v35  ;;  %v1500_v43 = vsel %vm1412_vm15, %v1499_v18, %v1498_v28  ;;  %v1431_v11 = vsel %vm1412_vm15, %v1430_v44, %v1429_v51 }
 0x1c3   : > { %v1554_v25 = vunpack.c.l.b16 %v1361_v31  ;;  %v1471_v23 = vsel %vm1421_vm3, %v1470_v12, %v1469_v4  ;;  %v1501_v0 = vsel %vm1415_vm0, %v2885_v58, %v1500_v43  ;;  %v1433_v50 = vsel %vm1415_vm0, %v1432_v16, %v1431_v11 }
 0x1c4   : > { %v1558_v38 = vunpack.c.l.b16 %v1369_v22  ;;  %v1472_v52 = vpack.c.b16 %v1471_v23, %v1471_v23  ;;  %v1503_v18 = vsel %vm1418_vm1, %v1502_v53, %v1501_v0  ;;  %v1435_v44 = vsel %vm1418_vm1, %v1434_v20, %v1433_v50 }
 0x1c5   : > { %v2988_v27 = vunpack.i.l.s16 %v1554_v25  ;;  %v1505_v49 = vsel %vm1421_vm3, %v1504_v13, %v1503_v18  ;;  %v1436_v15 = vrot.slane %v2948_v34, 2  ;;  %v1514_v63 = vrot.slane %v2944_v32, 3 }
 0x1c6   : > { %v2993_v7 = vunpack.i.l.s16 %v1558_v38  ;;  %1473 = vrot.lane.b32.xlu0 %v1472_v52, %s2244_s25  ;;  %v1506_v16 = vpack.c.b16 %v1505_v49, %v1505_v49  ;;  %v1521_v12 = vrot.slane %v2948_v34, 7  ;;  %v1445_v53 = vrot.slane %v2944_v32, 7  ;;  %s2252_s25 = smov 72  }
 0x1c7   : > { %v1437_v31 = vsel %vm1421_vm3, %v1436_v15, %v1435_v44  ;;  %v1515_v20 = vsel %vm1409_vm14, %v1514_v63, %v1513_v5  ;;  %v1453_v35 = vrot.slane %v2948_v34, 3  ;;  %v1479_v13 = vsel %vm1406_vm13, %v1478_v33, %v1477_v62 }
 0x1c8   : > { %1507 = vrot.lane.b32.xlu2 %v1506_v16, %s2248_s29  ;;  %v1438_v28 = vpack.c.b16 %v1437_v31, %v1437_v31  ;;  %v1517_v51 = vsel %vm1412_vm15, %v1516_v46, %v1515_v20  ;;  %v1446_v22 = vsel %vm1409_vm14, %v1445_v53, %v1444_v24  ;;  %v1480_v4 = vrot.slane %v2944_v32, 1  ;;  %s2256_s29 = smov 120  }
 0x1c9   : > { %v1519_v5 = vsel %vm1415_vm0, %v1518_v9, %v1517_v51  ;;  %v1448_v43 = vsel %vm1412_vm15, %v1447_v2, %v1446_v22  ;;  %v1487_v33 = vrot.slane %v2948_v34, 5  ;;  %v1593_v62 = vsel %vm1403_vm12, %v2942_v48, %v1592_v39 }
 0x1ca   : > { %1439 = vrot.lane.b32.xlu1 %v1438_v28, %s2246_s27  ;;  %v1520_v46 = vsel %vm1418_vm1, %v2828_v8, %v1519_v5  ;;  %v1450_v9 = vsel %vm1415_vm0, %v1449_v36, %v1448_v43  ;;  %v1481_v24 = vsel %vm1409_vm14, %v1480_v4, %v1479_v13  ;;  %v1595_v2 = vsel %vm1406_vm13, %v1594_v17, %v1593_v62  ;;  %s2254_s27 = smov 88  }
 0x1cb   : > { %v1522_v11 = vsel %vm1421_vm3, %v1521_v12, %v1520_v46  ;;  %v1452_v39 = vsel %vm1418_vm1, %v1451_v61, %v1450_v9  ;;  %v1482_v25 = vsel %vm1412_vm15, %v2823_v29, %v1481_v24  ;;  %v1596_v23 = vrot.slane %v2988_v27, 6 }
 0x1cc   : > { %v1523_v0 = vpack.c.b16 %v1522_v11, %v1522_v11  ;;  %v1454_v36 = vsel %vm1421_vm3, %v1453_v35, %v1452_v39  ;;  %v1484_v50 = vsel %vm1415_vm0, %v1483_v54, %v1482_v25  ;;  %v1604_v17 = vrot.slane %v2993_v7, 2 }
 0x1cd   : > { %v1455_v38 = vpack.c.b16 %v1454_v36, %v1454_v36  ;;  %v1486_v52 = vsel %vm1418_vm1, %v1485_v57, %v1484_v50  ;;  %v1597_v61 = vsel %vm1409_vm14, %v1596_v23, %v1595_v2  ;;  %v1575_v18 = vrot.slane %v2942_v48, 7 }
 0x1ce   : > { %1524 = vrot.lane.b32.xlu0 %v1523_v0, %s2249_s30  ;;  %v1488_v44 = vsel %vm1421_vm3, %v1487_v33, %v1486_v52  ;;  %v1599_v49 = vsel %vm1412_vm15, %v1598_v59, %v1597_v61  ;;  %v1579_v54 = vrot.slane %v2988_v27, 5  ;;  %v1587_v15 = vrot.slane %v2993_v7, 1  ;;  %s2257_s30 = smov 112  }
 0x1cf   : > { %v1489_v63 = vpack.c.b16 %v1488_v44, %v1488_v44  ;;  %v1601_v57 = vsel %vm1415_vm0, %v1600_v19, %v1599_v49  ;;  %v1576_v16 = vsel %vm1403_vm12, %v1575_v18, %v2862_v45  ;;  %v1527_v12 = vrot.slane %v2899_v1, 6 }
 0x1d0   : > { %1456 = vrot.lane.b32.xlu2 %v1455_v38, %s2245_s26  ;;  %v1603_v59 = vsel %vm1418_vm1, %v1602_v21, %v1601_v57  ;;  %v1578_v53 = vsel %vm1406_vm13, %v1577_v56, %v1576_v16  ;;  %v1531_v31 = vrot.slane %v2944_v32, 4  ;;  %v1644_v20 = vrot.slane %v2942_v48, 3  ;;  %s2253_s26 = smov 96  }
 0x1d1   : > { %v1605_v19 = vsel %vm1421_vm3, %v1604_v17, %v1603_v59  ;;  %v1580_v35 = vsel %vm1409_vm14, %v1579_v54, %v1578_v53  ;;  %v1528_v13 = vsel %vm1403_vm12, %v1527_v12, %v1526_v10  ;;  %v1648_v28 = vrot.slane %v2988_v27, 1 }
 0x1d2   : > { %1490 = vrot.lane.b32.xlu1 %v1489_v63, %s2247_s28  ;;  %v1606_v21 = vpack.c.b16 %v1605_v19, %v1605_v19  ;;  %v1582_v56 = vsel %vm1412_vm15, %v1581_v55, %v1580_v35  ;;  %v1530_v51 = vsel %vm1406_vm13, %v1529_v41, %v1528_v13  ;;  %v1645_v22 = vsel %vm1403_vm12, %v1644_v20, %v1643_v3  ;;  %s2255_s28 = smov 80  }
 0x1d3   : > { %v1584_v10 = vsel %vm1415_vm0, %v1583_v26, %v1582_v56  ;;  %v1532_v4 = vsel %vm1409_vm14, %v1531_v31, %v1530_v51  ;;  %v1647_v5 = vsel %vm1406_vm13, %v1646_v30, %v1645_v22  ;;  %v1651_v55 = vrot.slane %v2904_v6, 7 }
 0x1d4   : > { %v1586_v41 = vsel %vm1418_vm1, %v1585_v60, %v1584_v10  ;;  %v3260_v43 = vrot.slane %v2823_v29, 3  ;;  %v1649_v33 = vsel %vm1409_vm14, %v1648_v28, %v1647_v5  ;;  %v1655_v26 = vrot.slane %v2993_v7, 5 }
 0x1d5   : > { %v1588_v62 = vsel %vm1421_vm3, %v1587_v15, %v1586_v41  ;;  %v3261_v46 = vrot.slane %v2885_v58, 2  ;;  %v1650_v9 = vsel %vm1412_vm15, %v2826_v37, %v1649_v33  ;;  %v1627_v24 = vrot.slane %v2942_v48, 2 }
 0x1d6   : > { %v1534_v3 = vsel %vm1412_vm15, %v3260_v43, %v1532_v4  ;;  %1607 = vrot.lane.b32.xlu0 %v1606_v21, %s2252_s25  ;;  %v1589_v60 = vpack.c.b16 %v1588_v62, %v1588_v62  ;;  %v3262_v2 = vrot.slane %v2828_v8, 1  ;;  %v1652_v39 = vsel %vm1415_vm0, %v1651_v55, %v1650_v9 }
 0x1d7   : > { %v1536_v30 = vsel %vm1415_vm0, %v3261_v46, %v1534_v3  ;;  %v1634_v25 = vrot.slane %v2904_v6, 6  ;;  %v3263_v0 = vrot.slane %v2847_v40, 6  ;;  %v3264_v50 = vrot.slane %v2862_v45, 3 }
 0x1d8   : > { %v1538_v11 = vsel %vm1418_vm1, %v3262_v2, %v1536_v30  ;;  %v1638_v38 = vrot.slane %v2993_v7, 4  ;;  %1590 = vrot.lane.b32.xlu2 %v1589_v60, %s2251_s5  ;;  %v3265_v18 = vrot.slane %v2873_v42, 1  ;;  %v1610_v49 = vrot.slane %v2942_v48, 1  ;;  %s1879_s5 = sshll.u32 %s3291_s13, 1 }
 0x1d9   : > { %v1539_v23 = vsel %vm1421_vm3, %v2948_v34, %v1538_v11  ;;  %v1654_v36 = vsel %vm1418_vm1, %v3263_v0, %v1652_v39  ;;  %v1628_v17 = vsel %vm1403_vm12, %v1627_v24, %v3264_v50  ;;  %v1613_v63 = vrot.slane %v2988_v27, 7  ;;  %s226_s6 = sadd.s32 %s1879_s5, %s3293_s12 }
 0x1da   : > { %v1540_v52 = vpack.c.b16 %v1539_v23, %v1539_v23  ;;  %v1656_v61 = vsel %vm1421_vm3, %v1655_v26, %v1654_v36  ;;  %v1630_v44 = vsel %vm1406_vm13, %v3265_v18, %v1628_v17  ;;  %v1617_v57 = vrot.slane %v2904_v6, 5  ;;  %s1880_s7 = sshll.u32 %s226_s6, 2 }
 0x1db   : > { %v1657_v54 = vpack.c.b16 %v1656_v61, %v1656_v61  ;;  %v1631_v15 = vsel %vm1409_vm14, %v2988_v27, %v1630_v44  ;;  %v3266_v16 = vrot.slane %v2826_v37, 7  ;;  %v3267_v59 = vrot.slane %v2862_v45, 2  ;;  %s228_s10 = scalar_lea.vmem %s3259_s3, %s1880_s7 }
 0x1dc   : > { %1541 = vrot.lane.b32.xlu1 %v1540_v52, %s2250_s4  ;;  %v1621_v31 = vrot.slane %v2993_v7, 3  ;;  %v1695_v20 = vrot.slane %v2942_v48, 6  ;;  %v1699_v13 = vrot.slane %v2988_v27, 4  ;;  %v1703_v28 = vrot.slane %v2904_v6, 2  ;;  %s2258_s4 = smov 104  }
 0x1dd   : > { %v1633_v12 = vsel %vm1412_vm15, %v3266_v16, %v1631_v15  ;;  %v1611_v53 = vsel %vm1403_vm12, %v1610_v49, %v3267_v59  ;;  %v3268_v21 = vrot.slane %v2847_v40, 5  ;;  %v3269_v22 = vrot.slane %v2862_v45, 7 }
 0x1de   : > { %v1635_v19 = vsel %vm1415_vm0, %v1634_v25, %v1633_v12  ;;  %v1612_v35 = vsel %vm1406_vm13, %v2873_v42, %v1611_v53  ;;  %v1678_v4 = vrot.slane %v2942_v48, 5  ;;  %v3270_v55 = vrot.slane %v2826_v37, 6  ;;  %1658 = vrot.lane.b32.xlu0 %v1657_v54, %s2253_s26 }
 0x1df   : > { %v1637_v56 = vsel %vm1418_vm1, %v3268_v21, %v1635_v19  ;;  %v1614_v51 = vsel %vm1409_vm14, %v1613_v63, %v1612_v35  ;;  %v1696_v10 = vsel %vm1403_vm12, %v1695_v20, %v3269_v22  ;;  %v3271_v43 = vrot.slane %v2873_v42, 5 }
 0x1e0   : > { %v1639_v5 = vsel %vm1421_vm3, %v1638_v38, %v1637_v56  ;;  %v1616_v41 = vsel %vm1412_vm15, %v3270_v55, %v1614_v51  ;;  %v1682_v33 = vrot.slane %v2988_v27, 3  ;;  %v3272_v30 = vrot.slane %v2862_v45, 6 }
 0x1e1   : > { %v1698_v3 = vsel %vm1406_vm13, %v3271_v43, %v1696_v10  ;;  %v1640_v26 = vpack.c.b16 %v1639_v5, %v1639_v5  ;;  %v1618_v62 = vsel %vm1415_vm0, %v1617_v57, %v1616_v41  ;;  %v3273_v24 = vrot.slane %v2847_v40, 4 }
 0x1e2   : > { %v1700_v46 = vsel %vm1409_vm14, %v1699_v13, %v1698_v3  ;;  %v1679_v9 = vsel %vm1403_vm12, %v1678_v4, %v3272_v30  ;;  %v3274_v2 = vrot.slane %v2826_v37, 3  ;;  %v3275_v39 = vrot.slane %v2873_v42, 4 }
 0x1e3   : > { %v1620_v60 = vsel %vm1418_vm1, %v3273_v24, %v1618_v62  ;;  %v1663_v23 = vrot.slane %v2873_v42, 3  ;;  %1641 = vrot.lane.b32.xlu2 %v1640_v26, %s2254_s27  ;;  %v1686_v17 = vrot.slane %v2904_v6, 1  ;;  %v3276_v52 = vrot.slane %v2847_v40, 1 }
 0x1e4   : > { %v1702_v11 = vsel %vm1412_vm15, %v3274_v2, %v1700_v46  ;;  %v1681_v25 = vsel %vm1406_vm13, %v3275_v39, %v1679_v9  ;;  %v1622_v0 = vsel %vm1421_vm3, %v1621_v31, %v1620_v60  ;;  %v3277_v18 = vrot.slane %v2826_v37, 2 }
 0x1e5   : > { %v1704_v36 = vsel %vm1415_vm0, %v1703_v28, %v1702_v11  ;;  %v1683_v50 = vsel %vm1409_vm14, %v1682_v33, %v1681_v25  ;;  %v1623_v38 = vpack.c.b16 %v1622_v0, %v1622_v0  ;;  %v1661_v42 = vrot.slane %v2942_v48, 4 }
 0x1e6   : > { %v1706_v61 = vsel %vm1418_vm1, %v3276_v52, %v1704_v36  ;;  %v1685_v44 = vsel %vm1412_vm15, %v3277_v18, %v1683_v50  ;;  %v1689_v15 = vrot.slane %v2993_v7, 7  ;;  %v1665_v63 = vrot.slane %v2988_v27, 2 }
 0x1e7   : > { %v1707_v49 = vsel %vm1421_vm3, %v2993_v7, %v1706_v61  ;;  %v1687_v54 = vsel %vm1415_vm0, %v1686_v17, %v1685_v44  ;;  %1624 = vrot.lane.b32.xlu1 %v1623_v38, %s2255_s28  ;;  %v3278_v16 = vrot.slane %v2862_v45, 5  ;;  %v1402_v48 = vrot.slane %v2899_v1, 7 }
 0x1e8   : > { %v1688_v57 = vsel %vm1418_vm1, %v2847_v40, %v1687_v54  ;;  %v1405_v59 = vrot.slane %v2855_v14, 6  ;;  %v1708_v53 = vpack.c.b16 %v1707_v49, %v1707_v49  ;;  %v1408_v27 = vrot.slane %v2944_v32, 5 }
 0x1e9   : > { %v1662_v12 = vsel %vm1403_vm12, %v1661_v42, %v3278_v16  ;;  %v1690_v31 = vsel %vm1421_vm3, %v1689_v15, %v1688_v57  ;;  %v1404_v35 = vsel %vm1403_vm12, %v1402_v48, %v2836_v47  ;;  %v1411_v45 = vrot.slane %v2823_v29, 4 }
 0x1ea   : > { %v1664_v20 = vsel %vm1406_vm13, %v1663_v23, %v1662_v12  ;;  %1709 = vrot.lane.b32.xlu0 %v1708_v53, %s2256_s29  ;;  %v1691_v13 = vpack.c.b16 %v1690_v31, %v1690_v31  ;;  %v3279_v1 = vrot.slane %v2826_v37, 1  ;;  %v1670_v28 = vrot.slane %v2847_v40, 7 }
 0x1eb   : > { %v1666_v19 = vsel %vm1409_vm14, %v1665_v63, %v1664_v20  ;;  %v1407_v21 = vsel %vm1406_vm13, %v1405_v59, %v1404_v35  ;;  %v1672_v56 = vrot.slane %v2993_v7, 6  ;;  %v1414_v29 = vrot.slane %v2885_v58, 3 }
 0x1ec   : > { %v1668_v14 = vsel %vm1412_vm15, %v3279_v1, %v1666_v19  ;;  %v1410_v47 = vsel %vm1409_vm14, %v1408_v27, %v1407_v21  ;;  %1692 = vrot.lane.b32.xlu2 %v1691_v13, %s2257_s30  ;;  %v1417_v22 = vrot.slane %v2828_v8, 2 }
 0x1ed   : > { %v1669_v32 = vsel %vm1415_vm0, %v2904_v6, %v1668_v14  ;;  %v1413_v37 = vsel %vm1412_vm15, %v1411_v45, %v1410_v47  ;;  %v1420_v6 = vrot.slane %v2948_v34, 1 }
 0x1ee   : > { %v1671_v51 = vsel %vm1418_vm1, %v1670_v28, %v1669_v32  ;;  %v1416_v10 = vsel %vm1415_vm0, %v1414_v29, %v1413_v37 }
 0x1ef   : > { %v1673_v40 = vsel %vm1421_vm3, %v1672_v56, %v1671_v51  ;;  %v1419_v7 = vsel %vm1418_vm1, %v1417_v22, %v1416_v10 }
 0x1f0   : > { %v1674_v4 = vpack.c.b16 %v1673_v40, %v1673_v40  ;;  %v1422_v5 = vsel %vm1421_vm3, %v1420_v6, %v1419_v7 }
 0x1f1   : > { %v1423_v3 = vpack.c.b16 %v1422_v5, %v1422_v5 }
 0x1f2   : > { %1675 = vrot.lane.b32.xlu1 %v1674_v4, %s2258_s4 }
 0x222   : > { %v1508_v58 = vpop.permute.xlu2 %1507 }
 0x22a   : > { %v1457_v43 = vpop.permute.xlu2 %1456 }
 0x232   : > { %v1591_v30 = vpop.permute.xlu2 %1590 }
 0x238   : > { %v1474_v55 = vpop.permute.xlu0 %1473 }
 0x23c   : > { %v1440_v41 = vpop.permute.xlu1 %1439 }
 0x23d   : > { %v1713_v33 = vsel %vm1092_vm2, %v1423_v3, %v1440_v41  ;;  %v1642_v25 = vpop.permute.xlu2 %1641  ;;  %vm1730_vm2 = vcmask 654336  }
 0x23e   : > { %v1715_v34 = vsel %vm1109_vm4, %v1713_v33, %v1457_v43  ;;  %vm1733_vm4 = vcmask 719872  }
 0x23f   : > { %v1717_v62 = vsel %vm1126_vm5, %v1715_v34, %v1474_v55  ;;  %vm1736_vm5 = vcmask 785408  }
 0x240   : > { %v1525_v8 = vpop.permute.xlu0 %1524 }
 0x244   : > { %v1491_v26 = vpop.permute.xlu1 %1490 }
 0x245   : > { %v1719_v46 = vsel %vm1143_vm6, %v1717_v62, %v1491_v26  ;;  %vm1739_vm6 = vcmask 850944  }
 0x246   : > { %v1721_v60 = vsel %vm1160_vm7, %v1719_v46, %v1508_v58  ;;  %vm1742_vm7 = vcmask 916480   ;;  %v1693_v61 = vpop.permute.xlu2 %1692 }
 0x247   : > { %v1723_v2 = vsel %vm1177_vm8, %v1721_v60, %v1525_v8  ;;  %vm1745_vm8 = vcmask 982016  }
 0x248   : > { %v1608_v9 = vpop.permute.xlu0 %1607 }
 0x24e   : > { %v1542_v24 = vpop.permute.xlu1 %1541 }
 0x24f   : > { %v1725_v11 = vsel %vm1194_vm9, %v1723_v2, %v1542_v24 }
 0x250   : > { %v1727_v39 = vsel %vm1211_vm10, %v1725_v11, %v1591_v30  ;;  %v1659_v0 = vpop.permute.xlu0 %1658 }
 0x251   : > { %v1729_v36 = vsel %vm1268_vm11, %v1727_v39, %v1608_v9 }
 0x259   : > { %v1625_v23 = vpop.permute.xlu1 %1624 }
 0x25a   : > { %v1732_v50 = vsel %vm1730_vm2, %v1729_v36, %v1625_v23 }
 0x25b   : > { %v1735_v17 = vsel %vm1733_vm4, %v1732_v50, %v1642_v25 }
 0x25c   : > { %v1738_v52 = vsel %vm1736_vm5, %v1735_v17, %v1659_v0  ;;  %v1710_v44 = vpop.permute.xlu0 %1709 }
 0x264   : > { %v1676_v38 = vpop.permute.xlu1 %1675 }
 0x265   : > { %v1741_v18 = vsel %vm1739_vm6, %v1738_v52, %v1676_v38 }
 0x266   : > { %v1744_v42 = vsel %vm1742_vm7, %v1741_v18, %v1693_v61 }
 0x267   : > { %v1747_v49 = vsel %vm1745_vm8, %v1744_v42, %v1710_v44 }
 0x268   : > { %1749 = vst [vmem:[%s228_s10] sm:$0xf] %v1747_v49 }
 0x269 PF: > { %s13_s16 = sadd.s32 1, %s2242_s16   ;;  %s3280_s12 = smov %s2234_s14 }
 0x26a   : > { %p10_p7 = scmp.ge.s32.totalorder %s13_s16, 6   ;;  %s3281_s13 = smov %s2238_s15 }
 0x26b   : > { %s3282_s14 = smov %s3285_s17  ;;  %s3283_s15 = smov %s3289_s18 }
 0x26c   :  { %12 = sbr.rel (!%p10_p7) target bundleno = 3 (0x3), region = 71 }

// kernel: a_call__.5
= control target key start
LH: loop header
LB: loop body
LE: loop exit
PB: predicated region body
PF: predicated region fallthrough
CT: control target
= control target key end

     0   :  { %s2182_s12 = smov 0   ;;  %s2184_s13 = smov 0   ;;  %s3147_s0 = inlined_call_operand.vmem [shape: bf16[2,18,18,8], index: 0, kind: input, shape index: {}]   ;;  %s3148_s1 = inlined_call_operand.vmem [shape: bf16[72,8], index: 1, kind: input, shape index: {}]   ;;  %s3149_s2 = inlined_call_operand.vmem [shape: f32[1,1,8], index: 2, kind: input, shape index: {}]   ;;  %s3150_s3 = inlined_call_operand.vmem [shape: f32[2,16,128], index: 3, kind: output, shape index: {}]  }
   0x1   :  { %s2186_s14 = smov 0   ;;  %s2188_s15 = smov 0  }
   0x2   :  { %s2190_s16 = smov 0  }
   0x3 LB: > { %s25_s17 = sadd.s32 1, %s2137_s14  ;;  %s32_s18 = sadd.s32 1, %s2141_s15  ;;  %s2145_s16 = sphi %s2190_s16, %s13_s16   ;;  %s2141_s15 = sphi %s2188_s15, %s3175_s15   ;;  %s2137_s14 = sphi %s2186_s14, %s3174_s14   ;;  %s2133_s13 = sphi %s2184_s13, %s3173_s13   ;;  %s2129_s12 = sphi %s2182_s12, %s3172_s12  }
   0x4   : > { %p26_p0 = scmp.ge.s32.totalorder %s25_s17, 2  ;;  %p1796_p1 = scmp.ge.s32.totalorder %s2145_s16, 1 }
   0x5   : > { %p175_p2 = scmp.lt.s32.totalorder %s2145_s16, 5 }
   0x6   : > { %s3177_s17 = smov (%p26_p0, %s25_s17), 0  ;;  %s3179_s18 = smov (!%p26_p0, %s32_s18), %s2141_s15 }
   0x7   : > { %p176_p3 = pnand %p1796_p1, %p175_p2  ;;  %p34_p4 = scmp.ge.s32.totalorder %s3179_s18, 2 }
   0x8   : > { %p209_p5 = scmp.lt.s32.totalorder (!%p176_p3), %s2133_s13, 1  ;;  %s1897_s19 = smul.u32 (!%p176_p3), 96, %s2129_s12 }
   0x9   : > { %s3181_s18 = smov (%p34_p4, %s3179_s18), 0  ;;  %179 = sbr.rel (%p176_p3) target bundleno = 603 (0x25b), region = 32 }
   0xa   : > { %s2147_s25 = smov (!%p176_p3), 24   ;;  %s2148_s26 = smov (!%p176_p3), 16  }
   0xb   : > { %s2149_s27 = smov (!%p176_p3), 8   ;;  %s2150_s28 = smov (!%p176_p3), 32  }
   0xc   : > { %s2151_s29 = smov (!%p176_p3), 40   ;;  %s2152_s30 = smov (!%p176_p3), 48  }
   0xd   : > { %s2153_s4 = smov (!%p176_p3), 56   ;;  %s2154_s5 = smov (!%p176_p3), 64  }
   0xe   : > { %s3183_s13 = smov (!%p209_p5, %s2133_s13), 1  ;;  %vm539_vm0 = vcmask 1046528   ;;  %vm402_vm1 = vsmask.f32 7424  ;;  %vm1092_vm2 = vcmask 64512   ;;  %vm1285_vm3 = vcmask 1043456  }
   0xf   : > { %s2012_s20 = smul.u32 216, %s3183_s13  ;;  %vm1109_vm4 = vcmask 130048   ;;  %vm1126_vm5 = vcmask 195584   ;;  %vm1143_vm6 = vcmask 261120   ;;  %vm1160_vm7 = vcmask 326656   ;;  %p223_p6 = scmp.lt.s32.totalorder %s2129_s12, 1 }
  0x10   : > { %vm1177_vm8 = vcmask 392192   ;;  %vm1194_vm9 = vcmask 457728   ;;  %vm1211_vm10 = vcmask 523264   ;;  %vm1268_vm11 = vcmask 588800  }
  0x11   : > { %s213_s23 = scalar_lea.vmem %s3147_s0, %s2012_s20  ;;  %vm1363_vm12 = vcmask 1041409   ;;  %vm1366_vm13 = vcmask 1042434   ;;  %vm1369_vm14 = vcmask 1043459   ;;  %vm1372_vm15 = vcmask 1044484   ;;  %s3185_s12 = smov (!%p223_p6, %s2129_s12), 1 }
  0x12   : > { %s2221_s24 = scalar_lea.vmem %s213_s23, %s1897_s19 }
  0x13   : > { %v1967_v0 = vld [vmem:[%s2221_s24 + $0x30] sm:$0xf0]  ;;  %v254_v1 = vld [vmem:[%s2221_s24 + $0x38] sm:$0x1]  ;;  %v1968_v2 = vld [vmem:[%s2221_s24 + $0x30] sm:$0xe] }
  0x14   : > { %v390_v3 = vunpack.c.l.b16 %v254_v1  ;;  %v1969_v4 = vor.u32 %v1968_v2, %v1967_v0  ;;  %v2227_v5 = vld [vmem:[%s2221_s24] sm:$0xff]   ;;  %v250_v6 = vld [vmem:[%s2221_s24 + $0x8] sm:$0x1]  ;;  %v1970_v12 = vld [vmem:[%s2221_s24 + $0x48] sm:$0xf0] }
  0x15   : > { %v2231_v7 = vld [vmem:[%s2221_s24 + $0x3c] sm:$0xff]   ;;  %v386_v9 = vunpack.c.l.b16 %v250_v6  ;;  %v404_v10 = vshrl.u32 %v2227_v5, 16  ;;  %v406_v11 = vshll.u32 %v2227_v5, 16  ;;  %v256_v13 = vld [vmem:[%s2221_s24 + $0x50] sm:$0x1]  ;;  %v2244_v18 = vld [vmem:[%s2221_s24 + $0x48] sm:$0xff]  }
  0x16   : > { %v2234_v8 = vld [vmem:[%s2221_s24 + $0x3c] sm:$0xf0]  ;;  %v2240_v14 = vpack.c.b16 %v390_v3, %v390_v3  ;;  %v552_v15 = vrot.slane %v1969_v4, 1  ;;  %v1971_v16 = vld [vmem:[%s2221_s24 + $0x48] sm:$0xe]  ;;  %v392_v17 = vunpack.c.l.b16 %v256_v13  ;;  %v478_v26 = vshll.u32 %v2244_v18, 16  ;;  %628 = vrot.lane.b32.xlu2 %v2231_v7, %s2147_s25 }
  0x17   : > { %v1961_v19 = vld [vmem:[%s2221_s24] sm:$0xf0]  ;;  %v394_v20 = vpack.c.b16 %v386_v9, %v386_v9  ;;  %v408_v21 = vrot.slane %v406_v11, 1  ;;  %v1972_v22 = vor.u32 %v1971_v16, %v1970_v12  ;;  %v1962_v23 = vld [vmem:[%s2221_s24] sm:$0xe]  ;;  %v476_v29 = vshrl.u32 %v2244_v18, 16 }
  0x18   : > { %v553_v24 = vrot.slane %v2240_v14, 1  ;;  %v400_v25 = vpack.c.b16 %v392_v17, %v392_v17  ;;  %v1963_v30 = vor.u32 %v1962_v23, %v1961_v19  ;;  %v2252_v31 = vld [vmem:[%s2221_s24 + $0x30] sm:$0xff]   ;;  %v480_v35 = vrot.slane %v478_v26, 1  ;;  %v1825_v40 = vld [vmem:[%s2221_s24 + $0x44] sm:$0x1]  ;;  %v2264_v45 = vld [vmem:[%s2221_s24 + $0x18] sm:$0xff]  }
  0x19   : > { %v409_v27 = vor.u32 %v408_v21, %v404_v10  ;;  %v411_v28 = vshll.u32 %v394_v20, 16  ;;  %v558_v33 = vrot.slane %v1972_v22, 1  ;;  %v541_v39 = vrot.slane %v394_v20, 1  ;;  %v252_v42 = vld [vmem:[%s2221_s24 + $0x20] sm:$0x1]  ;;  %v1817_v63 = vld [vmem:[%s2221_s24 + $0x54] sm:$0xff]  }
  0x1a   : > { %v554_v32 = vsel %vm539_vm0, %v552_v15, %v553_v24  ;;  %v559_v34 = vrot.slane %v400_v25, 1  ;;  %v483_v37 = vshll.u32 %v400_v25, 16  ;;  %v540_v38 = vrot.slane %v1963_v30, 1  ;;  %v2072_v58 = vld [vmem:[%s2221_s24 + $0x3c] sm:$0xe]  ;;  %v1805_v10 = vld [vmem:[%s2221_s24 + $0xc] sm:$0xff]  }
  0x1b   : > { %572 = vrot.lane.b32.xlu0 %v554_v32, %s2148_s26  ;;  %v413_v36 = vrot.slane %v411_v28, 1  ;;  %v454_v41 = vshll.u32 %v2252_v31, 16  ;;  %v711_v44 = vshll.u32 %v2231_v7, 16  ;;  %v2268_v47 = vor.u32 %v480_v35, %v476_v29  ;;  %v2282_v0 = vld [vmem:[%s2221_s24 + $0x54] sm:$0xf0] }
  0x1c   : > { %v560_v46 = vsel %vm539_vm0, %v558_v33, %v559_v34  ;;  %v452_v48 = vshrl.u32 %v2252_v31, 16  ;;  %v648_v49 = vunpack.c.l.b16 %v1825_v40  ;;  %v485_v50 = vrot.slane %v483_v37, 1  ;;  %v2074_v11 = vld [vmem:[%s2221_s24 + $0xc] sm:$0xf0]  ;;  %v1827_v12 = vld [vmem:[%s2221_s24 + $0x5c] sm:$0x1] }
  0x1d   : > { %v414_v43 = vsel %vm402_vm1, %v409_v27, %v413_v36  ;;  %v542_v51 = vsel %vm539_vm0, %v540_v38, %v541_v39  ;;  %v459_v52 = vshll.u32 %v2240_v14, 16  ;;  %v388_v53 = vunpack.c.l.b16 %v252_v42  ;;  %v1821_v17 = vld [vmem:[%s2221_s24 + $0x14] sm:$0x1]  ;;  %v1964_v27 = vld [vmem:[%s2221_s24 + $0x18] sm:$0xf0]  ;;  %v1809_v39 = vld [vmem:[%s2221_s24 + $0x24] sm:$0xff]  }
  0x1e   : > { %499 = vrot.lane.b32.xlu1 %v414_v43, %s2149_s27  ;;  %v456_v54 = vrot.slane %v454_v41, 1  ;;  %v656_v55 = vpack.c.b16 %v648_v49, %v648_v49  ;;  %v428_v56 = vshrl.u32 %v2264_v45, 16  ;;  %v430_v57 = vshll.u32 %v2264_v45, 16  ;;  %564 = vrot.lane.b32.xlu2 %v542_v51, %s2148_s26  ;;  %v2075_v36 = vld [vmem:[%s2221_s24 + $0xc] sm:$0xe] }
  0x1f   : > { %v2276_v59 = vpack.c.b16 %v388_v53, %v388_v53  ;;  %v709_v60 = vshrl.u32 %v2231_v7, 16  ;;  %v713_v61 = vrot.slane %v711_v44, 1  ;;  %v486_v1 = vsel %vm402_vm1, %v2268_v47, %v485_v50  ;;  %v2316_v40 = vld [vmem:[%s2221_s24 + $0x24] sm:$0xf0]  ;;  %v2078_v53 = vld [vmem:[%s2221_s24 + $0x54] sm:$0xe] }
  0x20   : > { %v432_v62 = vrot.slane %v430_v57, 1  ;;  %v716_v2 = vshll.u32 %v656_v55, 16  ;;  %v2288_v4 = vor.u32 %v456_v54, %v452_v48  ;;  %v461_v6 = vrot.slane %v459_v52, 1  ;;  %v1823_v48 = vld [vmem:[%s2221_s24 + $0x2c] sm:$0x1] }
  0x21   : > { %v435_v3 = vshll.u32 %v2276_v59, 16  ;;  %v714_v13 = vor.u32 %v713_v61, %v709_v60  ;;  %v2073_v16 = vor.u32 %v2072_v58, %v2234_v8  ;;  %v650_v20 = vunpack.c.l.b16 %v1827_v12  ;;  %v1965_v8 = vld [vmem:[%s2221_s24 + $0x18] sm:$0xe]  ;;  %v1859_v54 = vld [vmem:[%s2221_s24 + $0x50] sm:$0x1] }
  0x22   : > { %v2290_v9 = vor.u32 %v432_v62, %v428_v56  ;;  %v718_v14 = vrot.slane %v716_v2, 1  ;;  %v462_v19 = vsel %vm402_vm1, %v2288_v4, %v461_v6  ;;  %v809_v21 = vrot.slane %v656_v55, 1 }
  0x23   : > { %576 = vrot.lane.b32.xlu0 %v560_v46, %s2148_s26  ;;  %v437_v7 = vrot.slane %v435_v3, 1  ;;  %v644_v22 = vunpack.c.l.b16 %v1821_v17  ;;  %v735_v24 = vshll.u32 %v1817_v63, 16  ;;  %v808_v25 = vrot.slane %v2073_v16, 1  ;;  %v1861_v16 = vld [vmem:[%s2221_s24 + $0x68] sm:$0x1] }
  0x24   : > { %v719_v23 = vsel %vm402_vm1, %v714_v13, %v718_v14  ;;  %v2305_v26 = vpack.c.b16 %v650_v20, %v650_v20  ;;  %v663_v28 = vshll.u32 %v1805_v10, 16  ;;  %v733_v32 = vshrl.u32 %v1817_v63, 16  ;;  %v1991_v14 = vld [vmem:[%s2221_s24 + $0x48] sm:$0xf0] }
  0x25   : > { %v438_v15 = vsel %vm402_vm1, %v2290_v9, %v437_v7  ;;  %v652_v29 = vpack.c.b16 %v644_v22, %v644_v22  ;;  %v810_v30 = vsel %vm539_vm0, %v808_v25, %v809_v21  ;;  %v737_v33 = vrot.slane %v735_v24, 1  ;;  %v1855_v21 = vld [vmem:[%s2221_s24 + $0x20] sm:$0x1]  ;;  %v2081_v24 = vld [vmem:[%s2221_s24 + $0x24] sm:$0xe] }
  0x26   : > { %511 = vrot.lane.b32.xlu1 %v486_v1, %s2149_s27  ;;  %503 = vrot.lane.b32.xlu2 %v438_v15, %s2149_s27  ;;  %v740_v34 = vshll.u32 %v2305_v26, 16  ;;  %v1966_v35 = vor.u32 %v1965_v8, %v1964_v27  ;;  %v661_v37 = vshrl.u32 %v1805_v10, 16  ;;  %v665_v38 = vrot.slane %v663_v28, 1  ;;  %v1992_v15 = vld [vmem:[%s2221_s24 + $0x48] sm:$0xe] }
  0x27   : > { %v668_v41 = vshll.u32 %v652_v29, 16  ;;  %v738_v42 = vor.u32 %v737_v33, %v733_v32  ;;  %v547_v46 = vrot.slane %v2276_v59, 1  ;;  %v2076_v52 = vor.u32 %v2075_v36, %v2074_v11 }
  0x28   : > { %v742_v43 = vrot.slane %v740_v34, 1  ;;  %v546_v44 = vrot.slane %v1966_v35, 1  ;;  %v666_v49 = vor.u32 %v665_v38, %v661_v37  ;;  %v646_v55 = vunpack.c.l.b16 %v1823_v48  ;;  %v2361_v37 = vld [vmem:[%s2221_s24 + $0x3c] sm:$0xff]  }
  0x29   : > { %v670_v50 = vrot.slane %v668_v41, 1  ;;  %v797_v57 = vrot.slane %v652_v29, 1  ;;  %v904_v58 = vunpack.c.l.b16 %v1859_v54  ;;  %v687_v60 = vshll.u32 %v1809_v39, 16  ;;  %v2364_v38 = vld [vmem:[%s2221_s24 + $0x3c] sm:$0xf0] }
  0x2a   : > { %v743_v51 = vsel %vm402_vm1, %v738_v42, %v742_v43  ;;  %v548_v56 = vsel %vm539_vm0, %v546_v44, %v547_v46  ;;  %v796_v61 = vrot.slane %v2076_v52, 1  ;;  %v2329_v62 = vpack.c.b16 %v646_v55, %v646_v55  ;;  %v255_v44 = vld [vmem:[%s2221_s24 + $0x44] sm:$0x1]  ;;  %v1985_v52 = vld [vmem:[%s2221_s24 + $0x18] sm:$0xf0] }
  0x2b   : > { %507 = vrot.lane.b32.xlu0 %v462_v19, %s2149_s27  ;;  %v671_v59 = vsel %vm402_vm1, %v666_v49, %v670_v50  ;;  %v912_v1 = vpack.c.b16 %v904_v58, %v904_v58  ;;  %v685_v3 = vshrl.u32 %v1809_v39, 16  ;;  %v689_v6 = vrot.slane %v687_v60, 1  ;;  %v1994_v49 = vld [vmem:[%s2221_s24 + $0x60] sm:$0xf0]  ;;  %v1857_v50 = vld [vmem:[%s2221_s24 + $0x38] sm:$0x1] }
  0x2c   : > { %v798_v2 = vsel %vm539_vm0, %v796_v61, %v797_v57  ;;  %v692_v7 = vshll.u32 %v2329_v62, 16  ;;  %v1993_v20 = vor.u32 %v1992_v15, %v1991_v14  ;;  %v906_v22 = vunpack.c.l.b16 %v1861_v16  ;;  %v2389_v60 = vld [vmem:[%s2221_s24 + $0x54] sm:$0xf0] }
  0x2d   : > { %v690_v12 = vor.u32 %v689_v6, %v685_v3  ;;  %v900_v27 = vunpack.c.l.b16 %v1855_v21  ;;  %v1065_v29 = vrot.slane %v912_v1, 1  ;;  %v803_v48 = vrot.slane %v2329_v62, 1  ;;  %v2401_v3 = vld [vmem:[%s2221_s24 + $0xc] sm:$0xf0] }
  0x2e   : > { %764 = vrot.lane.b32.xlu1 %v719_v23, %s2150_s28  ;;  %828 = vrot.lane.b32.xlu2 %v810_v30, %s2151_s29  ;;  %v694_v13 = vrot.slane %v692_v7, 1  ;;  %v1064_v28 = vrot.slane %v1993_v20, 1  ;;  %v914_v30 = vpack.c.b16 %v906_v22, %v906_v22  ;;  %v391_v54 = vunpack.c.l.b16 %v255_v44  ;;  %v251_v22 = vld [vmem:[%s2221_s24 + $0x14] sm:$0x1] }
  0x2f   : > { %v2356_v32 = vpack.c.b16 %v900_v27, %v900_v27  ;;  %v902_v58 = vunpack.c.l.b16 %v1857_v50 }
  0x30   : > { %v695_v19 = vsel %vm402_vm1, %v690_v12, %v694_v13  ;;  %v1066_v35 = vsel %vm539_vm0, %v1064_v28, %v1065_v29  ;;  %v996_v36 = vshll.u32 %v914_v30, 16  ;;  %v1071_v7 = vrot.slane %v914_v30, 1 }
  0x31   : > { %v924_v41 = vshll.u32 %v2356_v32, 16  ;;  %v464_v12 = vshrl.u32 %v2361_v37, 16  ;;  %v1053_v15 = vrot.slane %v2356_v32, 1  ;;  %v387_v28 = vunpack.c.l.b16 %v251_v22 }
  0x32   : > { %v998_v43 = vrot.slane %v996_v36, 1 }
  0x33   : > { %620 = vrot.lane.b32.xlu0 %v1805_v10, %s2147_s25  ;;  %v972_v10 = vshll.u32 %v912_v1, 16  ;;  %v466_v1 = vshll.u32 %v2361_v37, 16 }
  0x35   : > { %v974_v17 = vrot.slane %v972_v10, 1  ;;  %v910_v10 = vpack.c.b16 %v902_v58, %v902_v58  ;;  %v468_v13 = vrot.slane %v466_v1, 1  ;;  %v2090_v58 = vld [vmem:[%s2221_s24 + $0xc] sm:$0xe] }
  0x36   : > { %632 = vrot.lane.b32.xlu1 %v1817_v63, %s2147_s25  ;;  %768 = vrot.lane.b32.xlu2 %v743_v51, %s2150_s28  ;;  %v2079_v63 = vor.u32 %v2078_v53, %v2282_v0  ;;  %v815_v0 = vrot.slane %v2305_v26, 1  ;;  %v2351_v26 = vld [vmem:[%s2221_s24 + $0x60] sm:$0xff]   ;;  %v926_v51 = vrot.slane %v924_v41, 1  ;;  %v1986_v53 = vld [vmem:[%s2221_s24 + $0x18] sm:$0xe] }
  0x37   : > { %v975_v25 = vsel %vm402_vm1, %v2268_v47, %v974_v17  ;;  %v991_v8 = vshll.u32 %v2351_v26, 16  ;;  %v989_v33 = vshrl.u32 %v2351_v26, 16  ;;  %v1987_v61 = vor.u32 %v1986_v53, %v1985_v52  ;;  %v1988_v17 = vld [vmem:[%s2221_s24 + $0x30] sm:$0xf0] }
  0x38   : > { %v814_v11 = vrot.slane %v2079_v63, 1  ;;  %v927_v62 = vsel %vm402_vm1, %v2290_v9, %v926_v51  ;;  %v2394_v63 = vpack.c.b16 %v391_v54, %v391_v54  ;;  %v948_v21 = vshll.u32 %v910_v10, 16 }
  0x39   : > { %v993_v34 = vrot.slane %v991_v8, 1 }
  0x3a   : > { %v816_v23 = vsel %vm539_vm0, %v814_v11, %v815_v0  ;;  %v257_v11 = vld [vmem:[%s2221_s24 + $0x5c] sm:$0x1]  ;;  %v1052_v0 = vrot.slane %v1987_v61, 1  ;;  %v471_v14 = vshll.u32 %v2394_v63, 16  ;;  %v950_v32 = vrot.slane %v948_v21, 1 }
  0x3b   : > { %568 = vrot.lane.b32.xlu0 %v548_v56, %s2148_s26  ;;  %v2371_v42 = vor.u32 %v993_v34, %v989_v33  ;;  %v393_v20 = vunpack.c.l.b16 %v257_v11  ;;  %v1059_v34 = vrot.slane %v910_v10, 1  ;;  %v1826_v61 = vld [vmem:[%s2221_s24 + $0x50] sm:$0x1]  ;;  %v253_v10 = vld [vmem:[%s2221_s24 + $0x2c] sm:$0x1] }
  0x3c   : > { %v473_v27 = vrot.slane %v471_v14, 1  ;;  %v1054_v8 = vsel %vm539_vm0, %v1052_v0, %v1053_v15  ;;  %v649_v0 = vunpack.c.l.b16 %v1826_v61 }
  0x3d   : > { %v999_v55 = vsel %vm402_vm1, %v2371_v42, %v998_v43  ;;  %v401_v29 = vpack.c.b16 %v393_v20, %v393_v20 }
  0x3e   : > { %756 = vrot.lane.b32.xlu1 %v671_v59, %s2150_s28  ;;  %820 = vrot.lane.b32.xlu2 %v798_v2, %s2151_s29  ;;  %v2386_v59 = vld [vmem:[%s2221_s24 + $0x54] sm:$0xff]   ;;  %v2398_v2 = vld [vmem:[%s2221_s24 + $0xc] sm:$0xff]  }
  0x3f   : > { %v490_v30 = vshll.u32 %v2386_v59, 16  ;;  %v418_v36 = vshll.u32 %v2398_v2, 16  ;;  %v488_v41 = vshrl.u32 %v2386_v59, 16  ;;  %v495_v44 = vshll.u32 %v401_v29, 16 }
  0x40   : > { %v416_v50 = vshrl.u32 %v2398_v2, 16  ;;  %v562_v15 = vrot.slane %v401_v29, 1 }
  0x41   : > { %v492_v43 = vrot.slane %v490_v30, 1  ;;  %v420_v51 = vrot.slane %v418_v36, 1  ;;  %v497_v54 = vrot.slane %v495_v44, 1  ;;  %v1822_v30 = vld [vmem:[%s2221_s24 + $0x20] sm:$0x1] }
  0x42   : > { %v1979_v36 = vld [vmem:[%s2221_s24 + $0x48] sm:$0xf0] }
  0x43   : > { %884 = vrot.lane.b32.xlu0 %v2244_v18, %s2152_s30  ;;  %v493_v53 = vor.u32 %v492_v43, %v488_v41  ;;  %v645_v41 = vunpack.c.l.b16 %v1822_v30  ;;  %v1828_v43 = vld [vmem:[%s2221_s24 + $0x68] sm:$0x1] }
  0x46   : > { %624 = vrot.lane.b32.xlu1 %v1809_v39, %s2147_s25  ;;  %760 = vrot.lane.b32.xlu2 %v695_v19, %s2150_s28  ;;  %v2082_v39 = vor.u32 %v2081_v24, %v2316_v40  ;;  %v1995_v40 = vld [vmem:[%s2221_s24 + $0x60] sm:$0xe]  ;;  %v1989_v19 = vld [vmem:[%s2221_s24 + $0x30] sm:$0xe] }
  0x47   : > { %v1996_v56 = vor.u32 %v1995_v40, %v1994_v49  ;;  %v1990_v24 = vor.u32 %v1989_v19, %v1988_v17  ;;  %v2087_v49 = vld [vmem:[%s2221_s24 + $0x54] sm:$0xe]  ;;  %v657_v17 = vpack.c.b16 %v649_v0, %v649_v0 }
  0x48   : > { %v802_v46 = vrot.slane %v2082_v39, 1  ;;  %v395_v39 = vpack.c.b16 %v387_v28, %v387_v28 }
  0x49   : > { %v1070_v6 = vrot.slane %v1996_v56, 1  ;;  %v1058_v33 = vrot.slane %v1990_v24, 1  ;;  %v2092_v56 = vld [vmem:[%s2221_s24 + $0x24] sm:$0xf0]  ;;  %v2093_v24 = vld [vmem:[%s2221_s24 + $0x24] sm:$0xe] }
  0x4a   : > { %v804_v57 = vsel %vm539_vm0, %v802_v46, %v803_v48  ;;  %v951_v46 = vsel %vm402_vm1, %v2288_v4, %v950_v32  ;;  %v423_v52 = vshll.u32 %v395_v39, 16  ;;  %v544_v21 = vrot.slane %v395_v39, 1  ;;  %v1980_v39 = vld [vmem:[%s2221_s24 + $0x48] sm:$0xe] }
  0x4b   : > { %832 = vrot.lane.b32.xlu0 %v816_v23, %s2151_s29  ;;  %v1072_v16 = vsel %vm539_vm0, %v1070_v6, %v1071_v7  ;;  %v2084_v23 = vld [vmem:[%s2221_s24 + $0x3c] sm:$0xe]  ;;  %v1060_v40 = vsel %vm539_vm0, %v1058_v33, %v1059_v34  ;;  %v498_v6 = vsel %vm402_vm1, %v493_v53, %v497_v54  ;;  %v2088_v7 = vor.u32 %v2087_v49, %v2389_v60  ;;  %v2478_v53 = vld [vmem:[%s2221_s24 + $0x54] sm:$0xff]  }
  0x4c   : > { %v2085_v48 = vor.u32 %v2084_v23, %v2364_v38  ;;  %v556_v38 = vrot.slane %v2394_v63, 1  ;;  %v425_v1 = vrot.slane %v423_v52, 1  ;;  %v728_v23 = vshll.u32 %v657_v17, 16  ;;  %v2481_v54 = vld [vmem:[%s2221_s24 + $0x54] sm:$0xf0] }
  0x4d   : > { %v561_v14 = vrot.slane %v2088_v7, 1  ;;  %v2094_v34 = vor.u32 %v2093_v24, %v2092_v56  ;;  %v1981_v44 = vor.u32 %v1980_v39, %v1979_v36  ;;  %v651_v49 = vunpack.c.l.b16 %v1828_v43  ;;  %v1983_v7 = vld [vmem:[%s2221_s24 + $0x60] sm:$0xe] }
  0x4e   : > { %1020 = vrot.lane.b32.xlu1 %v975_v25, %s2153_s4  ;;  %1084 = vrot.lane.b32.xlu2 %v1066_v35, %s2154_s5  ;;  %v469_v25 = vor.u32 %v468_v13, %v464_v12  ;;  %v389_v12 = vunpack.c.l.b16 %v253_v10  ;;  %v2091_v13 = vor.u32 %v2090_v58, %v2401_v3  ;;  %v730_v29 = vrot.slane %v728_v23, 1 }
  0x4f   : > { %v563_v22 = vsel %vm539_vm0, %v561_v14, %v562_v15  ;;  %v977_v39 = vshrl.u32 %v2478_v53, 16 }
  0x50   : > { %v474_v35 = vsel %vm402_vm1, %v469_v25, %v473_v27  ;;  %v397_v60 = vpack.c.b16 %v389_v12, %v389_v12  ;;  %v543_v20 = vrot.slane %v2091_v13, 1 }
  0x52   : > { %v447_v27 = vshll.u32 %v397_v60, 16 }
  0x53   : > { %876 = vrot.lane.b32.xlu0 %v2264_v45, %s2152_s30 }
  0x54   : > { %v449_v33 = vrot.slane %v447_v27, 1 }
  0x56   : > { %888 = vrot.lane.b32.xlu1 %v2351_v26, %s2152_s30  ;;  %1024 = vrot.lane.b32.xlu2 %v999_v55, %s2153_s4  ;;  %v2432_v55 = vld [vmem:[%s2221_s24 + $0x24] sm:$0xff]  }
  0x57   : > { %v442_v19 = vshll.u32 %v2432_v55, 16  ;;  %v440_v3 = vshrl.u32 %v2432_v55, 16 }
  0x59   : > { %v444_v25 = vrot.slane %v442_v19, 1 }
  0x5b   : > { %824 = vrot.lane.b32.xlu0 %v804_v57, %s2151_s29  ;;  %v555_v57 = vrot.slane %v2085_v48, 1  ;;  %v445_v32 = vor.u32 %v444_v25, %v440_v3  ;;  %v550_v48 = vrot.slane %v397_v60, 1  ;;  %v1974_v60 = vld [vmem:[%s2221_s24 + $0x18] sm:$0xe]  ;;  %v979_v25 = vshll.u32 %v2478_v53, 16 }
  0x5d   : > { %v557_v11 = vsel %vm539_vm0, %v555_v57, %v556_v38  ;;  %v1236_v57 = vld [vmem:[%s3148_s1 + $0x20] sm:$0xf] }
  0x5e   : > { %1012 = vrot.lane.b32.xlu1 %v927_v62, %s2153_s4  ;;  %1088 = vrot.lane.b32.xlu2 %v1072_v16, %s2154_s5  ;;  %v421_v62 = vor.u32 %v420_v51, %v416_v50  ;;  %v811_v50 = vrot.slane %v1981_v44, 1  ;;  %v812_v51 = vrot.slane %v657_v17, 1  ;;  %v1258_v61 = vunpack.c.l.b16 %v1236_v57  ;;  %v1973_v17 = vld [vmem:[%s2221_s24 + $0x18] sm:$0xf0]  ;;  %v1856_v57 = vld [vmem:[%s2221_s24 + $0x2c] sm:$0x1] }
  0x60   : > { %v426_v63 = vsel %vm402_vm1, %v421_v62, %v425_v1  ;;  %v813_v38 = vsel %vm539_vm0, %v811_v50, %v812_v51  ;;  %v1263_v0 = vpack.c.b16 %v1258_v61, %v1258_v61  ;;  %v1976_v51 = vld [vmem:[%s2221_s24 + $0x30] sm:$0xf0] }
  0x62   : > { %v1287_v13 = vsel %vm1285_vm3, %v1263_v0, 0  ;;  %v1845_v0 = vld [vmem:[%s2221_s24 + $0x3c] sm:$0xff]   ;;  %vm1381_vm3 = vcmask 1047559  }
  0x63   : > { %880 = vrot.lane.b32.xlu0 %v2252_v31, %s2152_s30  ;;  %1998 = vmatpush.bf16.msra.mxu2 %v1287_v13 }
  0x64   : > { %1999 = vmatpush.bf16.msra.mxu3 %v1287_v13  ;;  %1292 = vmatpush.bf16.msra.mxu0 %v1287_v13 }
  0x65   : > { %1997 = vmatpush.bf16.msra.mxu1 %v1287_v13 }
  0x66   : > { %1076 = vrot.lane.b32.xlu1 %v1054_v8, %s2154_s5  ;;  %509 = vrot.lane.b32.xlu2 %v474_v35, %s2149_s27  ;;  %v545_v8 = vsel %vm539_vm0, %v543_v20, %v544_v21  ;;  %v731_v35 = vsel %vm402_vm1, %v2268_v47, %v730_v29  ;;  %v2473_v47 = vpack.c.b16 %v645_v41, %v645_v41  ;;  %v1901_v21 = vld [vmem:[%s3148_s1 + $0x18] sm:$0xff]  ;;  %v1900_v29 = vld [vmem:[%s3148_s1 + $0x10] sm:$0xff]  ;;  %v981_v41 = vrot.slane %v979_v25, 1 }
  0x67   : > { %2001 = vmatpush.bf16.msra.mxu2 %v1901_v21 }
  0x68   : > { %v680_v56 = vshll.u32 %v2473_v47, 16  ;;  %2002 = vmatpush.bf16.msra.mxu3 %v1901_v21  ;;  %1293 = vmatpush.bf16.msra.mxu0 %v1901_v21 }
  0x69   : > { %2000 = vmatpush.bf16.msra.mxu1 %v1901_v21 }
  0x6a   : > { %v682_v1 = vrot.slane %v680_v56, 1  ;;  %v2560_v56 = vld [vmem:[%s2221_s24 + $0x6c] sm:$0xf0] }
  0x6b   : > { %1016 = vrot.lane.b32.xlu0 %v951_v46, %s2153_s4  ;;  %v549_v46 = vrot.slane %v2094_v34, 1  ;;  %v2534_v34 = vld [vmem:[%s2221_s24 + $0x24] sm:$0xff]   ;;  %2004 = vmatpush.bf16.msra.mxu2 %v1900_v29 }
  0x6c   : > { %v683_v15 = vsel %vm402_vm1, %v2290_v9, %v682_v1  ;;  %2005 = vmatpush.bf16.msra.mxu3 %v1900_v29  ;;  %1294 = vmatpush.bf16.msra.mxu0 %v1900_v29  ;;  %v1862_v1 = vld [vmem:[%s2221_s24 + $0x74] sm:$0x1]  ;;  %v929_v25 = vshrl.u32 %v2534_v34, 16 }
  0x6d   : > { %v551_v52 = vsel %vm539_vm0, %v549_v46, %v550_v48  ;;  %2003 = vmatpush.bf16.msra.mxu1 %v1900_v29  ;;  %v2096_v48 = vld [vmem:[%s2221_s24 + $0x54] sm:$0xe]  ;;  %v907_v13 = vunpack.c.l.b16 %v1862_v1 }
  0x6e   : > { %1080 = vrot.lane.b32.xlu1 %v1060_v40, %s2154_s5  ;;  %513 = vrot.lane.b32.xlu2 %v498_v6, %s2149_s27  ;;  %v1982_v6 = vld [vmem:[%s2221_s24 + $0x60] sm:$0xf0] }
  0x6f   : > { %v1984_v12 = vor.u32 %v1983_v7, %v1982_v6 }
  0x70   : > { %v2447_v16 = vpop.permute.xlu2 %628 }
  0x71   : > { %v817_v24 = vrot.slane %v1984_v12, 1 }
  0x73   : > { %574 = vrot.lane.b32.xlu0 %v557_v11, %s2148_s26  ;;  %v1860_v11 = vld [vmem:[%s2221_s24 + $0x5c] sm:$0x1] }
  0x74   : > { %v905_v19 = vunpack.c.l.b16 %v1860_v11  ;;  %v901_v11 = vunpack.c.l.b16 %v1856_v57 }
  0x76   : > { %501 = vrot.lane.b32.xlu1 %v426_v63, %s2149_s27  ;;  %578 = vrot.lane.b32.xlu2 %v563_v22, %s2148_s26  ;;  %v1824_v63 = vld [vmem:[%s2221_s24 + $0x38] sm:$0x1] }
  0x77   : > { %v647_v22 = vunpack.c.l.b16 %v1824_v63  ;;  %v2097_v63 = vor.u32 %v2096_v48, %v2481_v54  ;;  %v915_v54 = vpack.c.b16 %v907_v13, %v907_v13 }
  0x78   : > { %v2458_v28 = vpop.permute.xlu2 %564 }
  0x7b   : > { %630 = vrot.lane.b32.xlu0 %v2244_v18, %s2147_s25  ;;  %v450_v18 = vsel %vm402_vm1, %v445_v32, %v449_v33  ;;  %v800_v32 = vrot.slane %v2473_v47, 1  ;;  %v982_v47 = vor.u32 %v981_v41, %v977_v39  ;;  %v1008_v39 = vshll.u32 %v915_v54, 16 }
  0x7c   : > { %v955_v41 = vshll.u32 %v1845_v0, 16 }
  0x7e   : > { %566 = vrot.lane.b32.xlu1 %v545_v8, %s2148_s26  ;;  %622 = vrot.lane.b32.xlu2 %v2264_v45, %s2147_s25  ;;  %v659_v45 = vpack.c.b16 %v651_v49, %v651_v49  ;;  %v2521_v8 = vpack.c.b16 %v905_v19, %v905_v19  ;;  %v1858_v19 = vld [vmem:[%s2221_s24 + $0x44] sm:$0x1] }
  0x80   : > { %v2471_v40 = vpop.permute.xlu2 %503  ;;  %v752_v58 = vshll.u32 %v659_v45, 16  ;;  %v818_v3 = vrot.slane %v659_v45, 1  ;;  %v984_v43 = vshll.u32 %v2521_v8, 16 }
  0x82   : > { %v819_v33 = vsel %vm539_vm0, %v817_v24, %v818_v3  ;;  %v986_v50 = vrot.slane %v984_v43, 1  ;;  %v903_v24 = vunpack.c.l.b16 %v1858_v19 }
  0x83   : > { %766 = vrot.lane.b32.xlu0 %v731_v35, %s2150_s28  ;;  %v2537_v35 = vld [vmem:[%s2221_s24 + $0x24] sm:$0xf0] }
  0x84   : > { %v987_v7 = vsel %vm402_vm1, %v982_v47, %v986_v50  ;;  %v911_v43 = vpack.c.b16 %v903_v24, %v903_v24  ;;  %v1010_v47 = vrot.slane %v1008_v39, 1  ;;  %v953_v50 = vshrl.u32 %v1845_v0, 16 }
  0x86   : > { %505 = vrot.lane.b32.xlu1 %v450_v18, %s2149_s27  ;;  %570 = vrot.lane.b32.xlu2 %v551_v52, %s2148_s26  ;;  %v1899_v18 = vld [vmem:[%s3148_s1 + $0x8] sm:$0xff]  ;;  %v1977_v52 = vld [vmem:[%s2221_s24 + $0x30] sm:$0xe] }
  0x87   : > { %2007 = vmatpush.bf16.msra.mxu2 %v1899_v18  ;;  %2008 = vmatpush.bf16.msra.mxu3 %v1899_v18  ;;  %v1978_v61 = vor.u32 %v1977_v52, %v1976_v51  ;;  %v957_v51 = vrot.slane %v955_v41, 1  ;;  %v960_v52 = vshll.u32 %v911_v43, 16 }
  0x88   : > { %v2491_v62 = vpop.permute.xlu2 %828  ;;  %1295 = vmatpush.bf16.msra.mxu0 %v1899_v18  ;;  %2006 = vmatpush.bf16.msra.mxu1 %v1899_v18 }
  0x8b   : > { %634 = vrot.lane.b32.xlu0 %v2351_v26, %s2147_s25  ;;  %v754_v26 = vrot.slane %v752_v58, 1  ;;  %v1898_v58 = vld [vmem:[%s3148_s1] sm:$0xff] }
  0x8c   : > { %2010 = vmatpush.bf16.msra.mxu2 %v1898_v58  ;;  %2011 = vmatpush.bf16.msra.mxu3 %v1898_v58 }
  0x8d   : > { %v2495_v10 = vpop.permute.xlu0 %572  ;;  %v755_v23 = vsel %vm402_vm1, %v2371_v42, %v754_v26  ;;  %v2526_v42 = vpack.c.b16 %v647_v22, %v647_v22  ;;  %v2573_v26 = vld [vmem:[%s2221_s24 + $0x3c] sm:$0xf0]  ;;  %1296 = vmatpush.bf16.msra.mxu0 %v1898_v58  ;;  %2009 = vmatpush.bf16.msra.mxu1 %v1898_v58  ;;  %v1067_v22 = vrot.slane %v2097_v63, 1  ;;  %v962_v63 = vrot.slane %v960_v52, 1 }
  0x8e   : > { %830 = vrot.lane.b32.xlu1 %v813_v38, %s2151_s29  ;;  %886 = vrot.lane.b32.xlu2 %v2478_v53, %s2152_s30  ;;  %v1853_v53 = vld [vmem:[%s2221_s24 + $0x6c] sm:$0xff]  }
  0x8f   : > { %v704_v44 = vshll.u32 %v2526_v42, 16  ;;  %v1003_v21 = vshll.u32 %v1853_v53, 16 }
  0x90   : > { %v500_v14 = vpop.permute.xlu1 %499  ;;  %v2519_v27 = vpop.permute.xlu2 %768 }
  0x91   : > { %v1094_v20 = vsel %vm1092_vm2, %v2227_v5, %v500_v14  ;;  %v1975_v5 = vor.u32 %v1974_v60, %v1973_v17  ;;  %v706_v38 = vrot.slane %v704_v44, 1  ;;  %v805_v14 = vrot.slane %v1978_v61, 1  ;;  %v2105_v61 = vld [vmem:[%s2221_s24 + $0x3c] sm:$0xe] }
  0x92   : > { %v2513_v9 = vsel %vm1109_vm4, %v1094_v20, %v2458_v28  ;;  %v931_v17 = vshll.u32 %v2534_v34, 16  ;;  %v909_v60 = vpack.c.b16 %v901_v11, %v901_v11 }
  0x93   : > { %758 = vrot.lane.b32.xlu0 %v683_v15, %s2150_s28  ;;  %v799_v30 = vrot.slane %v1975_v5, 1  ;;  %v707_v12 = vsel %vm402_vm1, %v2288_v4, %v706_v38  ;;  %v806_v15 = vrot.slane %v2526_v42, 1 }
  0x94   : > { %v933_v42 = vrot.slane %v931_v17, 1  ;;  %v936_v29 = vshll.u32 %v909_v60, 16  ;;  %v1074_v17 = vrot.slane %v915_v54, 1 }
  0x95   : > { %v2523_v28 = vpop.permute.xlu0 %576  ;;  %v801_v46 = vsel %vm539_vm0, %v799_v30, %v800_v32  ;;  %v807_v5 = vsel %vm539_vm0, %v805_v14, %v806_v15  ;;  %v2099_v30 = vld [vmem:[%s2221_s24 + $0x24] sm:$0xe]  ;;  %v1001_v32 = vshrl.u32 %v1853_v53, 16  ;;  %v1056_v14 = vrot.slane %v909_v60, 1 }
  0x96   : > { %770 = vrot.lane.b32.xlu1 %v755_v23, %s2150_s28  ;;  %834 = vrot.lane.b32.xlu2 %v819_v33, %s2151_s29  ;;  %v1068_v23 = vrot.slane %v2521_v8, 1  ;;  %v1005_v33 = vrot.slane %v1003_v21, 1  ;;  %v934_v18 = vor.u32 %v933_v42, %v929_v25  ;;  %v938_v44 = vrot.slane %v936_v29, 1 }
  0x97   : > { %v2100_v58 = vor.u32 %v2099_v30, %v2537_v35 }
  0x98   : > { %v2539_v36 = vpop.permute.xlu1 %511  ;;  %v2552_v49 = vpop.permute.xlu2 %820  ;;  %v1069_v8 = vsel %vm539_vm0, %v1067_v22, %v1068_v23  ;;  %v939_v38 = vsel %vm402_vm1, %v934_v18, %v938_v44  ;;  %v1062_v23 = vrot.slane %v911_v43, 1 }
  0x99   : > { %v1055_v13 = vrot.slane %v2100_v58, 1 }
  0x9b   : > { %626 = vrot.lane.b32.xlu0 %v2252_v31, %s2147_s25 }
  0x9d   : > { %v2556_v45 = vpop.permute.xlu0 %507 }
  0x9e   : > { %822 = vrot.lane.b32.xlu1 %v801_v46, %s2151_s29  ;;  %878 = vrot.lane.b32.xlu2 %v2534_v34, %s2152_s30  ;;  %v2102_v46 = vld [vmem:[%s2221_s24 + $0x6c] sm:$0xe]  ;;  %v1006_v34 = vor.u32 %v1005_v33, %v1001_v32 }
  0x9f   : > { %v2103_v11 = vor.u32 %v2102_v46, %v2560_v56  ;;  %v2106_v56 = vor.u32 %v2105_v61, %v2573_v26 }
  0xa0   : > { %v2568_v6 = vpop.permute.xlu1 %764  ;;  %v2587_v4 = vpop.permute.xlu2 %760  ;;  %v1011_v1 = vsel %vm402_vm1, %v1006_v34, %v1010_v47 }
  0xa1   : > { %v1061_v54 = vrot.slane %v2106_v56, 1 }
  0xa3   : > { %1022 = vrot.lane.b32.xlu0 %v987_v7, %s2153_s4  ;;  %v1102_v7 = vsel %vm1092_vm2, %v2252_v31, %v2556_v45  ;;  %v1057_v45 = vsel %vm539_vm0, %v1055_v13, %v1056_v14 }
  0xa4   : > { %v1119_v35 = vsel %vm1109_vm4, %v1102_v7, %v2495_v10 }
  0xa5   : > { %v2584_v20 = vpop.permute.xlu0 %620  ;;  %v1136_v21 = vsel %vm1126_vm5, %v1119_v35, %v2447_v16 }
  0xa6   : > { %762 = vrot.lane.b32.xlu1 %v707_v12, %s2150_s28  ;;  %826 = vrot.lane.b32.xlu2 %v807_v5, %s2151_s29  ;;  %v958_v12 = vor.u32 %v957_v51, %v953_v50  ;;  %v1153_v22 = vsel %vm1143_vm6, %v1136_v21, %v2568_v6  ;;  %v2069_v5 = vld [vmem:[%s2221_s24 + $0x48] sm:$0xff]   ;;  %v1063_v6 = vsel %vm539_vm0, %v1061_v54, %v1062_v23  ;;  %v2070_v50 = vld [vmem:[%s2221_s24 + $0x18] sm:$0xff]  }
  0xa7   : > { %v1170_v16 = vsel %vm1160_vm7, %v1153_v22, %v2491_v62  ;;  %v1106_v24 = vsel %vm1092_vm2, %v2069_v5, %v2539_v36  ;;  %v1128_v34 = vsel %vm1126_vm5, %v2513_v9, %v2584_v20  ;;  %v1098_v51 = vsel %vm1092_vm2, %v2070_v50, %v2471_v40 }
  0xa8   : > { %v2591_v3 = vpop.permute.xlu1 %632  ;;  %v963_v19 = vsel %vm402_vm1, %v958_v12, %v962_v63  ;;  %v1123_v32 = vsel %vm1109_vm4, %v1106_v24, %v2523_v28  ;;  %vm1378_vm1 = vcmask 1046534  }
  0xa9   : > { %v1140_v62 = vsel %vm1126_vm5, %v1123_v32, %v2591_v3 }
  0xaa   : > { %v1157_v39 = vsel %vm1143_vm6, %v1140_v62, %v2519_v27 }
  0xab   : > { %890 = vrot.lane.b32.xlu0 %v1853_v53, %s2152_s30  ;;  %v1085_v53 = vpop.permute.xlu2 %1084 }
  0xad   : > { %v2599_v48 = vpop.permute.xlu0 %568 }
  0xae   : > { %1086 = vrot.lane.b32.xlu1 %v1069_v8, %s2154_s5  ;;  %882 = vrot.lane.b32.xlu2 %v1845_v0, %s2152_s30  ;;  %v1073_v0 = vrot.slane %v2103_v11, 1 }
  0xb0   : > { %v2602_v57 = vpop.permute.xlu1 %756  ;;  %v1075_v10 = vsel %vm539_vm0, %v1073_v0, %v1074_v17  ;;  %vm1375_vm0 = vcmask 1045509  }
  0xb1   : > { %v1145_v27 = vsel %vm1143_vm6, %v1128_v34, %v2602_v57 }
  0xb2   : > { %v1162_v52 = vsel %vm1160_vm7, %v1145_v27, %v2552_v49 }
  0xb3   : > { %1014 = vrot.lane.b32.xlu0 %v939_v38, %s2153_s4  ;;  %v1025_v60 = vpop.permute.xlu2 %1024 }
  0xb5   : > { %v885_v15 = vpop.permute.xlu0 %884 }
  0xb6   : > { %1026 = vrot.lane.b32.xlu1 %v1011_v1, %s2153_s4  ;;  %1018 = vrot.lane.b32.xlu2 %v963_v19, %s2153_s4  ;;  %v1187_v25 = vsel %vm1177_vm8, %v1170_v16, %v885_v15 }
  0xb8   : > { %v625_v31 = vpop.permute.xlu1 %624 }
  0xbb   : > { %1078 = vrot.lane.b32.xlu0 %v1057_v45, %s2154_s5  ;;  %v1089_v36 = vpop.permute.xlu2 %1088 }
  0xbd   : > { %v833_v26 = vpop.permute.xlu0 %832 }
  0xbe   : > { %1090 = vrot.lane.b32.xlu1 %v1075_v10, %s2154_s5  ;;  %v1174_v8 = vsel %vm1160_vm7, %v1157_v39, %v833_v26 }
  0xc0   : > { %v1021_v42 = vpop.permute.xlu1 %1020 }
  0xc1   : > { %v1204_v29 = vsel %vm1194_vm9, %v1187_v25, %v1021_v42 }
  0xc2   : > { %v1221_v30 = vsel %vm1211_vm10, %v1204_v29, %v1085_v53  ;;  %v1115_v53 = vsel %vm1109_vm4, %v1098_v51, %v2599_v48 }
  0xc3   : > { %1891 = vmatmul.msk.bf16.vlgmr.msra.gmra.mxu2 %vm1268_vm11, %v1221_v30  ;;  %1082 = vrot.lane.b32.xlu0 %v1063_v6, %s2154_s5  ;;  %v510_v46 = vpop.permute.xlu2 %509  ;;  %v1132_v58 = vsel %vm1126_vm5, %v1115_v53, %v625_v31 }
  0xc4   : > { %v1149_v40 = vsel %vm1143_vm6, %v1132_v58, %v2587_v4  ;;  %v1104_v16 = vsel %vm1092_vm2, %v2361_v37, %v510_v46 }
  0xc5   : > { %v877_v33 = vpop.permute.xlu0 %876 }
  0xc6   : > { %v1179_v38 = vsel %vm1177_vm8, %v1162_v52, %v877_v33 }
  0xc8   : > { %v889_v41 = vpop.permute.xlu1 %888 }
  0xc9   : > { %v1191_v43 = vsel %vm1177_vm8, %v1174_v8, %v889_v41 }
  0xca   : > { %v1208_v28 = vsel %vm1194_vm9, %v1191_v43, %v1025_v60 }
  0xcb   : > { %v1225_v18 = vsel %vm1211_vm10, %v1208_v28, %v1089_v36  ;;  %v514_v20 = vpop.permute.xlu2 %513 }
  0xcc   : > { %1893 = vmatmul.msk.bf16.vlgmr.msra.gmra.mxu3 %vm1268_vm11, %v1225_v18  ;;  %v1108_v41 = vsel %vm1092_vm2, %v2386_v59, %v514_v20 }
  0xcd   : > { %v825_v44 = vpop.permute.xlu0 %824 }
  0xce   : > { %v1166_v49 = vsel %vm1160_vm7, %v1149_v40, %v825_v44 }
  0xd0   : > { %v1013_v3 = vpop.permute.xlu1 %1012 }
  0xd1   : > { %v1196_v9 = vsel %vm1194_vm9, %v1179_v38, %v1013_v3 }
  0xd3   : > { %v579_v63 = vpop.permute.xlu2 %578 }
  0xd4   : > { %v1125_v3 = vsel %vm1109_vm4, %v1108_v41, %v579_v63 }
  0xd5   : > { %v881_v47 = vpop.permute.xlu0 %880 }
  0xd6   : > { %v1183_v1 = vsel %vm1177_vm8, %v1166_v49, %v881_v47 }
  0xd8   : > { %v1077_v61 = vpop.permute.xlu1 %1076 }
  0xd9   : > { %v1213_v57 = vsel %vm1211_vm10, %v1196_v9, %v1077_v61 }
  0xda   : > { %1887 = vmatmul.msk.bf16.vlgmr.msra.gmra.mxu0 %vm1268_vm11, %v1213_v57 }
  0xdb   : > { %v623_v15 = vpop.permute.xlu2 %622 }
  0xdd   : > { %v1017_v48 = vpop.permute.xlu0 %1016 }
  0xde   : > { %v1200_v7 = vsel %vm1194_vm9, %v1183_v1, %v1017_v48 }
  0xe0   : > { %v1081_v11 = vpop.permute.xlu1 %1080 }
  0xe1   : > { %v1217_v12 = vsel %vm1211_vm10, %v1200_v7, %v1081_v11 }
  0xe2   : > { %1889 = vmatmul.msk.bf16.vlgmr.msra.gmra.mxu1 %vm1268_vm11, %v1217_v12  ;;  %v2717_v12 = vld [vmem:[%s3149_s2] ss:$0 sm:$0xff] }
  0xe3   : > { %v571_v4 = vpop.permute.xlu2 %570 }
  0xe5   : > { %v575_v13 = vpop.permute.xlu0 %574 }
  0xe6   : > { %v1121_v24 = vsel %vm1109_vm4, %v1104_v16, %v575_v13 }
  0xe8   : > { %v502_v14 = vpop.permute.xlu1 %501 }
  0xe9   : > { %v1096_v37 = vsel %vm1092_vm2, %v2398_v2, %v502_v14 }
  0xeb   : > { %v887_v45 = vpop.permute.xlu2 %886 }
  0xed   : > { %v631_v35 = vpop.permute.xlu0 %630 }
  0xee   : > { %v1138_v25 = vsel %vm1126_vm5, %v1121_v24, %v631_v35 }
  0xf0   : > { %v567_v0 = vpop.permute.xlu1 %566 }
  0xf1   : > { %v1113_v39 = vsel %vm1109_vm4, %v1096_v37, %v567_v0 }
  0xf2   : > { %v1130_v28 = vsel %vm1126_vm5, %v1113_v39, %v623_v15 }
  0xf3   : > { %v835_v10 = vpop.permute.xlu2 %834 }
  0xf5   : > { %v767_v17 = vpop.permute.xlu0 %766 }
  0xf6   : > { %v1155_v42 = vsel %vm1143_vm6, %v1138_v25, %v767_v17 }
  0xf8   : > { %v506_v19 = vpop.permute.xlu1 %505 }
  0xf9   : > { %v1100_v43 = vsel %vm1092_vm2, %v2432_v55, %v506_v19 }
  0xfa   : > { %v1117_v27 = vsel %vm1109_vm4, %v1100_v43, %v571_v4 }
  0xfb   : > { %v879_v23 = vpop.permute.xlu2 %878 }
  0xfd   : > { %v635_v31 = vpop.permute.xlu0 %634 }
  0xfe   : > { %v1142_v2 = vsel %vm1126_vm5, %v1125_v3, %v635_v31 }
 0x100   : > { %v831_v56 = vpop.permute.xlu1 %830 }
 0x101   : > { %v1172_v6 = vsel %vm1160_vm7, %v1155_v42, %v831_v56 }
 0x102   : > { %v1189_v32 = vsel %vm1177_vm8, %v1172_v6, %v887_v45 }
 0x103   : > { %v827_v30 = vpop.permute.xlu2 %826 }
 0x105   : > { %v759_v21 = vpop.permute.xlu0 %758 }
 0x106   : > { %v1147_v18 = vsel %vm1143_vm6, %v1130_v28, %v759_v21 }
 0x108   : > { %v771_v60 = vpop.permute.xlu1 %770 }
 0x109   : > { %v1159_v47 = vsel %vm1143_vm6, %v1142_v2, %v771_v60 }
 0x10a   : > { %v1176_v53 = vsel %vm1160_vm7, %v1159_v47, %v835_v10 }
 0x10b   : > { %v883_v44 = vpop.permute.xlu2 %882 }
 0x10d   : > { %v627_v22 = vpop.permute.xlu0 %626 }
 0x10e   : > { %v1134_v59 = vsel %vm1126_vm5, %v1117_v27, %v627_v22 }
 0x110   : > { %v823_v54 = vpop.permute.xlu1 %822 }
 0x111   : > { %v1164_v34 = vsel %vm1160_vm7, %v1147_v18, %v823_v54 }
 0x112   : > { %v1181_v50 = vsel %vm1177_vm8, %v1164_v34, %v879_v23 }
 0x113   : > { %v1019_v40 = vpop.permute.xlu2 %1018 }
 0x115   : > { %v1023_v26 = vpop.permute.xlu0 %1022 }
 0x116   : > { %v1206_v62 = vsel %vm1194_vm9, %v1189_v32, %v1023_v26 }
 0x118   : > { %v763_v5 = vpop.permute.xlu1 %762 }
 0x119   : > { %v1151_v55 = vsel %vm1143_vm6, %v1134_v59, %v763_v5 }
 0x11a   : > { %v1168_v58 = vsel %vm1160_vm7, %v1151_v55, %v827_v30 }
 0x11b   : > { %v1185_v49 = vsel %vm1177_vm8, %v1168_v58, %v883_v44 }
 0x11c   : > { %v1202_v1 = vsel %vm1194_vm9, %v1185_v49, %v1019_v40 }
 0x11d   : > { %v891_v29 = vpop.permute.xlu0 %890 }
 0x11e   : > { %v1193_v9 = vsel %vm1177_vm8, %v1176_v53, %v891_v29 }
 0x120   : > { %v1087_v36 = vpop.permute.xlu1 %1086 }
 0x121   : > { %v1223_v33 = vsel %vm1211_vm10, %v1206_v62, %v1087_v36 }
 0x122   : > { %1892 = vmatmul.msk.bf16.gmra.mxu2 %vm1268_vm11, %v1223_v33 }
 0x125   : > { %v1015_v8 = vpop.permute.xlu0 %1014 }
 0x126   : > { %v1198_v51 = vsel %vm1194_vm9, %v1181_v50, %v1015_v8 }
 0x128   : > { %v1027_v46 = vpop.permute.xlu1 %1026 }
 0x129   : > { %v1210_v20 = vsel %vm1194_vm9, %v1193_v9, %v1027_v46 }
 0x12d   : > { %v1079_v52 = vpop.permute.xlu0 %1078 }
 0x12e   : > { %v1215_v38 = vsel %vm1211_vm10, %v1198_v51, %v1079_v52 }
 0x12f   : > { %1888 = vmatmul.msk.bf16.gmra.mxu0 %vm1268_vm11, %v1215_v38 }
 0x130   : > { %v1091_v61 = vpop.permute.xlu1 %1090 }
 0x131   : > { %v1227_v57 = vsel %vm1211_vm10, %v1210_v20, %v1091_v61 }
 0x132   : > { %1894 = vmatmul.msk.bf16.gmra.mxu3 %vm1268_vm11, %v1227_v57 }
 0x135   : > { %v1083_v48 = vpop.permute.xlu0 %1082 }
 0x136   : > { %v1219_v7 = vsel %vm1211_vm10, %v1202_v1, %v1083_v48 }
 0x137   : > { %1890 = vmatmul.msk.bf16.gmra.mxu1 %vm1268_vm11, %v1219_v7 }
 0x146   : > { %v1318_v11 = vpop.f32.mrf.mxu2 }
 0x147   : > { %v1319_v15 = vadd.f32 %v2717_v12, %v1318_v11 }
 0x149   : > { %v2721_v17 = vmax.f32 %v1319_v15, 0.0 }
 0x14b   : > { %v1424_v21 = vrot.slane %v2721_v17, 7  ;;  %v1459_v22 = vrot.slane %v2721_v17, 1  ;;  %v1390_v54 = vrot.slane %v2721_v17, 5  ;;  %v1476_v23 = vrot.slane %v2721_v17, 2 }
 0x14c   : > { %v1407_v26 = vrot.slane %v2721_v17, 6  ;;  %v1493_v24 = vrot.slane %v2721_v17, 3 }
 0x14e   : > { %v1320_v13 = vpop.f32.mrf.mxu2 }
 0x14f   : > { %v1328_v63 = vpop.f32.mrf.mxu3  ;;  %v1321_v0 = vadd.f32 %v2717_v12, %v1320_v13 }
 0x150   : > { %v1329_v4 = vadd.f32 %v2717_v12, %v1328_v63 }
 0x151   : > { %v2724_v19 = vmax.f32 %v1321_v0, 0.0 }
 0x152   : > { %v2727_v56 = vmax.f32 %v1329_v4, 0.0 }
 0x153   : > { %v1534_v16 = vrot.slane %v2724_v19, 5  ;;  %v1517_v5 = vrot.slane %v2724_v19, 4 }
 0x154   : > { %v1428_v62 = vrot.slane %v2727_v56, 5  ;;  %v1462_v36 = vrot.slane %v2727_v56, 7  ;;  %v1394_v33 = vrot.slane %v2727_v56, 3  ;;  %v1411_v39 = vrot.slane %v2727_v56, 4 }
 0x155   : > { %v1445_v8 = vrot.slane %v2727_v56, 6 }
 0x157   : > { %v1298_v14 = vpop.f32.mrf.mxu0  ;;  %v1330_v31 = vpop.f32.mrf.mxu3 }
 0x158   : > { %v1299_v45 = vadd.f32 %v2717_v12, %v1298_v14  ;;  %v1331_v60 = vadd.f32 %v2717_v12, %v1330_v31 }
 0x15a   : > { %v2738_v25 = vmax.f32 %v1299_v45, 0.0  ;;  %v2747_v37 = vmax.f32 %v1331_v60, 0.0 }
 0x15c   : > { %v1418_v34 = vrot.slane %v2738_v25, 3  ;;  %v1452_v2 = vrot.slane %v2738_v25, 5  ;;  %v1384_v27 = vrot.slane %v2738_v25, 1  ;;  %v1469_v59 = vrot.slane %v2738_v25, 6 }
 0x15d   : > { %v1401_v55 = vrot.slane %v2738_v25, 2  ;;  %v1435_v50 = vrot.slane %v2738_v25, 4  ;;  %v1538_v51 = vrot.slane %v2747_v37, 3  ;;  %v1521_v52 = vrot.slane %v2747_v37, 2 }
 0x15e   : > { %v1486_v53 = vrot.slane %v2738_v25, 7 }
 0x15f   : > { %v1308_v35 = vpop.f32.mrf.mxu1  ;;  %v1300_v10 = vpop.f32.mrf.mxu0 }
 0x160   : > { %v1309_v42 = vadd.f32 %v2717_v12, %v1308_v35  ;;  %v1301_v32 = vadd.f32 %v2717_v12, %v1300_v10 }
 0x162   : > { %v2756_v46 = vmax.f32 %v1309_v42, 0.0  ;;  %v2761_v47 = vmax.f32 %v1301_v32, 0.0 }
 0x164   : > { %v1421_v57 = vrot.slane %v2756_v46, 1  ;;  %v1455_v40 = vrot.slane %v2756_v46, 3  ;;  %v1386_v49 = vrot.slane %v2756_v46, 7  ;;  %v1472_v1 = vrot.slane %v2756_v46, 4 }
 0x165   : > { %v1438_v48 = vrot.slane %v2756_v46, 2  ;;  %v1528_v7 = vrot.slane %v2761_v47, 1  ;;  %v1489_v11 = vrot.slane %v2756_v46, 5  ;;  %v1579_v63 = vrot.slane %v2761_v47, 4 }
 0x167   : > { %v1310_v6 = vpop.f32.mrf.mxu1 }
 0x168   : > { %v1311_v43 = vadd.f32 %v2717_v12, %v1310_v6 }
 0x16a   : > { %v2770_v58 = vmax.f32 %v1311_v43, 0.0 }
 0x16c   : > { %v1530_v31 = vrot.slane %v2770_v58, 7  ;;  %v1513_v45 = vrot.slane %v2770_v58, 6 }
 0x1a5   : > { %v1323_v3 = vpop.f32.mrf.mxu2 }
 0x1a6   : > { %v1324_v9 = vadd.f32 %v2717_v12, %v1323_v3 }
 0x1a8   : > { %v2787_v0 = vmax.f32 %v1324_v9, 0.0 }
 0x1aa   : > { %v1426_v60 = vrot.slane %v2787_v0, 6  ;;  %v1392_v28 = vrot.slane %v2787_v0, 4  ;;  %v1478_v9 = vrot.slane %v2787_v0, 1  ;;  %v1409_v35 = vrot.slane %v2787_v0, 5 }
 0x1ab   : > { %v1443_v38 = vrot.slane %v2787_v0, 7  ;;  %v1495_v13 = vrot.slane %v2787_v0, 2 }
 0x1ac   : > { %v1303_v4 = vpop.f32.mrf.mxu0 }
 0x1ad   : > { %v1304_v10 = vadd.f32 %v2717_v12, %v1303_v4  ;;  %v1325_v42 = vpop.f32.mrf.mxu2 }
 0x1ae   : > { %v1326_v3 = vadd.f32 %v2717_v12, %v1325_v42 }
 0x1af   : > { %v2799_v18 = vmax.f32 %v1304_v10, 0.0 }
 0x1b0   : > { %v2801_v4 = vmax.f32 %v1326_v3, 0.0 }
 0x1b1   : > { %v1419_v42 = vrot.slane %v2799_v18, 2  ;;  %v1453_v61 = vrot.slane %v2799_v18, 4  ;;  %v1385_v44 = vsel %vm1363_vm12, %v2799_v18, %v1384_v27  ;;  %v1470_v10 = vrot.slane %v2799_v18, 5 }
 0x1b2   : > { %v1402_v3 = vrot.slane %v2799_v18, 1  ;;  %v1436_v43 = vrot.slane %v2799_v18, 3  ;;  %v1387_v29 = vsel %vm1366_vm13, %v1386_v49, %v1385_v44  ;;  %v1536_v32 = vrot.slane %v2801_v4, 4 }
 0x1b3   : > { %v1420_v20 = vsel %vm1363_vm12, %v1419_v42, %v1418_v34  ;;  %v1454_v15 = vsel %vm1363_vm12, %v1453_v61, %v1452_v2  ;;  %v1471_v30 = vsel %vm1363_vm12, %v1470_v10, %v1469_v59  ;;  %v1519_v59 = vrot.slane %v2801_v4, 3 }
 0x1b4   : > { %v1305_v27 = vpop.f32.mrf.mxu0  ;;  %v1313_v14 = vpop.f32.mrf.mxu1  ;;  %v1403_v41 = vsel %vm1363_vm12, %v1402_v3, %v1401_v55  ;;  %v1437_v2 = vsel %vm1363_vm12, %v1436_v43, %v1435_v50  ;;  %v1422_v44 = vsel %vm1366_vm13, %v1421_v57, %v1420_v20  ;;  %v1456_v55 = vsel %vm1366_vm13, %v1455_v40, %v1454_v15 }
 0x1b5   : > { %v1306_v6 = vadd.f32 %v2717_v12, %v1305_v27  ;;  %v1314_v34 = vadd.f32 %v2717_v12, %v1313_v14  ;;  %v1333_v42 = vpop.f32.mrf.mxu3  ;;  %v1473_v49 = vsel %vm1366_vm13, %v1472_v1, %v1471_v30  ;;  %v1404_v14 = vsel %vm1366_vm13, %v2756_v46, %v1403_v41 }
 0x1b6   : > { %v1334_v61 = vadd.f32 %v2717_v12, %v1333_v42  ;;  %v1439_v3 = vsel %vm1366_vm13, %v1438_v48, %v1437_v2  ;;  %v1487_v27 = vrot.slane %v2799_v18, 6 }
 0x1b7   : > { %v2832_v10 = vmax.f32 %v1314_v34, 0.0  ;;  %v2838_v50 = vmax.f32 %v1306_v6, 0.0 }
 0x1b8   : > { %v2840_v43 = vmax.f32 %v1334_v61, 0.0 }
 0x1b9   : > { %v1423_v30 = vsel %vm1369_vm14, %v2832_v10, %v1422_v44  ;;  %v1457_v57 = vrot.slane %v2832_v10, 2  ;;  %v1388_v40 = vrot.slane %v2832_v10, 6  ;;  %v1474_v41 = vrot.slane %v2832_v10, 3 }
 0x1ba   : > { %v1425_v1 = vsel %vm1372_vm15, %v1424_v21, %v1423_v30  ;;  %v1430_v48 = vrot.slane %v2840_v43, 4  ;;  %v1464_v15 = vrot.slane %v2840_v43, 6  ;;  %v1396_v6 = vrot.slane %v2840_v43, 2 }
 0x1bb   : > { %v1427_v34 = vsel %vm1375_vm0, %v1426_v60, %v1425_v1  ;;  %v1458_v2 = vsel %vm1369_vm14, %v1457_v57, %v1456_v55  ;;  %v1389_v61 = vsel %vm1369_vm14, %v1388_v40, %v1387_v29  ;;  %v1475_v44 = vsel %vm1369_vm14, %v1474_v41, %v1473_v49 }
 0x1bc   : > { %v1315_v20 = vpop.f32.mrf.mxu1  ;;  %v1429_v42 = vsel %vm1378_vm1, %v1428_v62, %v1427_v34  ;;  %v1460_v21 = vsel %vm1372_vm15, %v1459_v22, %v1458_v2  ;;  %v1391_v30 = vsel %vm1372_vm15, %v1390_v54, %v1389_v61  ;;  %v1477_v60 = vsel %vm1372_vm15, %v1476_v23, %v1475_v44 }
 0x1bd   : > { %v1316_v29 = vadd.f32 %v2717_v12, %v1315_v20  ;;  %v1335_v55 = vpop.f32.mrf.mxu3  ;;  %v1431_v49 = vsel %vm1381_vm3, %v1430_v48, %v1429_v42  ;;  %v1461_v62 = vsel %vm1375_vm0, %v2787_v0, %v1460_v21  ;;  %v1393_v57 = vsel %vm1375_vm0, %v1392_v28, %v1391_v30 }
 0x1be   : > { %v1336_v22 = vadd.f32 %v2717_v12, %v1335_v55  ;;  %1432 = vrot.lane.b32.xlu0 %v1431_v49, %s2147_s25  ;;  %v1463_v54 = vsel %vm1378_vm1, %v1462_v36, %v1461_v62  ;;  %v1395_v23 = vsel %vm1378_vm1, %v1394_v33, %v1393_v57  ;;  %v1479_v20 = vsel %vm1375_vm0, %v1478_v9, %v1477_v60  ;;  %s2155_s25 = smov 72  }
 0x1bf   : > { %v2885_v42 = vmax.f32 %v1316_v29, 0.0  ;;  %v1465_v40 = vsel %vm1381_vm3, %v1464_v15, %v1463_v54  ;;  %v1397_v28 = vsel %vm1381_vm3, %v1396_v6, %v1395_v23  ;;  %v1480_v12 = vsel %vm1378_vm1, %v2727_v56, %v1479_v20 }
 0x1c0   : > { %v2891_v41 = vmax.f32 %v1336_v22, 0.0  ;;  %1466 = vrot.lane.b32.xlu2 %v1465_v40, %s2151_s29  ;;  %1398 = vrot.lane.b32.xlu1 %v1397_v28, %s2149_s27  ;;  %v1481_v36 = vrot.slane %v2840_v43, 7  ;;  %v1405_v33 = vrot.slane %v2832_v10, 7  ;;  %v1553_v9 = vrot.slane %v2801_v4, 5  ;;  %s2157_s27 = smov 88   ;;  %s2159_s29 = smov 120  }
 0x1c1   : > { %v1413_v1 = vrot.slane %v2840_v43, 3  ;;  %v1440_v48 = vrot.slane %v2832_v10, 1  ;;  %v1529_v15 = vsel %vm1363_vm12, %v2838_v50, %v1528_v7  ;;  %v1532_v6 = vrot.slane %v2885_v42, 6 }
 0x1c2   : > { %v1482_v34 = vsel %vm1381_vm3, %v1481_v36, %v1480_v12  ;;  %v1406_v2 = vsel %vm1369_vm14, %v1405_v33, %v1404_v14  ;;  %v1447_v61 = vrot.slane %v2840_v43, 5  ;;  %v1531_v44 = vsel %vm1366_vm13, %v1530_v31, %v1529_v15 }
 0x1c3   : > { %v1408_v21 = vsel %vm1372_vm15, %v1407_v26, %v1406_v2  ;;  %v1441_v30 = vsel %vm1369_vm14, %v1440_v48, %v1439_v3  ;;  %v1533_v7 = vsel %vm1369_vm14, %v1532_v6, %v1531_v44  ;;  %v1511_v60 = vrot.slane %v2838_v50, 7 }
 0x1c4   : > { %v1410_v14 = vsel %vm1375_vm0, %v1409_v35, %v1408_v21  ;;  %v1442_v29 = vsel %vm1372_vm15, %v2721_v17, %v1441_v30  ;;  %v1535_v31 = vsel %vm1372_vm15, %v1534_v16, %v1533_v7  ;;  %v1515_v55 = vrot.slane %v2885_v42, 5 }
 0x1c5   : > { %v1412_v26 = vsel %vm1378_vm1, %v1411_v39, %v1410_v14  ;;  %v1444_v3 = vsel %vm1375_vm0, %v1443_v38, %v1442_v29  ;;  %v1537_v35 = vsel %vm1375_vm0, %v1536_v32, %v1535_v31  ;;  %v1512_v49 = vsel %vm1363_vm12, %v1511_v60, %v2761_v47 }
 0x1c6   : > { %1483 = vrot.lane.b32.xlu0 %v1482_v34, %s2152_s30  ;;  %v1446_v16 = vsel %vm1378_vm1, %v1445_v8, %v1444_v3  ;;  %v1514_v39 = vsel %vm1366_vm13, %v1513_v45, %v1512_v49  ;;  %v1488_v38 = vsel %vm1363_vm12, %v1487_v27, %v1486_v53  ;;  %v1639_v32 = vrot.slane %v2801_v4, 2  ;;  %s2160_s30 = smov 112  }
 0x1c7   : > { %v1414_v62 = vsel %vm1381_vm3, %v1413_v1, %v1412_v26  ;;  %v1448_v57 = vsel %vm1381_vm3, %v1447_v61, %v1446_v16  ;;  %v1539_v8 = vsel %vm1378_vm1, %v1538_v51, %v1537_v35  ;;  %v1516_v22 = vsel %vm1369_vm14, %v1515_v55, %v1514_v39 }
 0x1c8   : > { %1415 = vrot.lane.b32.xlu2 %v1414_v62, %s2148_s26  ;;  %1449 = vrot.lane.b32.xlu1 %v1448_v57, %s2150_s28  ;;  %v1540_v45 = vrot.slane %v2891_v41, 2  ;;  %v1518_v53 = vsel %vm1372_vm15, %v1517_v5, %v1516_v22  ;;  %v1491_v27 = vrot.slane %v2832_v10, 4  ;;  %v1580_v54 = vrot.slane %v2838_v50, 3  ;;  %s2156_s26 = smov 96   ;;  %s2158_s28 = smov 80  }
 0x1c9   : > { %v1520_v51 = vsel %vm1375_vm0, %v1519_v59, %v1518_v53  ;;  %v1490_v23 = vsel %vm1366_vm13, %v1489_v11, %v1488_v38  ;;  %v1584_v20 = vrot.slane %v2885_v42, 1  ;;  %v1563_v40 = vrot.slane %v2838_v50, 2 }
 0x1ca   : > { %v1541_v28 = vsel %vm1381_vm3, %v1540_v45, %v1539_v8  ;;  %v1523_v5 = vrot.slane %v2891_v41, 1  ;;  %v1492_v12 = vsel %vm1369_vm14, %v1491_v27, %v1490_v23  ;;  %v1581_v36 = vsel %vm1363_vm12, %v1580_v54, %v1579_v63 }
 0x1cb   : > { %v1522_v59 = vsel %vm1378_vm1, %v1521_v52, %v1520_v51  ;;  %v1494_v11 = vsel %vm1372_vm15, %v1493_v24, %v1492_v12  ;;  %v3151_v33 = vrot.slane %v2770_v58, 2  ;;  %v3152_v48 = vrot.slane %v2761_v47, 3 }
 0x1cc   : > { %v1496_v63 = vsel %vm1375_vm0, %v1495_v13, %v1494_v11  ;;  %v3153_v52 = vrot.slane %v2770_v58, 1  ;;  %v1546_v24 = vrot.slane %v2838_v50, 1  ;;  %v3154_v2 = vrot.slane %v2727_v56, 1 }
 0x1cd   : > { %v1583_v1 = vsel %vm1366_vm13, %v3151_v33, %v1581_v36  ;;  %v1564_v15 = vsel %vm1363_vm12, %v1563_v40, %v3152_v48  ;;  %v1549_v13 = vrot.slane %v2885_v42, 7  ;;  %v3155_v30 = vrot.slane %v2801_v4, 7 }
 0x1ce   : > { %v1585_v6 = vsel %vm1369_vm14, %v1584_v20, %v1583_v1  ;;  %v1566_v34 = vsel %vm1366_vm13, %v3153_v52, %v1564_v15  ;;  %v1498_v61 = vsel %vm1378_vm1, %v3154_v2, %v1496_v63  ;;  %1542 = vrot.lane.b32.xlu0 %v1541_v28, %s2155_s25  ;;  %v3156_v60 = vrot.slane %v2724_v19, 7 }
 0x1cf   : > { %v1586_v44 = vsel %vm1372_vm15, %v2724_v19, %v1585_v6  ;;  %v1567_v21 = vsel %vm1369_vm14, %v2885_v42, %v1566_v34  ;;  %v3157_v29 = vrot.slane %v2761_v47, 2  ;;  %v1622_v55 = vrot.slane %v2801_v4, 1 }
 0x1d0   : > { %v1588_v7 = vsel %vm1375_vm0, %v3155_v30, %v1586_v44  ;;  %v1569_v14 = vsel %vm1372_vm15, %v3156_v60, %v1567_v21  ;;  %v1524_v26 = vsel %vm1381_vm3, %v1523_v5, %v1522_v59  ;;  %v1499_v3 = vsel %vm1381_vm3, %v2840_v43, %v1498_v61 }
 0x1d1   : > { %v1547_v31 = vsel %vm1363_vm12, %v1546_v24, %v3157_v29  ;;  %v1591_v35 = vrot.slane %v2891_v41, 5  ;;  %1525 = vrot.lane.b32.xlu2 %v1524_v26, %s2154_s5  ;;  %1500 = vrot.lane.b32.xlu1 %v1499_v3, %s2153_s4  ;;  %v3158_v16 = vrot.slane %v2801_v4, 6  ;;  %v1574_v38 = vrot.slane %v2891_v41, 4  ;;  %s2161_s4 = smov 104   ;;  %s1798_s5 = sshll.u32 %s3183_s13, 1 }
 0x1d2   : > { %v1548_v49 = vsel %vm1366_vm13, %v2770_v58, %v1547_v31  ;;  %v1631_v57 = vrot.slane %v2838_v50, 6  ;;  %v3159_v8 = vrot.slane %v2747_v37, 6  ;;  %v3160_v45 = vrot.slane %v2724_v19, 6  ;;  %s226_s6 = sadd.s32 %s1798_s5, %s3185_s12 }
 0x1d3   : > { %v1571_v39 = vsel %vm1375_vm0, %v3158_v16, %v1569_v14  ;;  %v1550_v62 = vsel %vm1369_vm14, %v1549_v13, %v1548_v49  ;;  %v1635_v27 = vrot.slane %v2885_v42, 4  ;;  %v1614_v54 = vrot.slane %v2838_v50, 5  ;;  %s1799_s7 = sshll.u32 %s226_s6, 3 }
 0x1d4   : > { %v1590_v22 = vsel %vm1378_vm1, %v3159_v8, %v1588_v7  ;;  %v1552_v53 = vsel %vm1372_vm15, %v3160_v45, %v1550_v62  ;;  %v1557_v23 = vrot.slane %v2891_v41, 3  ;;  %v3161_v20 = vrot.slane %v2761_v47, 7  ;;  %s228_s10 = scalar_lea.vmem %s3150_s3, %s1799_s7 }
 0x1d5   : > { %v1554_v51 = vsel %vm1375_vm0, %v1553_v9, %v1552_v53  ;;  %v1618_v28 = vrot.slane %v2885_v42, 3  ;;  %v3162_v5 = vrot.slane %v2747_v37, 5  ;;  %v3163_v36 = vrot.slane %v2770_v58, 5 }
 0x1d6   : > { %v1632_v40 = vsel %vm1363_vm12, %v1631_v57, %v3161_v20  ;;  %v3164_v11 = vrot.slane %v2761_v47, 6  ;;  %v1597_v33 = vrot.slane %v2838_v50, 4  ;;  %v3165_v1 = vrot.slane %v2747_v37, 4 }
 0x1d7   : > { %v1573_v12 = vsel %vm1378_vm1, %v3162_v5, %v1571_v39  ;;  %v1634_v59 = vsel %vm1366_vm13, %v3163_v36, %v1632_v40  ;;  %v3166_v63 = vrot.slane %v2770_v58, 4  ;;  %v1601_v52 = vrot.slane %v2885_v42, 2 }
 0x1d8   : > { %v1615_v9 = vsel %vm1363_vm12, %v1614_v54, %v3164_v11  ;;  %v1556_v48 = vsel %vm1378_vm1, %v3165_v1, %v1554_v51  ;;  %v1636_v15 = vsel %vm1369_vm14, %v1635_v27, %v1634_v59  ;;  %v1592_v34 = vsel %vm1381_vm3, %v1591_v35, %v1590_v22 }
 0x1d9   : > { %v1617_v6 = vsel %vm1366_vm13, %v3166_v63, %v1615_v9  ;;  %v3167_v24 = vrot.slane %v2724_v19, 3  ;;  %v3168_v61 = vrot.slane %v2761_v47, 5  ;;  %1593 = vrot.lane.b32.xlu0 %v1592_v34, %s2156_s26  ;;  %v1575_v21 = vsel %vm1381_vm3, %v1574_v38, %v1573_v12 }
 0x1da   : > { %v1619_v50 = vsel %vm1369_vm14, %v1618_v28, %v1617_v6  ;;  %v3169_v13 = vrot.slane %v2724_v19, 2  ;;  %v3170_v30 = vrot.slane %v2770_v58, 3  ;;  %v1362_v60 = vrot.slane %v2799_v18, 7  ;;  %1576 = vrot.lane.b32.xlu2 %v1575_v21, %s2157_s27 }
 0x1db   : > { %v1638_v2 = vsel %vm1372_vm15, %v3167_v24, %v1636_v15  ;;  %v1598_v44 = vsel %vm1363_vm12, %v1597_v33, %v3168_v61  ;;  %v1558_v14 = vsel %vm1381_vm3, %v1557_v23, %v1556_v48  ;;  %v1368_v31 = vrot.slane %v2832_v10, 5 }
 0x1dc   : > { %v1621_v42 = vsel %vm1372_vm15, %v3169_v13, %v1619_v50  ;;  %v1600_v7 = vsel %vm1366_vm13, %v3170_v30, %v1598_v44  ;;  %v1640_v47 = vsel %vm1375_vm0, %v1639_v32, %v1638_v2  ;;  %1559 = vrot.lane.b32.xlu1 %v1558_v14, %s2158_s28  ;;  %v1641_v58 = vrot.slane %v2747_v37, 1 }
 0x1dd   : > { %v1602_v29 = vsel %vm1369_vm14, %v1601_v52, %v1600_v7  ;;  %v3171_v26 = vrot.slane %v2724_v19, 1  ;;  %v1365_v3 = vrot.slane %v2756_v46, 6  ;;  %v1623_v35 = vsel %vm1375_vm0, %v1622_v55, %v1621_v42 }
 0x1de   : > { %v1364_v10 = vsel %vm1363_vm12, %v1362_v60, %v2738_v25  ;;  %v1642_v49 = vsel %vm1378_vm1, %v1641_v58, %v1640_v47  ;;  %v1606_v16 = vrot.slane %v2747_v37, 7  ;;  %v1371_v19 = vrot.slane %v2721_v17, 4 }
 0x1df   : > { %v1604_v18 = vsel %vm1372_vm15, %v3171_v26, %v1602_v29  ;;  %v1367_v39 = vsel %vm1366_vm13, %v1365_v3, %v1364_v10  ;;  %v1374_v46 = vrot.slane %v2787_v0, 3  ;;  %v1377_v55 = vrot.slane %v2727_v56, 2 }
 0x1e0   : > { %v1605_v32 = vsel %vm1375_vm0, %v2801_v4, %v1604_v18  ;;  %v1370_v38 = vsel %vm1369_vm14, %v1368_v31, %v1367_v39  ;;  %v1624_v4 = vsel %vm1378_vm1, %v2747_v37, %v1623_v35  ;;  %v1625_v62 = vrot.slane %v2891_v41, 7 }
 0x1e1   : > { %v1607_v25 = vsel %vm1378_vm1, %v1606_v16, %v1605_v32  ;;  %v1373_v57 = vsel %vm1372_vm15, %v1371_v19, %v1370_v38  ;;  %v1643_v8 = vsel %vm1381_vm3, %v2891_v41, %v1642_v49  ;;  %v1608_v17 = vrot.slane %v2891_v41, 6 }
 0x1e2   : > { %v1376_v22 = vsel %vm1375_vm0, %v1374_v46, %v1373_v57  ;;  %v1380_v0 = vrot.slane %v2840_v43, 1  ;;  %1644 = vrot.lane.b32.xlu0 %v1643_v8, %s2159_s29  ;;  %v1626_v37 = vsel %vm1381_vm3, %v1625_v62, %v1624_v4 }
 0x1e3   : > { %v1379_v56 = vsel %vm1378_vm1, %v1377_v55, %v1376_v22  ;;  %v1609_v45 = vsel %vm1381_vm3, %v1608_v17, %v1607_v25  ;;  %1627 = vrot.lane.b32.xlu2 %v1626_v37, %s2160_s30 }
 0x1e4   : > { %v1382_v53 = vsel %vm1381_vm3, %v1380_v0, %v1379_v56  ;;  %1610 = vrot.lane.b32.xlu1 %v1609_v45, %s2161_s4 }
 0x21a   : > { %v1467_v27 = vpop.permute.xlu2 %1466 }
 0x222   : > { %v1416_v51 = vpop.permute.xlu2 %1415 }
 0x22b   : > { %v1526_v12 = vpop.permute.xlu2 %1525 }
 0x230   : > { %v1433_v41 = vpop.permute.xlu0 %1432 }
 0x232   : > { %v1399_v54 = vpop.permute.xlu1 %1398 }
 0x233   : > { %v1647_v43 = vsel %vm1092_vm2, %v1382_v53, %v1399_v54  ;;  %vm1656_vm2 = vcmask 654336  }
 0x234   : > { %v1648_v20 = vsel %vm1109_vm4, %v1647_v43, %v1416_v51  ;;  %v1577_v48 = vpop.permute.xlu2 %1576  ;;  %vm1658_vm4 = vcmask 719872  }
 0x235   : > { %v1649_v28 = vsel %vm1126_vm5, %v1648_v20, %v1433_v41  ;;  %vm1660_vm5 = vcmask 785408  }
 0x238   : > { %v1484_v23 = vpop.permute.xlu0 %1483 }
 0x23a   : > { %v1450_v40 = vpop.permute.xlu1 %1449 }
 0x23b   : > { %v1650_v5 = vsel %vm1143_vm6, %v1649_v28, %v1450_v40  ;;  %vm1662_vm6 = vcmask 850944  }
 0x23c   : > { %v1651_v59 = vsel %vm1160_vm7, %v1650_v5, %v1467_v27  ;;  %vm1664_vm7 = vcmask 916480  }
 0x23d   : > { %v1652_v9 = vsel %vm1177_vm8, %v1651_v59, %v1484_v23  ;;  %vm1666_vm8 = vcmask 982016   ;;  %v1628_v50 = vpop.permute.xlu2 %1627 }
 0x240   : > { %v1543_v36 = vpop.permute.xlu0 %1542 }
 0x243   : > { %v1501_v11 = vpop.permute.xlu1 %1500 }
 0x244   : > { %v1653_v33 = vsel %vm1194_vm9, %v1652_v9, %v1501_v11 }
 0x245   : > { %v1654_v1 = vsel %vm1211_vm10, %v1653_v33, %v1526_v12 }
 0x246   : > { %v1655_v6 = vsel %vm1268_vm11, %v1654_v1, %v1543_v36 }
 0x24b   : > { %v1594_v15 = vpop.permute.xlu0 %1593 }
 0x24e   : > { %v1560_v63 = vpop.permute.xlu1 %1559 }
 0x24f   : > { %v1657_v52 = vsel %vm1656_vm2, %v1655_v6, %v1560_v63 }
 0x250   : > { %v1659_v34 = vsel %vm1658_vm4, %v1657_v52, %v1577_v48 }
 0x251   : > { %v1661_v2 = vsel %vm1660_vm5, %v1659_v34, %v1594_v15 }
 0x254   : > { %v1645_v44 = vpop.permute.xlu0 %1644 }
 0x256   : > { %v1611_v24 = vpop.permute.xlu1 %1610 }
 0x257   : > { %v1663_v61 = vsel %vm1662_vm6, %v1661_v2, %v1611_v24 }
 0x258   : > { %v1665_v21 = vsel %vm1664_vm7, %v1663_v61, %v1628_v50 }
 0x259   : > { %v1667_v13 = vsel %vm1666_vm8, %v1665_v21, %v1645_v44 }
 0x25a   : > { %1668 = vst [vmem:[%s228_s10] sm:$0xff] %v1667_v13 }
 0x25b PF: > { %s13_s16 = sadd.s32 1, %s2145_s16   ;;  %s3172_s12 = smov %s2137_s14 }
 0x25c   : > { %p10_p7 = scmp.ge.s32.totalorder %s13_s16, 6   ;;  %s3173_s13 = smov %s2141_s15 }
 0x25d   : > { %s3174_s14 = smov %s3177_s17  ;;  %s3175_s15 = smov %s3181_s18 }
 0x25e   :  { %12 = sbr.rel (!%p10_p7) target bundleno = 3 (0x3), region = 71 }

</bundles_post_ra>
